<compile_context>
chip_gen: v7x
topology: tpu7x:2x2x1
jax: 0.10.0
libtpu: 0.0.40
codegen_flags: <defaults>
</compile_context>

<pallas_src>
import jax
import jax.numpy as jnp
from jax.experimental import pallas as pl
from jax.experimental.pallas import tpu as pltpu

EPS = 1e-5   # BatchNorm1d / InstanceNorm1d default eps
LANE = 128


def make_class_block_kernel(block_b, seq_len, half, nin):
    def kernel(x_ref, w1_ref, sc_ref, sh_ref, gin_ref, bin_ref,
               w2bn_ref, w2in_ref, b2_ref, o_ref):
        m = block_b * seq_len
        x = x_ref[...].reshape(m, x_ref.shape[-1])                    # (m, D)

        # add_block Linear (bias folded away) — MXU, f32 accumulation.
        y = jnp.dot(x, w1_ref[...], preferred_element_type=jnp.float32)   # (m, NB) f32

        # BatchNorm1d half (eval): prefolded per-channel scale/shift.
        bn_out = y[:, :half] * sc_ref[...] + sh_ref[...]              # (m, half)

        # InstanceNorm1d half: stats over L per (batch, channel), biased var, f32.
        y_in = y[:, half:].reshape(block_b, seq_len, nin)
        mu = jnp.mean(y_in, axis=1, keepdims=True)
        var = jnp.mean(jnp.square(y_in - mu), axis=1, keepdims=True)
        in_out = (y_in - mu) * jax.lax.rsqrt(var + EPS)
        in_out = (in_out * gin_ref[...] + bin_ref[...]).reshape(m, nin)

        # classifier Linear, split along K — avoids a lane-axis concatenate.
        cdt = w2bn_ref.dtype
        z = (jnp.dot(bn_out.astype(cdt), w2bn_ref[...],
                     preferred_element_type=jnp.float32)
             + jnp.dot(in_out.astype(cdt), w2in_ref[...],
                       preferred_element_type=jnp.float32)
             + b2_ref[...])                                           # (m, Cpad) f32
        o_ref[...] = z.reshape(o_ref.shape).astype(o_ref.dtype)

    return kernel


def _round_up(n, m):
    return ((n + m - 1) // m) * m


def _choose_block_b(batch, seq_len, feat, itemsize,
                    target_rows=256, max_block_bytes=8 << 20):
    """Largest divisor of `batch` keeping ~target_rows matmul rows per grid step."""
    best = 1
    for bt in range(1, batch + 1):
        if batch % bt:
            continue
        if bt * seq_len > max(target_rows, seq_len):
            continue
        if bt > 1 and bt * seq_len * feat * itemsize > max_block_bytes:
            continue
        best = bt
    return best


def fold_params(params, compute_dtype=jnp.float32, lane=LANE):
    """Fold eval-mode BN (+ first Linear bias) into scale/shift; pad & split W2."""
    (w1t, b1, rm, rv, gbn, bbn, gin, bin_, w2t, b2) = params
    half = rm.shape[-1]
    c = w2t.shape[1]
    cpad = _round_up(c, lane)
    scale = gbn * jax.lax.rsqrt(rv + EPS)
    shift = bbn + (b1[:, :half] - rm) * scale   # absorbs Linear bias on the BN half
    # Linear bias on the IN half cancels in the mean subtraction -> dropped.
    w2p = jnp.pad(w2t, ((0, 0), (0, cpad - c)))
    b2p = jnp.pad(b2, ((0, 0), (0, cpad - c)))
    folded = (w1t.astype(compute_dtype), scale, shift, gin, bin_,
              w2p[:half].astype(compute_dtype), w2p[half:].astype(compute_dtype),
              b2p)
    return folded, c, cpad, half


def class_block_forward(x, params, *, compute_dtype=jnp.float32, block_b=None):
    batch, seq_len, feat = x.shape
    folded, c, cpad, half = fold_params(params, compute_dtype)
    (w1c, scale, shift, gin, bin_, w2bn, w2in, b2p) = folded
    nb = w1c.shape[1]
    nin = nb - half

    if block_b is None:
        block_b = _choose_block_b(batch, seq_len, feat,
                                  jnp.dtype(compute_dtype).itemsize)
    assert batch % block_b == 0, "batch must be divisible by block_b"
    grid = (batch // block_b,)

    xc = x.astype(compute_dtype)
    const = lambda b: (0, 0)
    kernel = make_class_block_kernel(block_b, seq_len, half, nin)

    out_padded = pl.pallas_call(
        kernel,
        out_shape=jax.ShapeDtypeStruct((batch, seq_len, cpad), x.dtype),
        grid_spec=pltpu.PrefetchScalarGridSpec(
            num_scalar_prefetch=0,
            grid=grid,
            in_specs=[
                pl.BlockSpec((block_b, seq_len, feat), lambda b: (b, 0, 0)),  # x tile
                pl.BlockSpec((feat, nb), const),      # W1^T   (compute dtype)
                pl.BlockSpec((1, half), const),       # BN folded scale (f32)
                pl.BlockSpec((1, half), const),       # BN folded shift (f32)
                pl.BlockSpec((1, nin), const),        # IN weight (f32)
                pl.BlockSpec((1, nin), const),        # IN bias (f32)
                pl.BlockSpec((half, cpad), const),    # W2^T rows [0:half)
                pl.BlockSpec((nin, cpad), const),     # W2^T rows [half:NB)
                pl.BlockSpec((1, cpad), const),       # b2 (lane-padded, f32)
            ],
            out_specs=pl.BlockSpec((block_b, seq_len, cpad), lambda b: (b, 0, 0)),
        ),
        compiler_params=pltpu.CompilerParams(
            dimension_semantics=("parallel",)),
    )(xc, w1c, scale, shift, gin, bin_, w2bn, w2in, b2p)

    return out_padded[..., :c]


def init_params(key, input_dim, class_num, num_bottleneck=256, ratio=0.5):
    half = int(num_bottleneck * (1.0 - ratio))                  # 128 for NB=256
    k1, k2 = jax.random.split(key)
    # add_block Linear: kaiming_normal_(a=0, mode='fan_out') -> std = sqrt(2/NB)
    w1 = jax.random.normal(k1, (num_bottleneck, input_dim), jnp.float32) \
        * jnp.sqrt(2.0 / num_bottleneck)
    b1 = jnp.zeros((1, num_bottleneck), jnp.float32)
    # IBN.BN defaults (not touched by weights_init_kaiming in the module)
    rm = jnp.zeros((1, half), jnp.float32)
    rv = jnp.ones((1, half), jnp.float32)
    gbn = jnp.ones((1, half), jnp.float32)
    bbn = jnp.zeros((1, half), jnp.float32)
    # IBN.IN defaults (affine=True)
    gin = jnp.ones((1, num_bottleneck - half), jnp.float32)
    bin_ = jnp.zeros((1, num_bottleneck - half), jnp.float32)
    # classifier Linear: normal std=0.001, bias 0
    w2 = jax.random.normal(k2, (class_num, num_bottleneck), jnp.float32) * 0.001
    b2 = jnp.zeros((1, class_num), jnp.float32)
    return (w1.T, b1, rm, rv, gbn, bbn, gin, bin_, w2.T, b2)


def class_block_reference(x, params):
    """Pure-JAX reference of the eval-mode forward (for verification)."""
    (w1t, b1, rm, rv, gbn, bbn, gin, bin_, w2t, b2) = params
    half = rm.shape[-1]
    y = x @ w1t + b1                                            # (B, L, NB)
    y_bn, y_in = y[..., :half], y[..., half:]
    bn_out = (y_bn - rm) / jnp.sqrt(rv + EPS) * gbn + bbn
    mu = jnp.mean(y_in, axis=1, keepdims=True)
    var = jnp.mean((y_in - mu) ** 2, axis=1, keepdims=True)
    in_out = (y_in - mu) / jnp.sqrt(var + EPS) * gin + bin_
    h = jnp.concatenate([bn_out, in_out], axis=-1)
    return h @ w2t + b2


if __name__ == "__main__":
    # image branch of Baseline: ClassBlock(2*512, 15); small B, L for the demo.
    B, L, INPUT_DIM, CLASS_NUM, NB = 16, 32, 1024, 15, 256

    key = jax.random.PRNGKey(0)
    kx, kp = jax.random.split(key)
    x = jax.random.normal(kx, (B, L, INPUT_DIM), jnp.float32)
    params = init_params(kp, INPUT_DIM, CLASS_NUM, num_bottleneck=NB)

    ref = class_block_reference(x, params)

    # f32 MXU operands (safe default on all generations).
    out_f32 = jax.block_until_ready(class_block_forward(x, params))
    assert out_f32.shape == (B, L, CLASS_NUM)
    assert jnp.allclose(out_f32, ref, atol=2e-4, rtol=2e-3), "f32 kernel mismatch"

    # bf16 MXU operands (v6e/v7x throughput path); norm math / accumulators stay f32.
    out_bf16 = jax.block_until_ready(
        class_block_forward(x, params, compute_dtype=jnp.bfloat16))
    assert out_bf16.shape == (B, L, CLASS_NUM)
    assert jnp.allclose(out_bf16, ref, atol=5e-3, rtol=5e-2), "bf16 kernel mismatch"

    print("KERNEL_OK")
</pallas_src>

<mosaic_0001>
module attributes {stable_mosaic.version = 11 : i64} {
  func.func @kernel(%arg0: i32, %arg1: memref<8x32x1024xf32, #tpu.memory_space<vmem>>, %arg2: memref<1024x256xf32, #tpu.memory_space<vmem>>, %arg3: memref<1x128xf32, #tpu.memory_space<vmem>>, %arg4: memref<1x128xf32, #tpu.memory_space<vmem>>, %arg5: memref<1x128xf32, #tpu.memory_space<vmem>>, %arg6: memref<1x128xf32, #tpu.memory_space<vmem>>, %arg7: memref<128x128xf32, #tpu.memory_space<vmem>>, %arg8: memref<128x128xf32, #tpu.memory_space<vmem>>, %arg9: memref<1x128xf32, #tpu.memory_space<vmem>>, %arg10: memref<8x32x128xf32, #tpu.memory_space<vmem>>) attributes {dimension_semantics = [#tpu.dimension_semantics<parallel>], iteration_bounds = array<i64: 2>, scalar_prefetch = 0 : i64, scratch_operands = 0 : i64, tpu.core_type = #tpu.core_type<tc>, window_params = [{transform_indices = @transform_0, window_bounds = array<i64: 8, 32, 1024>}, {pipeline_mode = #tpu.pipeline_mode<synchronous>, transform_indices = @transform_1, window_bounds = array<i64: 1024, 256>}, {pipeline_mode = #tpu.pipeline_mode<synchronous>, transform_indices = @transform_2, window_bounds = array<i64: 1, 128>}, {pipeline_mode = #tpu.pipeline_mode<synchronous>, transform_indices = @transform_3, window_bounds = array<i64: 1, 128>}, {pipeline_mode = #tpu.pipeline_mode<synchronous>, transform_indices = @transform_4, window_bounds = array<i64: 1, 128>}, {pipeline_mode = #tpu.pipeline_mode<synchronous>, transform_indices = @transform_5, window_bounds = array<i64: 1, 128>}, {pipeline_mode = #tpu.pipeline_mode<synchronous>, transform_indices = @transform_6, window_bounds = array<i64: 128, 128>}, {pipeline_mode = #tpu.pipeline_mode<synchronous>, transform_indices = @transform_7, window_bounds = array<i64: 128, 128>}, {pipeline_mode = #tpu.pipeline_mode<synchronous>, transform_indices = @transform_8, window_bounds = array<i64: 1, 128>}, {transform_indices = @transform_9, window_bounds = array<i64: 8, 32, 128>}]} {
    %c0 = arith.constant 0 : index
    %c0_0 = arith.constant 0 : index
    %c0_1 = arith.constant 0 : index
    %0 = vector.load %arg1[%c0, %c0_0, %c0_1] : memref<8x32x1024xf32, #tpu.memory_space<vmem>>, vector<8x32x1024xf32>
    %1 = vector.shape_cast %0 : vector<8x32x1024xf32> to vector<256x1024xf32>
    %c0_2 = arith.constant 0 : index
    %c0_3 = arith.constant 0 : index
    %2 = vector.load %arg2[%c0_2, %c0_3] : memref<1024x256xf32, #tpu.memory_space<vmem>>, vector<1024x256xf32>
    %cst = arith.constant dense<0.000000e+00> : vector<256x256xf32>
    %3 = tpu.matmul %1, %2, %cst {dimension_numbers = #tpu.dot_dimension_numbers<[1], [0], [0], [1], [0, 0, 1, 1], [], []>} : vector<256x1024xf32>, vector<1024x256xf32>, vector<256x256xf32> -> vector<256x256xf32>
    %4 = vector.extract_strided_slice %3 {offsets = [0, 0], sizes = [256, 128], strides = [1, 1]} : vector<256x256xf32> to vector<256x128xf32>
    %c0_4 = arith.constant 0 : index
    %c0_5 = arith.constant 0 : index
    %5 = vector.load %arg3[%c0_4, %c0_5] : memref<1x128xf32, #tpu.memory_space<vmem>>, vector<1x128xf32>
    %6 = vector.broadcast %5 : vector<1x128xf32> to vector<256x128xf32>
    %7 = arith.mulf %4, %6 : vector<256x128xf32>
    %c0_6 = arith.constant 0 : index
    %c0_7 = arith.constant 0 : index
    %8 = vector.load %arg4[%c0_6, %c0_7] : memref<1x128xf32, #tpu.memory_space<vmem>>, vector<1x128xf32>
    %9 = vector.broadcast %8 : vector<1x128xf32> to vector<256x128xf32>
    %10 = arith.addf %7, %9 : vector<256x128xf32>
    %11 = vector.extract_strided_slice %3 {offsets = [0, 128], sizes = [256, 128], strides = [1, 1]} : vector<256x256xf32> to vector<256x128xf32>
    %12 = vector.shape_cast %11 : vector<256x128xf32> to vector<8x32x128xf32>
    %cst_8 = arith.constant dense<0.000000e+00> : vector<8x128xf32>
    %13 = vector.multi_reduction <add>, %12, %cst_8 [1] : vector<8x32x128xf32> to vector<8x128xf32>
    %14 = vector.shape_cast %13 : vector<8x128xf32> to vector<8x1x128xf32>
    %cst_9 = arith.constant 3.200000e+01 : f32
    %15 = vector.broadcast %cst_9 : f32 to vector<8x1x128xf32>
    %16 = arith.divf %14, %15 : vector<8x1x128xf32>
    %17 = vector.broadcast %16 : vector<8x1x128xf32> to vector<8x32x128xf32>
    %18 = arith.subf %12, %17 : vector<8x32x128xf32>
    %19 = arith.mulf %18, %18 : vector<8x32x128xf32>
    %cst_10 = arith.constant dense<0.000000e+00> : vector<8x128xf32>
    %20 = vector.multi_reduction <add>, %19, %cst_10 [1] : vector<8x32x128xf32> to vector<8x128xf32>
    %21 = vector.shape_cast %20 : vector<8x128xf32> to vector<8x1x128xf32>
    %cst_11 = arith.constant 3.200000e+01 : f32
    %22 = vector.broadcast %cst_11 : f32 to vector<8x1x128xf32>
    %23 = arith.divf %21, %22 : vector<8x1x128xf32>
    %24 = vector.broadcast %16 : vector<8x1x128xf32> to vector<8x32x128xf32>
    %25 = arith.subf %12, %24 : vector<8x32x128xf32>
    %cst_12 = arith.constant 9.99999974E-6 : f32
    %26 = vector.broadcast %cst_12 : f32 to vector<8x1x128xf32>
    %27 = arith.addf %23, %26 : vector<8x1x128xf32>
    %28 = math.rsqrt %27 : vector<8x1x128xf32>
    %29 = vector.broadcast %28 : vector<8x1x128xf32> to vector<8x32x128xf32>
    %30 = arith.mulf %25, %29 : vector<8x32x128xf32>
    %c0_13 = arith.constant 0 : index
    %c0_14 = arith.constant 0 : index
    %31 = vector.load %arg5[%c0_13, %c0_14] : memref<1x128xf32, #tpu.memory_space<vmem>>, vector<1x128xf32>
    %32 = vector.shape_cast %31 : vector<1x128xf32> to vector<1x1x128xf32>
    %33 = vector.broadcast %32 : vector<1x1x128xf32> to vector<8x32x128xf32>
    %34 = arith.mulf %30, %33 : vector<8x32x128xf32>
    %c0_15 = arith.constant 0 : index
    %c0_16 = arith.constant 0 : index
    %35 = vector.load %arg6[%c0_15, %c0_16] : memref<1x128xf32, #tpu.memory_space<vmem>>, vector<1x128xf32>
    %36 = vector.shape_cast %35 : vector<1x128xf32> to vector<1x1x128xf32>
    %37 = vector.broadcast %36 : vector<1x1x128xf32> to vector<8x32x128xf32>
    %38 = arith.addf %34, %37 : vector<8x32x128xf32>
    %39 = vector.shape_cast %38 : vector<8x32x128xf32> to vector<256x128xf32>
    %c0_17 = arith.constant 0 : index
    %c0_18 = arith.constant 0 : index
    %40 = vector.load %arg7[%c0_17, %c0_18] : memref<128x128xf32, #tpu.memory_space<vmem>>, vector<128x128xf32>
    %cst_19 = arith.constant dense<0.000000e+00> : vector<256x128xf32>
    %41 = tpu.matmul %10, %40, %cst_19 {dimension_numbers = #tpu.dot_dimension_numbers<[1], [0], [0], [1], [0, 0, 1, 1], [], []>} : vector<256x128xf32>, vector<128x128xf32>, vector<256x128xf32> -> vector<256x128xf32>
    %c0_20 = arith.constant 0 : index
    %c0_21 = arith.constant 0 : index
    %42 = vector.load %arg8[%c0_20, %c0_21] : memref<128x128xf32, #tpu.memory_space<vmem>>, vector<128x128xf32>
    %cst_22 = arith.constant dense<0.000000e+00> : vector<256x128xf32>
    %43 = tpu.matmul %39, %42, %cst_22 {dimension_numbers = #tpu.dot_dimension_numbers<[1], [0], [0], [1], [0, 0, 1, 1], [], []>} : vector<256x128xf32>, vector<128x128xf32>, vector<256x128xf32> -> vector<256x128xf32>
    %44 = arith.addf %41, %43 : vector<256x128xf32>
    %c0_23 = arith.constant 0 : index
    %c0_24 = arith.constant 0 : index
    %45 = vector.load %arg9[%c0_23, %c0_24] : memref<1x128xf32, #tpu.memory_space<vmem>>, vector<1x128xf32>
    %46 = vector.broadcast %45 : vector<1x128xf32> to vector<256x128xf32>
    %47 = arith.addf %44, %46 : vector<256x128xf32>
    %48 = vector.shape_cast %47 : vector<256x128xf32> to vector<8x32x128xf32>
    %c0_25 = arith.constant 0 : index
    %c0_26 = arith.constant 0 : index
    %c0_27 = arith.constant 0 : index
    %49 = vector.load %arg10[%c0_25, %c0_26, %c0_27] : memref<8x32x128xf32, #tpu.memory_space<vmem>>, vector<8x32x128xf32>
    tpu.vector_store %arg10[%c0_25, %c0_26, %c0_27], %48 {strides = array<i32>} : memref<8x32x128xf32, #tpu.memory_space<vmem>>, vector<8x32x128xf32>,
    return
  }
  func.func @transform_0(%arg0: i32) -> (i32, i32, i32) {
    %c0_i32 = arith.constant 0 : i32
    %c0_i32_0 = arith.constant 0 : i32
    %c0_i32_1 = arith.constant 0 : i32
    return %arg0, %c0_i32, %c0_i32_0 : i32, i32, i32
  }
  func.func @transform_1(%arg0: i32) -> (i32, i32) {
    %c0_i32 = arith.constant 0 : i32
    %c0_i32_0 = arith.constant 0 : i32
    %c0_i32_1 = arith.constant 0 : i32
    return %c0_i32, %c0_i32_0 : i32, i32
  }
  func.func @transform_2(%arg0: i32) -> (i32, i32) {
    %c0_i32 = arith.constant 0 : i32
    %c0_i32_0 = arith.constant 0 : i32
    %c0_i32_1 = arith.constant 0 : i32
    return %c0_i32, %c0_i32_0 : i32, i32
  }
  func.func @transform_3(%arg0: i32) -> (i32, i32) {
    %c0_i32 = arith.constant 0 : i32
    %c0_i32_0 = arith.constant 0 : i32
    %c0_i32_1 = arith.constant 0 : i32
    return %c0_i32, %c0_i32_0 : i32, i32
  }
  func.func @transform_4(%arg0: i32) -> (i32, i32) {
    %c0_i32 = arith.constant 0 : i32
    %c0_i32_0 = arith.constant 0 : i32
    %c0_i32_1 = arith.constant 0 : i32
    return %c0_i32, %c0_i32_0 : i32, i32
  }
  func.func @transform_5(%arg0: i32) -> (i32, i32) {
    %c0_i32 = arith.constant 0 : i32
    %c0_i32_0 = arith.constant 0 : i32
    %c0_i32_1 = arith.constant 0 : i32
    return %c0_i32, %c0_i32_0 : i32, i32
  }
  func.func @transform_6(%arg0: i32) -> (i32, i32) {
    %c0_i32 = arith.constant 0 : i32
    %c0_i32_0 = arith.constant 0 : i32
    %c0_i32_1 = arith.constant 0 : i32
    return %c0_i32, %c0_i32_0 : i32, i32
  }
  func.func @transform_7(%arg0: i32) -> (i32, i32) {
    %c0_i32 = arith.constant 0 : i32
    %c0_i32_0 = arith.constant 0 : i32
    %c0_i32_1 = arith.constant 0 : i32
    return %c0_i32, %c0_i32_0 : i32, i32
  }
  func.func @transform_8(%arg0: i32) -> (i32, i32) {
    %c0_i32 = arith.constant 0 : i32
    %c0_i32_0 = arith.constant 0 : i32
    %c0_i32_1 = arith.constant 0 : i32
    return %c0_i32, %c0_i32_0 : i32, i32
  }
  func.func @transform_9(%arg0: i32) -> (i32, i32, i32) {
    %c0_i32 = arith.constant 0 : i32
    %c0_i32_0 = arith.constant 0 : i32
    %c0_i32_1 = arith.constant 0 : i32
    return %arg0, %c0_i32, %c0_i32_0 : i32, i32, i32
  }
}

</mosaic_0001>

<bundles_post_ra>
// kernel: tpu_custom_call.1
= control target key start
LH: loop header
LB: loop body
LE: loop exit
PB: predicated region body
PF: predicated region fallthrough
CT: control target
= control target key end

     0   :  { %s6065_s0 = inlined_call_operand.hbm [shape: f32[16,32,1024], index: 0, kind: input, shape index: {}]   ;;  %s6066_s1 = inlined_call_operand.hbm [shape: f32[1024,256], index: 1, kind: input, shape index: {}]   ;;  %s6067_s2 = inlined_call_operand.hbm [shape: f32[1,128], index: 2, kind: input, shape index: {}]   ;;  %s6068_s3 = inlined_call_operand.hbm [shape: f32[1,128], index: 3, kind: input, shape index: {}]   ;;  %s6069_s4 = inlined_call_operand.hbm [shape: f32[1,128], index: 4, kind: input, shape index: {}]   ;;  %s6070_s5 = inlined_call_operand.hbm [shape: f32[1,128], index: 5, kind: input, shape index: {}]   ;;  %s6071_s6 = inlined_call_operand.hbm [shape: f32[128,128], index: 6, kind: input, shape index: {}]   ;;  %s6072_s7 = inlined_call_operand.hbm [shape: f32[128,128], index: 7, kind: input, shape index: {}]   ;;  %s6073_s8 = inlined_call_operand.hbm [shape: f32[1,128], index: 8, kind: input, shape index: {}]   ;;  %s6074_s9 = inlined_call_operand.hbm [shape: f32[16,32,128], index: 9, kind: output, shape index: {}]  }
   0x1   :  { %6080 = sst [smem:[#allocation47_spill]] %s6074_s9 }
   0x2   :  { %14 = vsyncpa [#allocation3], 0 }
   0x3   :  { %16 = vsyncpa [#allocation3 + $0x1], 0 }
   0x4   :  { %17 = vsyncpa [#allocation6], 0 }
   0x5   :  { %18 = vsyncpa [#allocation9], 0 }
   0x6   :  { %19 = vsyncpa [#allocation12], 0 }
   0x7   :  { %20 = vsyncpa [#allocation15], 0 }
   0x8   :  { %21 = vsyncpa [#allocation4], 0 }
   0x9   :  { %23 = vsyncpa [#allocation4 + $0x1], 0  ;;  %s4576_s30 = smov 0   ;;  %s4578_s10 = smov 0  }
   0xa   :  { %s4580_s11 = smov 0   ;;  %s4582_s12 = smov 0  }
   0xb LB: > { %s4508_s13 = smov [#allocation5]   ;;  %s4597_s15 = sadd.s32 4294967295, %s4506_s12   ;;  %s4506_s12 = sphi %s4582_s12, %s6153_s12   ;;  %s4502_s11 = sphi %s4580_s11, %s6152_s11   ;;  %s4498_s10 = sphi %s4578_s10, %s6151_s10   ;;  %s4494_s30 = sphi %s4576_s30, %s6150_s30  }
   0xc   : > { %s266_s14 = sshll.u32 %s4508_s13, 4  ;;  %p3147_p0 = scmp.ge.s32.totalorder %s4506_s12, 1  ;;  %s4602_s14 = int_to_ptr.vmem [resolvable:$true] %s266_s14 }
   0xd   : > { %p6076_p1 = scmp.eq.s32.totalorder %s4597_s15, 0  ;;  %p254_p2 = scmp.lt.s32.totalorder %s4506_s12, 3 }
   0xe   : > { %s4509_s17 = smov [#allocation8]   ;;  %s4510_s20 = smov [#allocation11]  }
   0xf   : > { %p4604_p3 = pnand %p3147_p0, %p254_p2  ;;  %s291_s18 = sshll.u32 %s4509_s17, 4  ;;  %s4617_s18 = int_to_ptr.vmem [resolvable:$true] %s291_s18 }
  0x10   : > { %s313_s21 = sshll.u32 %s4510_s20, 4  ;;  %s4170_s24 = scalar_lea.hbm %s6066_s1, 32768  ;;  %s4619_s21 = int_to_ptr.vmem [resolvable:$true] %s313_s21 }
  0x11   : > { %s6081_s16 = scalar_select %p4604_p3, 1, 0 }
  0x12   : > { %p4055_p5 = pneg %p4604_p3  ;;  %p4171_p7 = scmp.ne.s32.totalorder %s6066_s1, %s4170_s24 }
  0x13   : > { %p4177_p11 = scmp.lt.u32.totalorder %s4170_s24, %s6066_s1 }
  0x14   : > { %p4613_p6 = pnand %p4055_p5, %p6076_p1 }
  0x16   : > { %p4629_p8 = pneg %p4613_p6 }
  0x18   : > { %p4173_p9 = pnand %p4629_p8, %p4171_p7 }
  0x1a   : > { %p4174_p10 = pneg %p4173_p9 }
  0x1c   : > { %p4179_p12 = pnand %p4177_p11, %p4174_p10 }
  0x1e   : > { %4182 = shalt.err (!%p4179_p12)
}
  0x1f   : > { %s4183_s13 = scalar_lea.vmem %s4602_s14, 32768  ;;  %p4191_p5 = scmp.lt.s32.totalorder %s4602_s14, %s4602_s14 }
  0x20   : > { %p4184_p13 = scmp.ne.s32.totalorder %s4602_s14, %s4183_s13  ;;  %p4192_p4 = scmp.lt.s32.totalorder %s4183_s13, %s4183_s13 }
  0x22   : > { %p4186_p0 = pnand %p4184_p13, %p4629_p8  ;;  %p4193_p7 = por %p4192_p4, %p4191_p5 }
  0x24   : > { %p4187_p2 = pneg %p4186_p0 }
  0x26   : > { %p4194_p9 = pnand %p4193_p7, %p4187_p2 }
  0x28   : > { %4197 = shalt.err (!%p4194_p9)
}
  0x29   : > { %s4511_s17 = smov 256   ;;  %s4512_s20 = smov 16  }
  0x2a   : > { %4058 = dma.hbm_to_vmem [thread:$0]  (!%p4613_p6), %s6066_s1, 32768, %s4602_s14, [#allocation6], %s4511_s17, %s4511_s17, %s4512_s20  }
  0x2b   : > { %s4198_s26 = scalar_lea.hbm %s6068_s3, 16 }
  0x2c   : > { %p4199_p4 = scmp.ne.s32.totalorder %s6068_s3, %s4198_s26  ;;  %p4205_p12 = scmp.lt.u32.totalorder %s4198_s26, %s6068_s3 }
  0x2e   : > { %p4201_p10 = pnand %p4199_p4, %p4629_p8 }
  0x30   : > { %p4202_p11 = pneg %p4201_p10 }
  0x32   : > { %p4207_p13 = pnand %p4205_p12, %p4202_p11 }
  0x34   : > { %4210 = shalt.err (!%p4207_p13)
}
  0x35   : > { %s4211_s14 = scalar_lea.vmem %s4617_s18, 16  ;;  %s4218_s17 = scalar_lea.vmem %s4617_s18, 32 }
  0x36   : > { %p4212_p0 = scmp.ne.s32.totalorder %s4617_s18, %s4211_s14  ;;  %p4219_p7 = scmp.lt.s32.totalorder %s4617_s18, %s4617_s18 }
  0x37   : > { %p4220_p9 = scmp.lt.s32.totalorder %s4218_s17, %s4211_s14 }
  0x38   : > { %p4214_p2 = pnand %p4212_p0, %p4629_p8 }
  0x39   : > { %p4221_p4 = por %p4220_p9, %p4219_p7 }
  0x3a   : > { %p4215_p5 = pneg %p4214_p2 }
  0x3c   : > { %p4222_p10 = pnand %p4221_p4, %p4215_p5 }
  0x3e   : > { %4225 = shalt.err (!%p4222_p10)
}
  0x3f   : > { %4064 = dma.hbm_to_vmem [thread:$0]  (!%p4613_p6), %s6068_s3, 16, %s4617_s18, [#allocation9]  }
  0x40   : > { %s4226_s24 = scalar_lea.hbm %s6070_s5, 16 }
  0x41   : > { %p4227_p11 = scmp.ne.s32.totalorder %s6070_s5, %s4226_s24  ;;  %p4233_p0 = scmp.lt.u32.totalorder %s4226_s24, %s6070_s5 }
  0x43   : > { %p4229_p12 = pnand %p4227_p11, %p4629_p8 }
  0x45   : > { %p4230_p13 = pneg %p4229_p12 }
  0x47   : > { %p4235_p2 = pnand %p4233_p0, %p4230_p13 }
  0x49   : > { %4238 = shalt.err (!%p4235_p2)
}
  0x4a   : > { %s4239_s18 = scalar_lea.vmem %s4619_s21, 16  ;;  %s4246_s13 = scalar_lea.vmem %s4619_s21, 32 }
  0x4b   : > { %p4240_p5 = scmp.ne.s32.totalorder %s4619_s21, %s4239_s18  ;;  %p4247_p4 = scmp.lt.s32.totalorder %s4619_s21, %s4619_s21 }
  0x4c   : > { %p4248_p10 = scmp.lt.s32.totalorder %s4246_s13, %s4239_s18 }
  0x4d   : > { %p4242_p7 = pnand %p4240_p5, %p4629_p8 }
  0x4e   : > { %p4249_p11 = por %p4248_p10, %p4247_p4 }
  0x4f   : > { %p4243_p9 = pneg %p4242_p7 }
  0x51   : > { %p4250_p12 = pnand %p4249_p11, %p4243_p9 }
  0x53   : > { %4253 = shalt.err (!%p4250_p12)
}
  0x54   : > { %4070 = dma.hbm_to_vmem [thread:$0]  (!%p4613_p6), %s6070_s5, 16, %s4619_s21, [#allocation12]  }
  0x55   : > { %s4513_s9 = smov [#allocation14]   ;;  %s4514_s22 = smov [#allocation7]  }
  0x56   : > { %s336_s20 = sshll.u32 %s4513_s9, 4  ;;  %s280_s23 = sshll.u32 %s4514_s22, 4  ;;  %s337_s20 = int_to_ptr.vmem [resolvable:$true] %s336_s20  ;;  %s281_s23 = int_to_ptr.vmem [resolvable:$true] %s280_s23 }
  0x57   : > { %s4254_s26 = scalar_lea.hbm %s6072_s7, 2048 }
  0x58   : > { %p4255_p13 = scmp.ne.s32.totalorder %s6072_s7, %s4254_s26  ;;  %p4261_p5 = scmp.lt.u32.totalorder %s4254_s26, %s6072_s7 }
  0x5a   : > { %p4257_p0 = pnand %p4255_p13, %p4629_p8 }
  0x5c   : > { %p4258_p2 = pneg %p4257_p0 }
  0x5e   : > { %p4263_p7 = pnand %p4261_p5, %p4258_p2 }
  0x60   : > { %4266 = shalt.err (!%p4263_p7)
}
  0x61   : > { %s4267_s21 = scalar_lea.vmem %s337_s20, 2048  ;;  %p4275_p11 = scmp.lt.s32.totalorder %s337_s20, %s337_s20 }
  0x62   : > { %p4268_p9 = scmp.ne.s32.totalorder %s337_s20, %s4267_s21  ;;  %p4276_p12 = scmp.lt.s32.totalorder %s4267_s21, %s4267_s21 }
  0x64   : > { %p4270_p4 = pnand %p4268_p9, %p4629_p8  ;;  %p4277_p1 = por %p4276_p12, %p4275_p11 }
  0x66   : > { %p4271_p10 = pneg %p4270_p4 }
  0x68   : > { %p4278_p3 = pnand %p4277_p1, %p4271_p10 }
  0x6a   : > { %4281 = shalt.err (!%p4278_p3)
}
  0x6b   : > { %s6078_s14 = smov 128   ;;  %s4516_s17 = smov 8  }
  0x6c   : > { %4076 = dma.hbm_to_vmem [thread:$0]  (!%p4613_p6), %s6072_s7, 2048, %s337_s20, [#allocation15], %s6078_s14, %s6078_s14, %s4516_s17  }
  0x6d   : > { %s4282_s26 = scalar_lea.hbm %s6067_s2, 16 }
  0x6e   : > { %p4283_p1 = scmp.ne.s32.totalorder %s6067_s2, %s4282_s26  ;;  %p4289_p0 = scmp.lt.u32.totalorder %s4282_s26, %s6067_s2 }
  0x70   : > { %p4285_p3 = pnand %p4283_p1, %p4629_p8 }
  0x72   : > { %p4286_p13 = pneg %p4285_p3 }
  0x74   : > { %p4291_p2 = pnand %p4289_p0, %p4286_p13 }
  0x76   : > { %4294 = shalt.err (!%p4291_p2)
}
  0x77   : > { %s4295_s21 = scalar_lea.vmem %s281_s23, 16  ;;  %s4302_s20 = scalar_lea.vmem %s281_s23, 32 }
  0x78   : > { %p4296_p5 = scmp.ne.s32.totalorder %s281_s23, %s4295_s21  ;;  %p4303_p4 = scmp.lt.s32.totalorder %s281_s23, %s281_s23 }
  0x79   : > { %p4304_p10 = scmp.lt.s32.totalorder %s4302_s20, %s4295_s21 }
  0x7a   : > { %p4298_p7 = pnand %p4296_p5, %p4629_p8 }
  0x7b   : > { %p4305_p11 = por %p4304_p10, %p4303_p4 }
  0x7c   : > { %p4299_p9 = pneg %p4298_p7 }
  0x7e   : > { %p4306_p12 = pnand %p4305_p11, %p4299_p9 }
  0x80   : > { %4309 = shalt.err (!%p4306_p12)
}
  0x81   : > { %4061 = dma.hbm_to_vmem [thread:$0]  (!%p4613_p6), %s6067_s2, 16, %s281_s23, [#allocation6]  }
  0x82   : > { %s4517_s24 = smov [#allocation10]   ;;  %s4518_s26 = smov [#allocation13]  }
  0x83   : > { %s302_s25 = sshll.u32 %s4517_s24, 4  ;;  %s323_s28 = sshll.u32 %s4518_s26, 4  ;;  %s303_s25 = int_to_ptr.vmem [resolvable:$true] %s302_s25  ;;  %s324_s28 = int_to_ptr.vmem [resolvable:$true] %s323_s28 }
  0x84   : > { %s4310_s13 = scalar_lea.hbm %s6069_s4, 16 }
  0x85   : > { %p4311_p1 = scmp.ne.s32.totalorder %s6069_s4, %s4310_s13  ;;  %p4317_p0 = scmp.lt.u32.totalorder %s4310_s13, %s6069_s4 }
  0x87   : > { %p4313_p3 = pnand %p4311_p1, %p4629_p8 }
  0x89   : > { %p4314_p13 = pneg %p4313_p3 }
  0x8b   : > { %p4319_p2 = pnand %p4317_p0, %p4314_p13 }
  0x8d   : > { %4322 = shalt.err (!%p4319_p2)
}
  0x8e   : > { %s4323_s23 = scalar_lea.vmem %s303_s25, 16  ;;  %s4330_s22 = scalar_lea.vmem %s303_s25, 32 }
  0x8f   : > { %p4324_p5 = scmp.ne.s32.totalorder %s303_s25, %s4323_s23  ;;  %p4331_p4 = scmp.lt.s32.totalorder %s303_s25, %s303_s25 }
  0x90   : > { %p4332_p10 = scmp.lt.s32.totalorder %s4330_s22, %s4323_s23 }
  0x91   : > { %p4326_p7 = pnand %p4324_p5, %p4629_p8 }
  0x92   : > { %p4333_p11 = por %p4332_p10, %p4331_p4 }
  0x93   : > { %p4327_p9 = pneg %p4326_p7 }
  0x95   : > { %p4334_p12 = pnand %p4333_p11, %p4327_p9 }
  0x97   : > { %4337 = shalt.err (!%p4334_p12)
}
  0x98   : > { %4067 = dma.hbm_to_vmem [thread:$0]  (!%p4613_p6), %s6069_s4, 16, %s303_s25, [#allocation9]  }
  0x99   : > { %s4338_s18 = scalar_lea.hbm %s6071_s6, 2048 }
  0x9a   : > { %p4339_p1 = scmp.ne.s32.totalorder %s6071_s6, %s4338_s18  ;;  %p4345_p0 = scmp.lt.u32.totalorder %s4338_s18, %s6071_s6 }
  0x9c   : > { %p4341_p3 = pnand %p4339_p1, %p4629_p8 }
  0x9e   : > { %p4342_p13 = pneg %p4341_p3 }
  0xa0   : > { %p4347_p2 = pnand %p4345_p0, %p4342_p13 }
  0xa2   : > { %4350 = shalt.err (!%p4347_p2)
}
  0xa3   : > { %s4351_s23 = scalar_lea.vmem %s324_s28, 2048  ;;  %p4359_p4 = scmp.lt.s32.totalorder %s324_s28, %s324_s28 }
  0xa4   : > { %p4352_p5 = scmp.ne.s32.totalorder %s324_s28, %s4351_s23  ;;  %p4360_p10 = scmp.lt.s32.totalorder %s4351_s23, %s4351_s23 }
  0xa6   : > { %p4354_p7 = pnand %p4352_p5, %p4629_p8  ;;  %p4361_p11 = por %p4360_p10, %p4359_p4 }
  0xa8   : > { %p4355_p9 = pneg %p4354_p7 }
  0xaa   : > { %p4362_p12 = pnand %p4361_p11, %p4355_p9 }
  0xac   : > { %4365 = shalt.err (!%p4362_p12)
}
  0xad   : > { %s6084_s25 = smov 128   ;;  %s4519_s26 = smov [#allocation16]  }
  0xae   : > { %4073 = dma.hbm_to_vmem [thread:$0]  (!%p4613_p6), %s6071_s6, 2048, %s324_s28, [#allocation12], %s6084_s25, %s6084_s25, %s4516_s17  }
  0xaf   : > { %s350_s14 = sshll.u32 %s4519_s26, 4  ;;  %s4366_s13 = scalar_lea.hbm %s6073_s8, 16  ;;  %s351_s14 = int_to_ptr.vmem [resolvable:$true] %s350_s14 }
  0xb0   : > { %p4367_p1 = scmp.ne.s32.totalorder %s6073_s8, %s4366_s13  ;;  %p4373_p0 = scmp.lt.u32.totalorder %s4366_s13, %s6073_s8 }
  0xb2   : > { %p4369_p3 = pnand %p4367_p1, %p4629_p8 }
  0xb4   : > { %p4370_p13 = pneg %p4369_p3 }
  0xb6   : > { %p4375_p2 = pnand %p4373_p0, %p4370_p13 }
  0xb8   : > { %4378 = shalt.err (!%p4375_p2)
}
  0xb9   : > { %s4379_s17 = scalar_lea.vmem %s351_s14, 16  ;;  %s4386_s28 = scalar_lea.vmem %s351_s14, 32 }
  0xba   : > { %p4380_p5 = scmp.ne.s32.totalorder %s351_s14, %s4379_s17  ;;  %p4387_p4 = scmp.lt.s32.totalorder %s351_s14, %s351_s14 }
  0xbb   : > { %p4388_p10 = scmp.lt.s32.totalorder %s4386_s28, %s4379_s17 }
  0xbc   : > { %p4382_p7 = pnand %p4380_p5, %p4629_p8 }
  0xbd   : > { %p4389_p11 = por %p4388_p10, %p4387_p4 }
  0xbe   : > { %p4383_p9 = pneg %p4382_p7 }
  0xc0   : > { %p4390_p12 = pnand %p4389_p11, %p4383_p9 }
  0xc2   : > { %4393 = shalt.err (!%p4390_p12)
}
  0xc3   : > { %4079 = dma.hbm_to_vmem [thread:$0]  (!%p4613_p6), %s6073_s8, 16, %s351_s14, [#allocation15]  }
  0xc4   : > { %s3146_s27 = sadd.s32 4294967294, %s4506_s12   ;;  %s4796_s19 = sadd.s32 1, %s4506_s12  }
  0xc5   : > { %s33_s24 = ssub.s32 %s4506_s12, %s4796_s19  ;;  %s36_s26 = sadd.s32 1, %s4502_s11 }
  0xc6   : > { %p34_p8 = scmp.eq.s32.totalorder %s33_s24, 0  ;;  %p43_p1 = scmp.ne.s32.totalorder %s4502_s11, %s4498_s10 }
  0xc7   : > { %p44_p3 = scmp.eq.s32.totalorder %s4506_s12, 0  ;;  %p49_p13 = scmp.ne.s32.totalorder %s4498_s10, %s4494_s30 }
  0xc8   : > { %s4807_s29 = scalar_select %p34_p8, %s4502_s11, %s36_s26  }
  0xc9   : > { %p4809_p0 = por %p44_p3, %p43_p1  ;;  %p6086_p2 = scmp.eq.s32.totalorder %s4597_s15, 0 }
  0xca   : > { %p241_p5 = scmp.eq.s32.totalorder %s4597_s15, 1  ;;  %p247_p7 = scmp.eq.s32.totalorder %s3146_s27, 1 }
  0xcb   : > { %p4815_p6 = por %p6086_p2, %p49_p13  ;;  %p4096_p9 = scmp.lt.s32.totalorder %s4506_s12, 2 }
  0xcc   : > { %s361_s13 = sand.u32 1, %s4502_s11   ;;  %p4822_p4 = por %p241_p5, %p43_p1 }
  0xcd   : > { %p4826_p10 = por %p247_p7, %p49_p13  ;;  %s3157_s9 = sshll.u32 %s361_s13, 11 }
  0xce   : > { %s6088_s21 = scalar_select %p4822_p4, 1, 0 }
  0xcf   : > { %s6089_s20 = scalar_select %p4826_p10, 1, 0 }
  0xd0   : > { %s3184_s23 = sshll.u32 %s4506_s12, 15  ;;  %s365_s22 = scalar_lea.vmem [#allocation2], %s3157_s9 }
  0xd1   : > { %s4834_s25 = scalar_lea.hbm %s6065_s0, %s3184_s23  ;;  %s373_s27 = sshll.u32 %s365_s22, 4  ;;  %s4836_s27 = int_to_ptr.vmem [resolvable:$true] %s373_s27 }
  0xd2   : > { %p4840_p11 = pnand %p4096_p9, %p4809_p0  ;;  %s4844_s26 = scalar_lea.sflag [#allocation3], %s361_s13 }
  0xd3   : > { %s4394_s17 = scalar_lea.hbm %s4834_s25, 32768  ;;  %s4399_s18 = scalar_lea.hbm %s6065_s0, 65536 }
  0xd4   : > { %p4395_p12 = scmp.ne.s32.totalorder %s4834_s25, %s4394_s17  ;;  %p4396_p8 = pneg %p4840_p11 }
  0xd5   : > { %p4400_p13 = scmp.lt.u32.totalorder %s4834_s25, %s6065_s0  ;;  %p4401_p0 = scmp.lt.u32.totalorder %s4399_s18, %s4394_s17 }
  0xd6   : > { %p4397_p1 = pnand %p4396_p8, %p4395_p12  ;;  %p4403_p5 = scmp.lt.u32.totalorder %s4394_s17, %s4834_s25 }
  0xd7   : > { %p4402_p2 = por %p4401_p0, %p4400_p13 }
  0xd8   : > { %p4398_p3 = pneg %p4397_p1 }
  0xd9   : > { %p4404_p7 = por %p4403_p5, %p4402_p2 }
  0xdb   : > { %p4405_p9 = pnand %p4404_p7, %p4398_p3 }
  0xdd   : > { %4408 = shalt.err (!%p4405_p9)
}
  0xde   : > { %s4409_s13 = scalar_lea.vmem %s4836_s27, 32768  ;;  %s4520_s9 = smov [#allocation2]  }
  0xdf   : > { %p4410_p12 = scmp.ne.s32.totalorder %s4836_s27, %s4409_s13  ;;  %s4414_s23 = sshll.u32 %s4520_s9, 4  ;;  %s4415_s23 = int_to_ptr.vmem [resolvable:$false] %s4414_s23 }
  0xe0   : > { %s4416_s28 = scalar_lea.vmem %s4415_s23, 65536  ;;  %p4417_p4 = scmp.lt.s32.totalorder %s4836_s27, %s4415_s23 }
  0xe1   : > { %p4412_p1 = pnand %p4410_p12, %p4396_p8  ;;  %p4418_p13 = scmp.lt.s32.totalorder %s4416_s28, %s4409_s13 }
  0xe3   : > { %p4413_p10 = pneg %p4412_p1  ;;  %p4419_p0 = por %p4418_p13, %p4417_p4 }
  0xe5   : > { %p4420_p2 = pnand %p4419_p0, %p4413_p10 }
  0xe7   : > { %4423 = shalt.err (!%p4420_p2)
}
  0xe8   : > { %s4521_s17 = smov 1024   ;;  %s4522_s18 = smov 64  }
  0xe9   : > { %4083 = dma.hbm_to_vmem [thread:$0]  (!%p4840_p11), %s4834_s25, 32768, %s4836_s27, %s4844_s26, %s4521_s17, %s4521_s17, %s4522_s18  }
  0xea   : > { %p6091_p8 = scmp.ne.s32.totalorder %s6081_s16, 0 }
  0xec   : > { %385 = sbr.rel (%p6091_p8) target bundleno = 1217 (0x4c1), region = 56 }
  0xf3   : > { %s4875_s22 = sand.u32 1, %s4498_s10  }
  0xf4   : > { %s3162_s13 = sshll.u32 %s4875_s22, 11  ;;  %s388_s9 = scalar_lea.sflag [#allocation3], %s4875_s22 }
  0xf5   : > { %s4879_s23 = scalar_lea.vmem [#allocation2], %s3162_s13 }
  0xf6   : > { %4469 = dma.done.wait (%p4815_p6), %s388_s9, 32768  }
  0xf7   : > { %4471 = vsyncadd (%p4815_p6), %s388_s9, 4294934528  ;;  %p6092_p4 = scmp.eq.s32.totalorder %s4597_s15, 0 }
  0xf9   : > { %4473 = dma.done.wait (%p6092_p4), [#allocation6], 32784   ;;  %p6093_p10 = pmov %p6092_p4 }
  0xfa   : > { %p6094_p11 = pmov %p6092_p4 }
  0xfb   : > { %4475 = vsyncadd (%p6093_p10), [#allocation6], 4294934512 }
  0xfc   : > { %4477 = dma.done.wait (%p6094_p11), [#allocation9], 32   ;;  %p6095_p3 = pmov %p6092_p4 }
  0xfe   : > { %4479 = vsyncadd (%p6095_p3), [#allocation9], 4294967264  ;;  %p6096_p5 = pmov %p6095_p3 }
  0xff   : > { %p6097_p7 = pmov %p6095_p3 }
 0x100   : > { %4481 = dma.done.wait (%p6096_p5), [#allocation12], 2064  }
 0x101   : > { %4483 = vsyncadd (%p6097_p7), [#allocation12], 4294965232  ;;  %p6098_p6 = pmov %p6095_p3 }
 0x102   : > { %p6099_p9 = pmov %p6095_p3 }
 0x103   : > { %4485 = dma.done.wait (%p6098_p6), [#allocation15], 2064  }
 0x104   : > { %4487 = vsyncadd (%p6099_p9), [#allocation15], 4294965232  ;;  %v781_v0 = vld [vmem:[#allocation5 + $0x208] sm:$0xff]  ;;  %v783_v1 = vld [vmem:[#allocation5 + $0x218] sm:$0xff]  ;;  %s3171_s16 = sshll.u32 %s4875_s22, 8  ;;  %s3186_s25 = sshll.u32 %s4597_s15, 12 }
 0x105   : > { %v780_v2 = vld [vmem:[#allocation5 + $0x200] sm:$0xff]  ;;  %v4901_v3 = vpack.c.bf16 %v783_v1, %v781_v0  ;;  %v782_v4 = vld [vmem:[#allocation5 + $0x210] sm:$0xff]  ;;  %v785_v5 = vld [vmem:[#allocation5 + $0x228] sm:$0xff]  ;;  %s5950_s14 = scalar_lea.vmem [#allocation17], %s3171_s16  ;;  %s6146_s28 = sld [smem:[#allocation47_spill]] }
 0x106   : > { %v787_v6 = vld [vmem:[#allocation5 + $0x238] sm:$0xff]  ;;  %v4903_v7 = vpack.c.bf16 %v782_v4, %v780_v2  ;;  %v784_v9 = vld [vmem:[#allocation5 + $0x220] sm:$0xff]  ;;  %v786_v10 = vld [vmem:[#allocation5 + $0x230] sm:$0xff]  ;;  %s2997_s27 = sshll.u32 %s5950_s14, 4  ;;  %s2983_s15 = scalar_lea.sflag [#allocation4], %s4875_s22  ;;  %s6018_s27 = int_to_ptr.vmem [resolvable:$true] %s2997_s27 }
 0x107   : > { %v4905_v8 = vpack.c.bf16 %v787_v6, %v785_v5  ;;  %v789_v11 = vld [vmem:[#allocation5 + $0x248] sm:$0xff]  ;;  %3508 = vmatprep.subr.bf16.mxu0 %v4901_v3  ;;  %v791_v12 = vld [vmem:[#allocation5 + $0x258] sm:$0xff]  ;;  %v4909_v13 = vpack.c.bf16 %v786_v10, %v784_v9  ;;  %v788_v15 = vld [vmem:[#allocation5 + $0x240] sm:$0xff]  ;;  %s4424_s18 = scalar_lea.vmem %s6018_s27, 4096  ;;  %p6147_p1 = scmp.ne.s32.totalorder %s6088_s21, 0 }
 0x108   : > { %3510 = vmatpush1.bf16.msra.mxu0 %v4903_v7  ;;  %v4912_v14 = vpack.c.bf16 %v791_v12, %v789_v11  ;;  %v790_v16 = vld [vmem:[#allocation5 + $0x250] sm:$0xff]  ;;  %v793_v17 = vld [vmem:[#allocation5 + $0x268] sm:$0xff]  ;;  %v795_v18 = vld [vmem:[#allocation5 + $0x278] sm:$0xff]  ;;  %p4425_p12 = scmp.ne.s32.totalorder %s6018_s27, %s4424_s18  ;;  %s4523_s13 = smov [#allocation17]  }
 0x109   : > { %3512 = vmatprep.subr.bf16.mxu0 %v4905_v8  ;;  %v4915_v19 = vpack.c.bf16 %v790_v16, %v788_v15  ;;  %v4918_v20 = vpack.c.bf16 %v795_v18, %v793_v17  ;;  %v792_v21 = vld [vmem:[#allocation5 + $0x260] sm:$0xff]  ;;  %v794_v22 = vld [vmem:[#allocation5 + $0x270] sm:$0xff]  ;;  %v797_v23 = vld [vmem:[#allocation5 + $0x288] sm:$0xff]  ;;  %s4428_s9 = sshll.u32 %s4523_s13, 4  ;;  %s4429_s9 = int_to_ptr.vmem [resolvable:$false] %s4428_s9 }
 0x10a   : > { %v799_v24 = vld [vmem:[#allocation5 + $0x298] sm:$0xff]  ;;  %v4921_v25 = vpack.c.bf16 %v794_v22, %v792_v21  ;;  %v796_v27 = vld [vmem:[#allocation5 + $0x280] sm:$0xff]  ;;  %v798_v28 = vld [vmem:[#allocation5 + $0x290] sm:$0xff]  ;;  %p4426_p13 = pnand %p4425_p12, %p6147_p1  ;;  %p4431_p2 = scmp.lt.s32.totalorder %s6018_s27, %s4429_s9 }
 0x10b   : > { %v4924_v26 = vpack.c.bf16 %v799_v24, %v797_v23  ;;  %v801_v29 = vld [vmem:[#allocation5 + $0x2a8] sm:$0xff]  ;;  %v803_v30 = vld [vmem:[#allocation5 + $0x2b8] sm:$0xff]  ;;  %v4927_v31 = vpack.c.bf16 %v798_v28, %v796_v27  ;;  %v800_v33 = vld [vmem:[#allocation5 + $0x2a0] sm:$0xff]  ;;  %s6016_s17 = scalar_lea.hbm %s6146_s28, %s3186_s25 }
 0x10c   : > { %3514 = vmatpush1.bf16.msra.mxu0 %v4909_v13  ;;  %v4930_v32 = vpack.c.bf16 %v803_v30, %v801_v29  ;;  %v802_v34 = vld [vmem:[#allocation5 + $0x2b0] sm:$0xff]  ;;  %v805_v35 = vld [vmem:[#allocation5 + $0x2c8] sm:$0xff]  ;;  %v807_v36 = vld [vmem:[#allocation5 + $0x2d8] sm:$0xff]  ;;  %p4427_p0 = pneg %p4426_p13 }
 0x10d   : > { %3516 = vmatprep.subr.bf16.mxu0 %v4912_v14  ;;  %v4933_v37 = vpack.c.bf16 %v802_v34, %v800_v33  ;;  %v804_v38 = vld [vmem:[#allocation5 + $0x2c0] sm:$0xff]  ;;  %v4936_v39 = vpack.c.bf16 %v807_v36, %v805_v35  ;;  %v806_v40 = vld [vmem:[#allocation5 + $0x2d0] sm:$0xff]  ;;  %v463_v41 = vld [vmem:[%s4879_s23 + $0x18] sm:$0xff] }
 0x10e   : > { %v717_v42 = vld [vmem:[#allocation5 + $0x8] sm:$0xff]  ;;  %v811_v44 = vld [vmem:[#allocation5 + $0x2f8] sm:$0xff]  ;;  %1293 = vmatprep.mubr.f32.mxu0 %v463_v41  ;;  %v716_v47 = vld [vmem:[#allocation5] sm:$0xff]  ;;  %v4940_v49 = vpack.c.bf16 %v806_v40, %v804_v38 }
 0x10f   : > { %v809_v43 = vld [vmem:[#allocation5 + $0x2e8] sm:$0xff]  ;;  %v719_v45 = vld [vmem:[#allocation5 + $0x18] sm:$0xff]  ;;  %v718_v48 = vld [vmem:[#allocation5 + $0x10] sm:$0xff] }
 0x110   : > { %3518 = vmatpush1.bf16.msra.mxu0 %v4915_v19  ;;  %v3443_v46 = vpack.c.bf16 %v719_v45, %v717_v42  ;;  %v808_v50 = vld [vmem:[#allocation5 + $0x2e0] sm:$0xff]  ;;  %v3445_v51 = vpack.c.bf16 %v718_v48, %v716_v47  ;;  %v4943_v52 = vpack.c.bf16 %v811_v44, %v809_v43  ;;  %v810_v53 = vld [vmem:[#allocation5 + $0x2f0] sm:$0xff]  ;;  %v721_v54 = vld [vmem:[#allocation5 + $0x28] sm:$0xff] }
 0x111   : > { %3520 = vmatprep.subr.bf16.mxu0 %v4918_v20  ;;  %v723_v55 = vld [vmem:[#allocation5 + $0x38] sm:$0xff]  ;;  %v813_v56 = vld [vmem:[#allocation5 + $0x308] sm:$0xff]  ;;  %v720_v59 = vld [vmem:[#allocation5 + $0x20] sm:$0xff]  ;;  %v4946_v61 = vpack.c.bf16 %v810_v53, %v808_v50 }
 0x112   : > { %3444 = vmatprep.subr.bf16.mxu1 %v3443_v46  ;;  %v815_v57 = vld [vmem:[#allocation5 + $0x318] sm:$0xff]  ;;  %v3447_v58 = vpack.c.bf16 %v723_v55, %v721_v54  ;;  %v722_v60 = vld [vmem:[#allocation5 + $0x30] sm:$0xff]  ;;  %v725_v63 = vld [vmem:[#allocation5 + $0x48] sm:$0xff] }
 0x113   : > { %3446 = vmatpush1.bf16.msra.mxu1 %v3445_v51  ;;  %v3449_v62 = vpack.c.bf16 %v722_v60, %v720_v59  ;;  %v727_v0 = vld [vmem:[#allocation5 + $0x58] sm:$0xff]  ;;  %v4949_v1 = vpack.c.bf16 %v815_v57, %v813_v56  ;;  %v812_v2 = vld [vmem:[#allocation5 + $0x300] sm:$0xff]  ;;  %v814_v4 = vld [vmem:[#allocation5 + $0x310] sm:$0xff] }
 0x114   : > { %3522 = vmatpush1.bf16.msra.mxu0 %v4921_v25  ;;  %3448 = vmatprep.subr.bf16.mxu1 %v3447_v58  ;;  %v817_v5 = vld [vmem:[#allocation5 + $0x328] sm:$0xff]  ;;  %v3451_v6 = vpack.c.bf16 %v727_v0, %v725_v63  ;;  %v819_v9 = vld [vmem:[#allocation5 + $0x338] sm:$0xff]  ;;  %v724_v10 = vld [vmem:[#allocation5 + $0x40] sm:$0xff]  ;;  %v4952_v16 = vpack.c.bf16 %v814_v4, %v812_v2 }
 0x115   : > { %3524 = vmatprep.subr.bf16.mxu0 %v4924_v26  ;;  %v726_v11 = vld [vmem:[#allocation5 + $0x50] sm:$0xff]  ;;  %v729_v15 = vld [vmem:[#allocation5 + $0x68] sm:$0xff]  ;;  %v816_v17 = vld [vmem:[#allocation5 + $0x320] sm:$0xff]  ;;  %v4955_v21 = vpack.c.bf16 %v819_v9, %v817_v5 }
 0x116   : > { %v3453_v12 = vpack.c.bf16 %v726_v11, %v724_v10  ;;  %v731_v18 = vld [vmem:[#allocation5 + $0x78] sm:$0xff]  ;;  %v818_v22 = vld [vmem:[#allocation5 + $0x330] sm:$0xff]  ;;  %v728_v24 = vld [vmem:[#allocation5 + $0x60] sm:$0xff] }
 0x117   : > { %3450 = vmatpush1.bf16.msra.mxu1 %v3449_v62  ;;  %v3455_v23 = vpack.c.bf16 %v731_v18, %v729_v15  ;;  %v730_v27 = vld [vmem:[#allocation5 + $0x70] sm:$0xff]  ;;  %v821_v28 = vld [vmem:[#allocation5 + $0x348] sm:$0xff]  ;;  %v823_v29 = vld [vmem:[#allocation5 + $0x358] sm:$0xff]  ;;  %v4958_v35 = vpack.c.bf16 %v818_v22, %v816_v17 }
 0x118   : > { %3526 = vmatpush1.bf16.msra.mxu0 %v4927_v31  ;;  %3452 = vmatprep.subr.bf16.mxu1 %v3451_v6  ;;  %v3457_v30 = vpack.c.bf16 %v730_v27, %v728_v24  ;;  %v733_v33 = vld [vmem:[#allocation5 + $0x88] sm:$0xff]  ;;  %v735_v34 = vld [vmem:[#allocation5 + $0x98] sm:$0xff]  ;;  %v820_v36 = vld [vmem:[#allocation5 + $0x340] sm:$0xff]  ;;  %v4961_v41 = vpack.c.bf16 %v823_v29, %v821_v28 }
 0x119   : > { %3528 = vmatprep.subr.bf16.mxu0 %v4930_v32  ;;  %v3459_v38 = vpack.c.bf16 %v735_v34, %v733_v33  ;;  %v732_v40 = vld [vmem:[#allocation5 + $0x80] sm:$0xff]  ;;  %v822_v42 = vld [vmem:[#allocation5 + $0x350] sm:$0xff]  ;;  %v825_v43 = vld [vmem:[#allocation5 + $0x368] sm:$0xff] }
 0x11a   : > { %v734_v44 = vld [vmem:[#allocation5 + $0x90] sm:$0xff]  ;;  %v827_v45 = vld [vmem:[#allocation5 + $0x378] sm:$0xff]  ;;  %v737_v47 = vld [vmem:[#allocation5 + $0xa8] sm:$0xff]  ;;  %v4964_v51 = vpack.c.bf16 %v822_v42, %v820_v36 }
 0x11b   : > { %3454 = vmatpush1.bf16.msra.mxu1 %v3453_v12  ;;  %v3461_v46 = vpack.c.bf16 %v734_v44, %v732_v40  ;;  %v739_v48 = vld [vmem:[#allocation5 + $0xb8] sm:$0xff]  ;;  %v736_v53 = vld [vmem:[#allocation5 + $0xa0] sm:$0xff]  ;;  %v738_v54 = vld [vmem:[#allocation5 + $0xb0] sm:$0xff]  ;;  %v4967_v55 = vpack.c.bf16 %v827_v45, %v825_v43 }
 0x11c   : > { %3530 = vmatpush1.bf16.msra.mxu0 %v4933_v37  ;;  %3456 = vmatprep.subr.bf16.mxu1 %v3455_v23  ;;  %v3463_v50 = vpack.c.bf16 %v739_v48, %v737_v47  ;;  %v824_v56 = vld [vmem:[#allocation5 + $0x360] sm:$0xff]  ;;  %v826_v57 = vld [vmem:[#allocation5 + $0x370] sm:$0xff]  ;;  %v741_v58 = vld [vmem:[#allocation5 + $0xc8] sm:$0xff]  ;;  %v3465_v62 = vpack.c.bf16 %v738_v54, %v736_v53 }
 0x11d   : > { %3532 = vmatprep.subr.bf16.mxu0 %v4936_v39  ;;  %v829_v59 = vld [vmem:[#allocation5 + $0x388] sm:$0xff]  ;;  %v831_v60 = vld [vmem:[#allocation5 + $0x398] sm:$0xff]  ;;  %v740_v2 = vld [vmem:[#allocation5 + $0xc0] sm:$0xff]  ;;  %v4970_v5 = vpack.c.bf16 %v826_v57, %v824_v56 }
 0x11e   : > { %v743_v63 = vld [vmem:[#allocation5 + $0xd8] sm:$0xff]  ;;  %v742_v4 = vld [vmem:[#allocation5 + $0xd0] sm:$0xff]  ;;  %v828_v6 = vld [vmem:[#allocation5 + $0x380] sm:$0xff]  ;;  %v4973_v9 = vpack.c.bf16 %v831_v60, %v829_v59 }
 0x11f   : > { %3458 = vmatpush1.bf16.msra.mxu1 %v3457_v30  ;;  %v3467_v0 = vpack.c.bf16 %v743_v63, %v741_v58  ;;  %v830_v10 = vld [vmem:[#allocation5 + $0x390] sm:$0xff]  ;;  %v745_v11 = vld [vmem:[#allocation5 + $0xe8] sm:$0xff]  ;;  %v747_v12 = vld [vmem:[#allocation5 + $0xf8] sm:$0xff]  ;;  %v3469_v18 = vpack.c.bf16 %v742_v4, %v740_v2 }
 0x120   : > { %3534 = vmatpush1.bf16.msra.mxu0 %v4940_v49  ;;  %3460 = vmatprep.subr.bf16.mxu1 %v3459_v38  ;;  %v833_v15 = vld [vmem:[#allocation5 + $0x3a8] sm:$0xff]  ;;  %v835_v17 = vld [vmem:[#allocation5 + $0x3b8] sm:$0xff]  ;;  %v3471_v22 = vpack.c.bf16 %v747_v12, %v745_v11  ;;  %v744_v23 = vld [vmem:[#allocation5 + $0xe0] sm:$0xff]  ;;  %v4976_v27 = vpack.c.bf16 %v830_v10, %v828_v6 }
 0x121   : > { %3536 = vmatprep.subr.bf16.mxu0 %v4943_v52  ;;  %v746_v24 = vld [vmem:[#allocation5 + $0xf0] sm:$0xff]  ;;  %v749_v28 = vld [vmem:[#allocation5 + $0x108] sm:$0xff]  ;;  %v751_v29 = vld [vmem:[#allocation5 + $0x118] sm:$0xff]  ;;  %v4979_v30 = vpack.c.bf16 %v835_v17, %v833_v15 }
 0x122   : > { %v832_v33 = vld [vmem:[#allocation5 + $0x3a0] sm:$0xff]  ;;  %v834_v34 = vld [vmem:[#allocation5 + $0x3b0] sm:$0xff]  ;;  %v837_v36 = vld [vmem:[#allocation5 + $0x3c8] sm:$0xff]  ;;  %v3473_v40 = vpack.c.bf16 %v746_v24, %v744_v23  ;;  %v3475_v42 = vpack.c.bf16 %v751_v29, %v749_v28 }
 0x123   : > { %3462 = vmatpush1.bf16.msra.mxu1 %v3461_v46  ;;  %v839_v38 = vld [vmem:[#allocation5 + $0x3d8] sm:$0xff]  ;;  %v748_v43 = vld [vmem:[#allocation5 + $0x100] sm:$0xff]  ;;  %v750_v44 = vld [vmem:[#allocation5 + $0x110] sm:$0xff]  ;;  %v4982_v45 = vpack.c.bf16 %v834_v34, %v832_v33 }
 0x124   : > { %3538 = vmatpush1.bf16.msra.mxu0 %v4946_v61  ;;  %3464 = vmatprep.subr.bf16.mxu1 %v3463_v50  ;;  %v753_v46 = vld [vmem:[#allocation5 + $0x128] sm:$0xff]  ;;  %v755_v47 = vld [vmem:[#allocation5 + $0x138] sm:$0xff]  ;;  %v4985_v48 = vpack.c.bf16 %v839_v38, %v837_v36  ;;  %v836_v50 = vld [vmem:[#allocation5 + $0x3c0] sm:$0xff]  ;;  %v3477_v57 = vpack.c.bf16 %v750_v44, %v748_v43 }
 0x125   : > { %3540 = vmatprep.subr.bf16.mxu0 %v4949_v1  ;;  %v838_v53 = vld [vmem:[#allocation5 + $0x3d0] sm:$0xff]  ;;  %v841_v54 = vld [vmem:[#allocation5 + $0x3e8] sm:$0xff]  ;;  %v843_v56 = vld [vmem:[#allocation5 + $0x3f8] sm:$0xff]  ;;  %v3479_v58 = vpack.c.bf16 %v755_v47, %v753_v46 }
 0x126   : > { %v752_v59 = vld [vmem:[#allocation5 + $0x120] sm:$0xff]  ;;  %v754_v60 = vld [vmem:[#allocation5 + $0x130] sm:$0xff]  ;;  %v757_v63 = vld [vmem:[#allocation5 + $0x148] sm:$0xff]  ;;  %v4991_v2 = vpack.c.bf16 %v843_v56, %v841_v54 }
 0x127   : > { %3466 = vmatpush1.bf16.msra.mxu1 %v3465_v62  ;;  %v4988_v62 = vpack.c.bf16 %v838_v53, %v836_v50  ;;  %v840_v4 = vld [vmem:[#allocation5 + $0x3e0] sm:$0xff]  ;;  %v842_v6 = vld [vmem:[#allocation5 + $0x3f0] sm:$0xff]  ;;  %v845_v10 = vld [vmem:[#allocation5 + $0x408] sm:$0xff]  ;;  %v3481_v12 = vpack.c.bf16 %v754_v60, %v752_v59 }
 0x128   : > { %3542 = vmatpush1.bf16.msra.mxu0 %v4952_v16  ;;  %3468 = vmatprep.subr.bf16.mxu1 %v3467_v0  ;;  %v759_v0 = vld [vmem:[#allocation5 + $0x158] sm:$0xff]  ;;  %v756_v17 = vld [vmem:[#allocation5 + $0x140] sm:$0xff]  ;;  %v761_v23 = vld [vmem:[#allocation5 + $0x168] sm:$0xff] }
 0x129   : > { %3544 = vmatprep.subr.bf16.mxu0 %v4955_v21  ;;  %v847_v11 = vld [vmem:[#allocation5 + $0x418] sm:$0xff]  ;;  %v3483_v15 = vpack.c.bf16 %v759_v0, %v757_v63  ;;  %v844_v29 = vld [vmem:[#allocation5 + $0x400] sm:$0xff]  ;;  %v846_v33 = vld [vmem:[#allocation5 + $0x410] sm:$0xff] }
 0x12a   : > { %v763_v24 = vld [vmem:[#allocation5 + $0x178] sm:$0xff]  ;;  %v3571_v28 = vpack.c.bf16 %v847_v11, %v845_v10  ;;  %v849_v34 = vld [vmem:[#allocation5 + $0x428] sm:$0xff]  ;;  %v762_v43 = vld [vmem:[#allocation5 + $0x170] sm:$0xff]  ;;  %v3573_v46 = vpack.c.bf16 %v846_v33, %v844_v29 }
 0x12b   : > { %3470 = vmatpush1.bf16.msra.mxu1 %v3469_v18  ;;  %v758_v18 = vld [vmem:[#allocation5 + $0x150] sm:$0xff]  ;;  %v851_v36 = vld [vmem:[#allocation5 + $0x438] sm:$0xff]  ;;  %v765_v47 = vld [vmem:[#allocation5 + $0x188] sm:$0xff] }
 0x12c   : > { %3546 = vmatpush1.bf16.msra.mxu0 %v4958_v35  ;;  %3472 = vmatprep.subr.bf16.mxu1 %v3471_v22  ;;  %v4994_v22 = vpack.c.bf16 %v842_v6, %v840_v4  ;;  %v3485_v38 = vpack.c.bf16 %v758_v18, %v756_v17  ;;  %v462_v44 = vld [vmem:[%s4879_s23 + $0x10] sm:$0xff]  ;;  %v767_v50 = vld [vmem:[#allocation5 + $0x198] sm:$0xff]  ;;  %v3575_v54 = vpack.c.bf16 %v851_v36, %v849_v34  ;;  %v848_v56 = vld [vmem:[#allocation5 + $0x420] sm:$0xff] }
 0x12d   : > { %3548 = vmatprep.subr.bf16.mxu0 %v4961_v41  ;;  %v471_v53 = vld [vmem:[%s4879_s23 + $0x58] sm:$0xff]  ;;  %v3491_v63 = vpack.c.bf16 %v767_v50, %v765_v47  ;;  %v764_v0 = vld [vmem:[#allocation5 + $0x180] sm:$0xff]  ;;  %v766_v4 = vld [vmem:[#allocation5 + $0x190] sm:$0xff] }
 0x12e   : > { %v855_v59 = vld [vmem:[#allocation5 + $0x458] sm:$0xff]  ;;  %v470_v6 = vld [vmem:[%s4879_s23 + $0x50] sm:$0xff]  ;;  %v769_v11 = vld [vmem:[#allocation5 + $0x1a8] sm:$0xff]  ;;  %v3493_v29 = vpack.c.bf16 %v766_v4, %v764_v0 }
 0x12f   : > { %3474 = vmatpush1.bf16.msra.mxu1 %v3473_v40  ;;  %v3487_v40 = vpack.c.bf16 %v763_v24, %v761_v23  ;;  %v852_v18 = vld [vmem:[#allocation5 + $0x440] sm:$0xff]  ;;  %v854_v23 = vld [vmem:[#allocation5 + $0x450] sm:$0xff]  ;;  %v857_v24 = vld [vmem:[#allocation5 + $0x468] sm:$0xff] }
 0x130   : > { %3550 = vmatpush1.bf16.msra.mxu0 %v4964_v51  ;;  %3476 = vmatprep.subr.bf16.mxu1 %v3475_v42  ;;  %v760_v42 = vld [vmem:[#allocation5 + $0x160] sm:$0xff]  ;;  %v770_v36 = vld [vmem:[#allocation5 + $0x1b0] sm:$0xff]  ;;  %v777_v4 = vld [vmem:[#allocation5 + $0x1e8] sm:$0xff] }
 0x131   : > { %3552 = vmatprep.subr.bf16.mxu0 %v4967_v55  ;;  %v3489_v60 = vpack.c.bf16 %v762_v43, %v760_v42  ;;  %v768_v34 = vld [vmem:[#allocation5 + $0x1a0] sm:$0xff]  ;;  %v773_v42 = vld [vmem:[#allocation5 + $0x1c8] sm:$0xff]  ;;  %v775_v43 = vld [vmem:[#allocation5 + $0x1d8] sm:$0xff] }
 0x132   : > { %v856_v47 = vld [vmem:[#allocation5 + $0x460] sm:$0xff]  ;;  %v858_v50 = vld [vmem:[#allocation5 + $0x470] sm:$0xff] }
 0x133   : > { %3478 = vmatpush1.bf16.msra.mxu1 %v3477_v57  ;;  %v850_v57 = vld [vmem:[#allocation5 + $0x430] sm:$0xff]  ;;  %v3585_v0 = vpack.c.bf16 %v858_v50, %v856_v47 }
 0x134   : > { %3554 = vmatpush1.bf16.msra.mxu0 %v4970_v5  ;;  %3480 = vmatprep.subr.bf16.mxu1 %v3479_v58  ;;  %v853_v58 = vld [vmem:[#allocation5 + $0x448] sm:$0xff]  ;;  %v3577_v10 = vpack.c.bf16 %v850_v57, %v848_v56  ;;  %v3497_v56 = vpack.c.bf16 %v770_v36, %v768_v34  ;;  %v503_v36 = vld [vmem:[%s4879_s23 + $0x158] sm:$0xff]  ;;  %v502_v47 = vld [vmem:[%s4879_s23 + $0x150] sm:$0xff] }
 0x135   : > { %3556 = vmatprep.subr.bf16.mxu0 %v4973_v9  ;;  %v3579_v17 = vpack.c.bf16 %v855_v59, %v853_v58  ;;  %v461_v57 = vld [vmem:[%s4879_s23 + $0x8] sm:$0xff]  ;;  %v3499_v58 = vpack.c.bf16 %v775_v43, %v773_v42  ;;  %v772_v59 = vld [vmem:[#allocation5 + $0x1c0] sm:$0xff]  ;;  %v866_v42 = vld [vmem:[#allocation5 + $0x4b0] sm:$0xff] }
 0x136   : > { %1036 = vmatprep.mubr.f32.mxu1 %v461_v57  ;;  %v869_v43 = vld [vmem:[#allocation5 + $0x4c8] sm:$0xff]  ;;  %v870_v57 = vld [vmem:[#allocation5 + $0x4d0] sm:$0xff] }
 0x137   : > { %3482 = vmatpush1.bf16.msra.mxu1 %v3481_v12  ;;  %v771_v12 = vld [vmem:[#allocation5 + $0x1b8] sm:$0xff] }
 0x138   : > { %3558 = vmatpush1.bf16.msra.mxu0 %v4976_v27  ;;  %3484 = vmatprep.subr.bf16.mxu1 %v3483_v15  ;;  %v479_v15 = vld [vmem:[%s4879_s23 + $0x98] sm:$0xff]  ;;  %v3495_v33 = vpack.c.bf16 %v771_v12, %v769_v11  ;;  %v860_v12 = vld [vmem:[#allocation5 + $0x480] sm:$0xff] }
 0x139   : > { %3560 = vmatprep.subr.bf16.mxu0 %v4979_v30 }
 0x13b   : > { %3486 = vmatpush1.bf16.msra.mxu1 %v3485_v38  ;;  %v478_v38 = vld [vmem:[%s4879_s23 + $0x90] sm:$0xff] }
 0x13c   : > { %3562 = vmatpush1.bf16.msra.mxu0 %v4982_v45  ;;  %3488 = vmatprep.subr.bf16.mxu1 %v3487_v40  ;;  %v3581_v40 = vpack.c.bf16 %v854_v23, %v852_v18  ;;  %v867_v18 = vld [vmem:[#allocation5 + $0x4b8] sm:$0xff] }
 0x13d   : > { %3564 = vmatprep.subr.bf16.mxu0 %v4985_v48 }
 0x13f   : > { %3490 = vmatpush1.bf16.msra.mxu1 %v3489_v60  ;;  %v774_v60 = vld [vmem:[#allocation5 + $0x1d0] sm:$0xff] }
 0x140   : > { %3566 = vmatpush1.bf16.msra.mxu0 %v4988_v62  ;;  %3492 = vmatprep.subr.bf16.mxu1 %v3491_v63  ;;  %v486_v63 = vld [vmem:[%s4879_s23 + $0xd0] sm:$0xff]  ;;  %v3501_v23 = vpack.c.bf16 %v774_v60, %v772_v59  ;;  %v875_v59 = vld [vmem:[#allocation5 + $0x4f8] sm:$0xff]  ;;  %v460_v60 = vld [vmem:[%s4879_s23] sm:$0xff] }
 0x141   : > { %3568 = vmatprep.subr.bf16.mxu0 %v4991_v2 }
 0x143   : > { %3494 = vmatpush1.bf16.msra.mxu1 %v3493_v29  ;;  %v778_v29 = vld [vmem:[#allocation5 + $0x1f0] sm:$0xff] }
 0x144   : > { %3570 = vmatpush1.bf16.msra.mxu0 %v4994_v22  ;;  %3496 = vmatprep.subr.bf16.mxu1 %v3495_v33  ;;  %v494_v33 = vld [vmem:[%s4879_s23 + $0x110] sm:$0xff] }
 0x145   : > { %3572 = vmatprep.subr.bf16.mxu0 %v3571_v28  ;;  %v859_v28 = vld [vmem:[#allocation5 + $0x478] sm:$0xff] }
 0x147   : > { %1294 = vmatmul.mubr.f32.vlgmr.msra.gmra.mrb[0].mxu0 %v462_v44  ;;  %v487_v44 = vld [vmem:[%s4879_s23 + $0xd8] sm:$0xff]  ;;  %3498 = vmatpush1.bf16.msra.mxu1 %v3497_v56  ;;  %v868_v56 = vld [vmem:[#allocation5 + $0x4c0] sm:$0xff] }
 0x148   : > { %3574 = vmatpush1.bf16.msra.mxu0 %v3573_v46  ;;  %1299 = vmatprep.mubr.f32.mxu0 %v471_v53  ;;  %v3583_v46 = vpack.c.bf16 %v859_v28, %v857_v24  ;;  %v861_v53 = vld [vmem:[#allocation5 + $0x488] sm:$0xff]  ;;  %v776_v28 = vld [vmem:[#allocation5 + $0x1e0] sm:$0xff] }
 0x149   : > { %3576 = vmatprep.subr.bf16.mxu0 %v3575_v54  ;;  %v863_v54 = vld [vmem:[#allocation5 + $0x498] sm:$0xff]  ;;  %3500 = vmatprep.subr.bf16.mxu1 %v3499_v58  ;;  %v873_v58 = vld [vmem:[#allocation5 + $0x4e8] sm:$0xff] }
 0x14a   : > { %v3587_v11 = vpack.c.bf16 %v863_v54, %v861_v53  ;;  %v511_v53 = vld [vmem:[%s4879_s23 + $0x198] sm:$0xff] }
 0x14b   : > { %1300 = vmatmul.mubr.f32.gmra.mrb[2].mxu0 %v470_v6  ;;  %v779_v6 = vld [vmem:[#allocation5 + $0x1f8] sm:$0xff]  ;;  %3502 = vmatpush1.bf16.msra.mxu1 %v3501_v23  ;;  %v518_v23 = vld [vmem:[%s4879_s23 + $0x1d0] sm:$0xff] }
 0x14c   : > { %3578 = vmatpush1.bf16.msra.mxu0 %v3577_v10  ;;  %1305 = vmatprep.mubr.f32.mxu0 %v479_v15  ;;  %v495_v10 = vld [vmem:[%s4879_s23 + $0x118] sm:$0xff]  ;;  %v862_v15 = vld [vmem:[#allocation5 + $0x490] sm:$0xff]  ;;  %v3503_v24 = vpack.c.bf16 %v779_v6, %v777_v4  ;;  %v3597_v4 = vpack.c.bf16 %v870_v57, %v868_v56 }
 0x14d   : > { %3580 = vmatprep.subr.bf16.mxu0 %v3579_v17  ;;  %v865_v17 = vld [vmem:[#allocation5 + $0x4a8] sm:$0xff]  ;;  %v3589_v34 = vpack.c.bf16 %v862_v15, %v860_v12  ;;  %v519_v6 = vld [vmem:[%s4879_s23 + $0x1d8] sm:$0xff]  ;;  %v874_v12 = vld [vmem:[#allocation5 + $0x4f0] sm:$0xff] }
 0x14e   : > { %3504 = vmatprep.subr.bf16.mxu1 %v3503_v24  ;;  %v877_v15 = vld [vmem:[#allocation5 + $0x508] sm:$0xff]  ;;  %v543_v57 = vld [vmem:[%s4879_s23 + $0x298] sm:$0xff] }
 0x14f   : > { %1306 = vmatmul.mubr.f32.gmra.mrb[4].mxu0 %v478_v38  ;;  %v3591_v38 = vpack.c.bf16 %v867_v18, %v865_v17  ;;  %v879_v17 = vld [vmem:[#allocation5 + $0x518] sm:$0xff]  ;;  %v468_v18 = vld [vmem:[%s4879_s23 + $0x40] sm:$0xff] }
 0x150   : > { %3582 = vmatpush1.bf16.msra.mxu0 %v3581_v40  ;;  %1311 = vmatprep.mubr.f32.mxu0 %v487_v44  ;;  %v864_v40 = vld [vmem:[#allocation5 + $0x4a0] sm:$0xff]  ;;  %v871_v44 = vld [vmem:[#allocation5 + $0x4d8] sm:$0xff] }
 0x151   : > { %3584 = vmatprep.subr.bf16.mxu0 %v3583_v46  ;;  %v3505_v46 = vpack.c.bf16 %v778_v29, %v776_v28  ;;  %v3593_v50 = vpack.c.bf16 %v866_v42, %v864_v40  ;;  %v3595_v54 = vpack.c.bf16 %v871_v44, %v869_v43  ;;  %v527_v28 = vld [vmem:[%s4879_s23 + $0x218] sm:$0xff]  ;;  %v3603_v29 = vpack.c.bf16 %v879_v17, %v877_v15  ;;  %v526_v40 = vld [vmem:[%s4879_s23 + $0x210] sm:$0xff]  ;;  %v893_v17 = vld [vmem:[#allocation5 + $0x588] sm:$0xff] }
 0x152   : > { %v535_v43 = vld [vmem:[%s4879_s23 + $0x258] sm:$0xff]  ;;  %v890_v15 = vld [vmem:[#allocation5 + $0x570] sm:$0xff] }
 0x153   : > { %1312 = vmatmul.mubr.f32.gmra.mrb[6].mxu0 %v486_v63  ;;  %3506 = vmatpush1.bf16.msra.mxu1 %v3505_v46  ;;  %v469_v63 = vld [vmem:[%s4879_s23 + $0x48] sm:$0xff]  ;;  %v880_v46 = vld [vmem:[#allocation5 + $0x520] sm:$0xff] }
 0x154   : > { %3586 = vmatpush1.bf16.msra.mxu0 %v3585_v0  ;;  %1317 = vmatprep.mubr.f32.mxu0 %v495_v10  ;;  %v510_v0 = vld [vmem:[%s4879_s23 + $0x190] sm:$0xff]  ;;  %v3599_v10 = vpack.c.bf16 %v875_v59, %v873_v58  ;;  %v884_v59 = vld [vmem:[#allocation5 + $0x540] sm:$0xff] }
 0x155   : > { %3588 = vmatprep.subr.bf16.mxu0 %v3587_v11  ;;  %3763 = vmatprep.subr.bf16.mxu1 %v4901_v3  ;;  %v872_v11 = vld [vmem:[#allocation5 + $0x4e0] sm:$0xff]  ;;  %v477_v3 = vld [vmem:[%s4879_s23 + $0x88] sm:$0xff] }
 0x156   : > { %1037 = vmatmul.mubr.f32.vlgmr.msra.gmra.mrb[0].mxu1 %v460_v60  ;;  %v3601_v24 = vpack.c.bf16 %v874_v12, %v872_v11  ;;  %v886_v60 = vld [vmem:[#allocation5 + $0x550] sm:$0xff]  ;;  %v888_v12 = vld [vmem:[#allocation5 + $0x560] sm:$0xff] }
 0x157   : > { %1318 = vmatmul.mubr.f32.gmra.mrb[8].mxu0 %v494_v33  ;;  %1042 = vmatprep.mubr.f32.mxu1 %v469_v63  ;;  %v876_v33 = vld [vmem:[#allocation5 + $0x500] sm:$0xff]  ;;  %v889_v63 = vld [vmem:[#allocation5 + $0x568] sm:$0xff] }
 0x158   : > { %3590 = vmatpush1.bf16.msra.mxu0 %v3589_v34  ;;  %1323 = vmatprep.mubr.f32.mxu0 %v503_v36  ;;  %v878_v34 = vld [vmem:[#allocation5 + $0x510] sm:$0xff]  ;;  %v881_v36 = vld [vmem:[#allocation5 + $0x528] sm:$0xff] }
 0x159   : > { %3592 = vmatprep.subr.bf16.mxu0 %v3591_v38  ;;  %3779 = vmatpush1.bf16.msra.mxu1 %v4903_v7  ;;  %v883_v7 = vld [vmem:[#allocation5 + $0x538] sm:$0xff]  ;;  %v476_v38 = vld [vmem:[%s4879_s23 + $0x80] sm:$0xff]  ;;  %v3605_v42 = vpack.c.bf16 %v878_v34, %v876_v33  ;;  %v894_v33 = vld [vmem:[#allocation5 + $0x590] sm:$0xff] }
 0x15a   : > { %3764 = vmatprep.subr.bf16.mxu1 %v4905_v8  ;;  %1043 = vmatmul.mubr.f32.gmra.mrb[2].mxu1 %v468_v18  ;;  %v485_v8 = vld [vmem:[%s4879_s23 + $0xc8] sm:$0xff]  ;;  %v3607_v44 = vpack.c.bf16 %v883_v7, %v881_v36  ;;  %v500_v18 = vld [vmem:[%s4879_s23 + $0x140] sm:$0xff]  ;;  %v558_v7 = vld [vmem:[%s4879_s23 + $0x310] sm:$0xff] }
 0x15b   : > { %1324 = vmatmul.mubr.f32.gmra.mrb[10].mxu0 %v502_v47  ;;  %1048 = vmatprep.mubr.f32.mxu1 %v477_v3  ;;  %v882_v47 = vld [vmem:[#allocation5 + $0x530] sm:$0xff]  ;;  %v897_v34 = vld [vmem:[#allocation5 + $0x5a8] sm:$0xff]  ;;  %v508_v36 = vld [vmem:[%s4879_s23 + $0x180] sm:$0xff] }
 0x15c   : > { %3594 = vmatpush1.bf16.msra.mxu0 %v3593_v50  ;;  %1329 = vmatprep.mubr.f32.mxu0 %v511_v53  ;;  %v885_v50 = vld [vmem:[#allocation5 + $0x548] sm:$0xff]  ;;  %v484_v53 = vld [vmem:[%s4879_s23 + $0xc0] sm:$0xff]  ;;  %v3609_v56 = vpack.c.bf16 %v882_v47, %v880_v46  ;;  %v550_v3 = vld [vmem:[%s4879_s23 + $0x2d0] sm:$0xff] }
 0x15d   : > { %3596 = vmatprep.subr.bf16.mxu0 %v3595_v54  ;;  %3780 = vmatpush1.bf16.msra.mxu1 %v4909_v13  ;;  %v887_v13 = vld [vmem:[#allocation5 + $0x558] sm:$0xff]  ;;  %v534_v54 = vld [vmem:[%s4879_s23 + $0x250] sm:$0xff]  ;;  %v516_v46 = vld [vmem:[%s4879_s23 + $0x1c0] sm:$0xff] }
 0x15e   : > { %3765 = vmatprep.subr.bf16.mxu1 %v4912_v14  ;;  %1049 = vmatmul.mubr.f32.gmra.mrb[4].mxu1 %v476_v38  ;;  %v493_v14 = vld [vmem:[%s4879_s23 + $0x108] sm:$0xff]  ;;  %v3611_v58 = vpack.c.bf16 %v887_v13, %v885_v50  ;;  %v566_v47 = vld [vmem:[%s4879_s23 + $0x350] sm:$0xff]  ;;  %v575_v13 = vld [vmem:[%s4879_s23 + $0x398] sm:$0xff] }
 0x15f   : > { %1330 = vmatmul.mubr.f32.gmra.mrb[12].mxu0 %v510_v0  ;;  %1054 = vmatprep.mubr.f32.mxu1 %v485_v8  ;;  %v492_v0 = vld [vmem:[%s4879_s23 + $0x100] sm:$0xff]  ;;  %v567_v8 = vld [vmem:[%s4879_s23 + $0x358] sm:$0xff] }
 0x160   : > { %3598 = vmatpush1.bf16.msra.mxu0 %v3597_v4  ;;  %1335 = vmatprep.mubr.f32.mxu0 %v519_v6  ;;  %v542_v4 = vld [vmem:[%s4879_s23 + $0x290] sm:$0xff]  ;;  %v3613_v6 = vpack.c.bf16 %v886_v60, %v884_v59  ;;  %v583_v60 = vld [vmem:[%s4879_s23 + $0x3d8] sm:$0xff] }
 0x161   : > { %3600 = vmatprep.subr.bf16.mxu0 %v3599_v10  ;;  %3781 = vmatpush1.bf16.msra.mxu1 %v4915_v19  ;;  %v891_v19 = vld [vmem:[#allocation5 + $0x578] sm:$0xff] }
 0x162   : > { %3766 = vmatprep.subr.bf16.mxu1 %v4918_v20  ;;  %1055 = vmatmul.mubr.f32.gmra.mrb[6].mxu1 %v484_v53  ;;  %v501_v20 = vld [vmem:[%s4879_s23 + $0x148] sm:$0xff]  ;;  %v551_v10 = vld [vmem:[%s4879_s23 + $0x2d8] sm:$0xff]  ;;  %v3615_v11 = vpack.c.bf16 %v891_v19, %v889_v63  ;;  %v904_v19 = vld [vmem:[#allocation5 + $0x5e0] sm:$0xff] }
 0x163   : > { %1336 = vmatmul.mubr.f32.gmra.mrb[14].mxu0 %v518_v23  ;;  %1060 = vmatprep.mubr.f32.mxu1 %v493_v14  ;;  %v3617_v23 = vpack.c.bf16 %v890_v15, %v888_v12  ;;  %v900_v14 = vld [vmem:[#allocation5 + $0x5c0] sm:$0xff] }
 0x164   : > { %3602 = vmatpush1.bf16.msra.mxu0 %v3601_v24  ;;  %1341 = vmatprep.mubr.f32.mxu0 %v527_v28  ;;  %v559_v24 = vld [vmem:[%s4879_s23 + $0x318] sm:$0xff]  ;;  %v908_v15 = vld [vmem:[#allocation5 + $0x600] sm:$0xff] }
 0x165   : > { %3604 = vmatprep.subr.bf16.mxu0 %v3603_v29  ;;  %3782 = vmatpush1.bf16.msra.mxu1 %v4921_v25  ;;  %v895_v25 = vld [vmem:[#allocation5 + $0x598] sm:$0xff]  ;;  %v892_v29 = vld [vmem:[#allocation5 + $0x580] sm:$0xff] }
 0x166   : > { %3767 = vmatprep.subr.bf16.mxu1 %v4924_v26  ;;  %1061 = vmatmul.mubr.f32.gmra.mrb[8].mxu1 %v492_v0  ;;  %v509_v26 = vld [vmem:[%s4879_s23 + $0x188] sm:$0xff]  ;;  %v3619_v28 = vpack.c.bf16 %v895_v25, %v893_v17  ;;  %v3621_v38 = vpack.c.bf16 %v894_v33, %v892_v29  ;;  %v906_v0 = vld [vmem:[#allocation5 + $0x5f0] sm:$0xff] }
 0x167   : > { %1342 = vmatmul.mubr.f32.gmra.mrb[16].mxu0 %v526_v40  ;;  %1066 = vmatprep.mubr.f32.mxu1 %v501_v20  ;;  %v909_v20 = vld [vmem:[#allocation5 + $0x608] sm:$0xff]  ;;  %v910_v17 = vld [vmem:[#allocation5 + $0x610] sm:$0xff] }
 0x168   : > { %3606 = vmatpush1.bf16.msra.mxu0 %v3605_v42  ;;  %1347 = vmatprep.mubr.f32.mxu0 %v535_v43  ;;  %v896_v42 = vld [vmem:[#allocation5 + $0x5a0] sm:$0xff]  ;;  %v898_v43 = vld [vmem:[#allocation5 + $0x5b0] sm:$0xff]  ;;  %v913_v25 = vld [vmem:[#allocation5 + $0x628] sm:$0xff] }
 0x169   : > { %3608 = vmatprep.subr.bf16.mxu0 %v3607_v44  ;;  %3783 = vmatpush1.bf16.msra.mxu1 %v4927_v31  ;;  %v899_v31 = vld [vmem:[#allocation5 + $0x5b8] sm:$0xff]  ;;  %v901_v44 = vld [vmem:[#allocation5 + $0x5c8] sm:$0xff]  ;;  %v3625_v50 = vpack.c.bf16 %v898_v43, %v896_v42  ;;  %v914_v29 = vld [vmem:[#allocation5 + $0x630] sm:$0xff] }
 0x16a   : > { %3768 = vmatprep.subr.bf16.mxu1 %v4930_v32  ;;  %1067 = vmatmul.mubr.f32.gmra.mrb[10].mxu1 %v500_v18  ;;  %v517_v32 = vld [vmem:[%s4879_s23 + $0x1c8] sm:$0xff]  ;;  %v3623_v40 = vpack.c.bf16 %v899_v31, %v897_v34  ;;  %v540_v18 = vld [vmem:[%s4879_s23 + $0x280] sm:$0xff] }
 0x16b   : > { %1348 = vmatmul.mubr.f32.gmra.mrb[18].mxu0 %v534_v54  ;;  %1072 = vmatprep.mubr.f32.mxu1 %v509_v26  ;;  %v902_v54 = vld [vmem:[#allocation5 + $0x5d0] sm:$0xff]  ;;  %v464_v26 = vld [vmem:[%s4879_s23 + $0x20] sm:$0xff]  ;;  %v917_v33 = vld [vmem:[#allocation5 + $0x648] sm:$0xff] }
 0x16c   : > { %3610 = vmatpush1.bf16.msra.mxu0 %v3609_v56  ;;  %1353 = vmatprep.mubr.f32.mxu0 %v543_v57  ;;  %v905_v56 = vld [vmem:[#allocation5 + $0x5e8] sm:$0xff]  ;;  %v524_v57 = vld [vmem:[%s4879_s23 + $0x200] sm:$0xff]  ;;  %v3629_v59 = vpack.c.bf16 %v902_v54, %v900_v14 }
 0x16d   : > { %3612 = vmatprep.subr.bf16.mxu0 %v3611_v58  ;;  %3784 = vmatpush1.bf16.msra.mxu1 %v4933_v37  ;;  %v903_v37 = vld [vmem:[#allocation5 + $0x5d8] sm:$0xff]  ;;  %v574_v58 = vld [vmem:[%s4879_s23 + $0x390] sm:$0xff]  ;;  %v548_v34 = vld [vmem:[%s4879_s23 + $0x2c0] sm:$0xff] }
 0x16e   : > { %3769 = vmatprep.subr.bf16.mxu1 %v4936_v39  ;;  %1073 = vmatmul.mubr.f32.gmra.mrb[12].mxu1 %v508_v36  ;;  %v525_v39 = vld [vmem:[%s4879_s23 + $0x208] sm:$0xff]  ;;  %v3627_v53 = vpack.c.bf16 %v903_v37, %v901_v44  ;;  %v472_v31 = vld [vmem:[%s4879_s23 + $0x60] sm:$0xff] }
 0x16f   : > { %1354 = vmatmul.mubr.f32.gmra.mrb[20].mxu0 %v542_v4  ;;  %1078 = vmatprep.mubr.f32.mxu1 %v517_v32  ;;  %v532_v4 = vld [vmem:[%s4879_s23 + $0x240] sm:$0xff]  ;;  %v481_v32 = vld [vmem:[%s4879_s23 + $0xa8] sm:$0xff] }
 0x170   : > { %3614 = vmatpush1.bf16.msra.mxu0 %v3613_v6  ;;  %1359 = vmatprep.mubr.f32.mxu0 %v551_v10  ;;  %v582_v6 = vld [vmem:[%s4879_s23 + $0x3d0] sm:$0xff]  ;;  %v3633_v10 = vpack.c.bf16 %v906_v0, %v904_v19  ;;  %v556_v42 = vld [vmem:[%s4879_s23 + $0x300] sm:$0xff]  ;;  %v489_v37 = vld [vmem:[%s4879_s23 + $0xe8] sm:$0xff] }
 0x171   : > { %3616 = vmatprep.subr.bf16.mxu0 %v3615_v11  ;;  %3785 = vmatpush1.bf16.msra.mxu1 %v4940_v49  ;;  %v907_v49 = vld [vmem:[#allocation5 + $0x5f8] sm:$0xff]  ;;  %v465_v11 = vld [vmem:[%s4879_s23 + $0x28] sm:$0xff]  ;;  %v480_v43 = vld [vmem:[%s4879_s23 + $0xa0] sm:$0xff] }
 0x172   : > { %3770 = vmatprep.subr.bf16.mxu1 %v4943_v52  ;;  %1079 = vmatmul.mubr.f32.gmra.mrb[14].mxu1 %v516_v46  ;;  %v533_v52 = vld [vmem:[%s4879_s23 + $0x248] sm:$0xff]  ;;  %v3631_v63 = vpack.c.bf16 %v907_v49, %v905_v56  ;;  %v924_v49 = vld [vmem:[#allocation5 + $0x680] sm:$0xff] }
 0x173   : > { %1360 = vmatmul.mubr.f32.gmra.mrb[22].mxu0 %v550_v3  ;;  %1084 = vmatprep.mubr.f32.mxu1 %v525_v39  ;;  %v3637_v3 = vpack.c.bf16 %v910_v17, %v908_v15  ;;  %v920_v39 = vld [vmem:[#allocation5 + $0x660] sm:$0xff]  ;;  %v497_v54 = vld [vmem:[%s4879_s23 + $0x128] sm:$0xff]  ;;  %v934_v15 = vld [vmem:[#allocation5 + $0x6d0] sm:$0xff] }
 0x174   : > { %3618 = vmatpush1.bf16.msra.mxu0 %v3617_v23  ;;  %1365 = vmatprep.mubr.f32.mxu0 %v559_v24  ;;  %v473_v23 = vld [vmem:[%s4879_s23 + $0x68] sm:$0xff]  ;;  %v928_v0 = vld [vmem:[#allocation5 + $0x6a0] sm:$0xff] }
 0x175   : > { %3620 = vmatprep.subr.bf16.mxu0 %v3619_v28  ;;  %3786 = vmatpush1.bf16.msra.mxu1 %v4946_v61  ;;  %v911_v61 = vld [vmem:[#allocation5 + $0x618] sm:$0xff]  ;;  %v912_v28 = vld [vmem:[#allocation5 + $0x620] sm:$0xff]  ;;  %v937_v17 = vld [vmem:[#allocation5 + $0x6e8] sm:$0xff] }
 0x176   : > { %3771 = vmatprep.subr.bf16.mxu1 %v4949_v1  ;;  %1085 = vmatmul.mubr.f32.gmra.mrb[16].mxu1 %v524_v57  ;;  %v541_v1 = vld [vmem:[%s4879_s23 + $0x288] sm:$0xff]  ;;  %v3635_v12 = vpack.c.bf16 %v911_v61, %v909_v20  ;;  %v3641_v36 = vpack.c.bf16 %v914_v29, %v912_v28  ;;  %v926_v57 = vld [vmem:[#allocation5 + $0x690] sm:$0xff]  ;;  %v943_v28 = vld [vmem:[#allocation5 + $0x718] sm:$0xff] }
 0x177   : > { %1366 = vmatmul.mubr.f32.gmra.mrb[24].mxu0 %v558_v7  ;;  %1090 = vmatprep.mubr.f32.mxu1 %v533_v52  ;;  %v929_v52 = vld [vmem:[#allocation5 + $0x6a8] sm:$0xff]  ;;  %v930_v20 = vld [vmem:[#allocation5 + $0x6b0] sm:$0xff] }
 0x178   : > { %3622 = vmatpush1.bf16.msra.mxu0 %v3621_v38  ;;  %1371 = vmatprep.mubr.f32.mxu0 %v567_v8  ;;  %v916_v38 = vld [vmem:[#allocation5 + $0x640] sm:$0xff]  ;;  %v918_v8 = vld [vmem:[#allocation5 + $0x650] sm:$0xff]  ;;  %v933_v61 = vld [vmem:[#allocation5 + $0x6c8] sm:$0xff] }
 0x179   : > { %3624 = vmatprep.subr.bf16.mxu0 %v3623_v40  ;;  %3787 = vmatpush1.bf16.msra.mxu1 %v4952_v16  ;;  %v915_v16 = vld [vmem:[#allocation5 + $0x638] sm:$0xff]  ;;  %v921_v40 = vld [vmem:[#allocation5 + $0x668] sm:$0xff]  ;;  %v3645_v44 = vpack.c.bf16 %v918_v8, %v916_v38 }
 0x17a   : > { %3772 = vmatprep.subr.bf16.mxu1 %v4955_v21  ;;  %1091 = vmatmul.mubr.f32.gmra.mrb[18].mxu1 %v532_v4  ;;  %v549_v21 = vld [vmem:[%s4879_s23 + $0x2c8] sm:$0xff]  ;;  %v3639_v24 = vpack.c.bf16 %v915_v16, %v913_v25  ;;  %v580_v4 = vld [vmem:[%s4879_s23 + $0x3c0] sm:$0xff]  ;;  %v947_v38 = vld [vmem:[#allocation5 + $0x738] sm:$0xff] }
 0x17b   : > { %1372 = vmatmul.mubr.f32.gmra.mrb[26].mxu0 %v566_v47  ;;  %1096 = vmatprep.mubr.f32.mxu1 %v541_v1  ;;  %v922_v47 = vld [vmem:[#allocation5 + $0x670] sm:$0xff]  ;;  %v504_v1 = vld [vmem:[%s4879_s23 + $0x160] sm:$0xff]  ;;  %v605_v29 = vld [vmem:[%s4879_s23 + $0x488] sm:$0xff] }
 0x17c   : > { %3626 = vmatpush1.bf16.msra.mxu0 %v3625_v50  ;;  %1377 = vmatprep.mubr.f32.mxu0 %v575_v13  ;;  %v925_v50 = vld [vmem:[#allocation5 + $0x688] sm:$0xff]  ;;  %v564_v13 = vld [vmem:[%s4879_s23 + $0x340] sm:$0xff]  ;;  %v3649_v14 = vpack.c.bf16 %v922_v47, %v920_v39  ;;  %v951_v39 = vld [vmem:[#allocation5 + $0x758] sm:$0xff] }
 0x17d   : > { %3628 = vmatprep.subr.bf16.mxu0 %v3627_v53  ;;  %3788 = vmatpush1.bf16.msra.mxu1 %v4958_v35  ;;  %v919_v35 = vld [vmem:[#allocation5 + $0x658] sm:$0xff]  ;;  %v488_v53 = vld [vmem:[%s4879_s23 + $0xe0] sm:$0xff]  ;;  %v613_v8 = vld [vmem:[%s4879_s23 + $0x4c8] sm:$0xff] }
 0x17e   : > { %3773 = vmatprep.subr.bf16.mxu1 %v4961_v41  ;;  %1097 = vmatmul.mubr.f32.gmra.mrb[20].mxu1 %v540_v18  ;;  %v557_v41 = vld [vmem:[%s4879_s23 + $0x308] sm:$0xff]  ;;  %v3643_v7 = vpack.c.bf16 %v919_v35, %v917_v33  ;;  %v588_v25 = vld [vmem:[%s4879_s23 + $0x400] sm:$0xff] }
 0x17f   : > { %1378 = vmatmul.mubr.f32.gmra.mrb[28].mxu0 %v574_v58  ;;  %1102 = vmatprep.mubr.f32.mxu1 %v549_v21  ;;  %v572_v58 = vld [vmem:[%s4879_s23 + $0x380] sm:$0xff]  ;;  %v521_v21 = vld [vmem:[%s4879_s23 + $0x1e8] sm:$0xff] }
 0x180   : > { %3630 = vmatpush1.bf16.msra.mxu0 %v3629_v59  ;;  %1383 = vmatprep.mubr.f32.mxu0 %v583_v60  ;;  %v496_v59 = vld [vmem:[%s4879_s23 + $0x120] sm:$0xff]  ;;  %v3653_v60 = vpack.c.bf16 %v926_v57, %v924_v49  ;;  %v621_v47 = vld [vmem:[%s4879_s23 + $0x508] sm:$0xff]  ;;  %v955_v49 = vld [vmem:[#allocation5 + $0x778] sm:$0xff] }
 0x181   : > { %3632 = vmatprep.subr.bf16.mxu0 %v3631_v63  ;;  %3789 = vmatpush1.bf16.msra.mxu1 %v4964_v51  ;;  %v923_v51 = vld [vmem:[#allocation5 + $0x678] sm:$0xff]  ;;  %v505_v63 = vld [vmem:[%s4879_s23 + $0x168] sm:$0xff]  ;;  %v512_v16 = vld [vmem:[%s4879_s23 + $0x1a0] sm:$0xff] }
 0x182   : > { %3774 = vmatprep.subr.bf16.mxu1 %v4967_v55  ;;  %1103 = vmatmul.mubr.f32.gmra.mrb[22].mxu1 %v548_v34  ;;  %v565_v55 = vld [vmem:[%s4879_s23 + $0x348] sm:$0xff]  ;;  %v3647_v46 = vpack.c.bf16 %v923_v51, %v921_v40  ;;  %v520_v33 = vld [vmem:[%s4879_s23 + $0x1e0] sm:$0xff] }
 0x183   : > { %1384 = vmatmul.mubr.f32.gmra.mrb[30].mxu0 %v582_v6  ;;  %1108 = vmatprep.mubr.f32.mxu1 %v557_v41  ;;  %v3657_v6 = vpack.c.bf16 %v930_v20, %v928_v0  ;;  %v529_v34 = vld [vmem:[%s4879_s23 + $0x228] sm:$0xff]  ;;  %v528_v40 = vld [vmem:[%s4879_s23 + $0x220] sm:$0xff]  ;;  %v959_v0 = vld [vmem:[#allocation5 + $0x798] sm:$0xff] }
 0x184   : > { %3634 = vmatpush1.bf16.msra.mxu0 %v3633_v10  ;;  %1550 = vmatprep.mubr.f32.mxu0 %v465_v11  ;;  %v513_v10 = vld [vmem:[%s4879_s23 + $0x1a8] sm:$0xff] }
 0x185   : > { %3636 = vmatprep.subr.bf16.mxu0 %v3635_v12  ;;  %3790 = vmatpush1.bf16.msra.mxu1 %v4970_v5  ;;  %v927_v5 = vld [vmem:[#allocation5 + $0x698] sm:$0xff]  ;;  %v932_v12 = vld [vmem:[#allocation5 + $0x6c0] sm:$0xff]  ;;  %v629_v57 = vld [vmem:[%s4879_s23 + $0x548] sm:$0xff] }
 0x186   : > { %3775 = vmatprep.subr.bf16.mxu1 %v4973_v9  ;;  %1109 = vmatmul.mubr.f32.gmra.mrb[24].mxu1 %v556_v42  ;;  %v573_v9 = vld [vmem:[%s4879_s23 + $0x388] sm:$0xff]  ;;  %v3651_v56 = vpack.c.bf16 %v927_v5, %v925_v50  ;;  %v3661_v18 = vpack.c.bf16 %v934_v15, %v932_v12  ;;  %v536_v50 = vld [vmem:[%s4879_s23 + $0x260] sm:$0xff]  ;;  %v963_v12 = vld [vmem:[#allocation5 + $0x7b8] sm:$0xff] }
 0x187   : > { %1551 = vmatmul.mubr.f32.vlgmr.msra.gmra.mrb[0].mxu0 %v464_v26  ;;  %1114 = vmatprep.mubr.f32.mxu1 %v565_v55  ;;  %v537_v42 = vld [vmem:[%s4879_s23 + $0x268] sm:$0xff] }
 0x188   : > { %3638 = vmatpush1.bf16.msra.mxu0 %v3637_v3  ;;  %1556 = vmatprep.mubr.f32.mxu0 %v473_v23  ;;  %v936_v3 = vld [vmem:[#allocation5 + $0x6e0] sm:$0xff]  ;;  %v938_v23 = vld [vmem:[#allocation5 + $0x6f0] sm:$0xff]  ;;  %v637_v20 = vld [vmem:[%s4879_s23 + $0x588] sm:$0xff] }
 0x189   : > { %3640 = vmatprep.subr.bf16.mxu0 %v3639_v24  ;;  %3791 = vmatpush1.bf16.msra.mxu1 %v4976_v27  ;;  %v931_v27 = vld [vmem:[#allocation5 + $0x6b8] sm:$0xff]  ;;  %v941_v24 = vld [vmem:[#allocation5 + $0x708] sm:$0xff]  ;;  %v3665_v35 = vpack.c.bf16 %v938_v23, %v936_v3 }
 0x18a   : > { %3776 = vmatprep.subr.bf16.mxu1 %v4979_v30  ;;  %1115 = vmatmul.mubr.f32.gmra.mrb[26].mxu1 %v564_v13  ;;  %v581_v30 = vld [vmem:[%s4879_s23 + $0x3c8] sm:$0xff]  ;;  %v3655_v19 = vpack.c.bf16 %v931_v27, %v929_v52  ;;  %v3667_v41 = vpack.c.bf16 %v943_v28, %v941_v24  ;;  %v544_v52 = vld [vmem:[%s4879_s23 + $0x2a0] sm:$0xff]  ;;  %v967_v3 = vld [vmem:[#allocation5 + $0x7d8] sm:$0xff] }
 0x18b   : > { %1557 = vmatmul.mubr.f32.gmra.mrb[2].mxu0 %v472_v31  ;;  %1120 = vmatprep.mubr.f32.mxu1 %v573_v9  ;;  %v940_v31 = vld [vmem:[#allocation5 + $0x700] sm:$0xff]  ;;  %v545_v13 = vld [vmem:[%s4879_s23 + $0x2a8] sm:$0xff] }
 0x18c   : > { %1562 = vmatprep.mubr.f32.mxu0 %v481_v32  ;;  %3642 = vmatpush1.bf16.msra.mxu0 %v3641_v36  ;;  %v942_v36 = vld [vmem:[#allocation5 + $0x710] sm:$0xff]  ;;  %v604_v32 = vld [vmem:[%s4879_s23 + $0x480] sm:$0xff]  ;;  %v645_v15 = vld [vmem:[%s4879_s23 + $0x5c8] sm:$0xff] }
 0x18d   : > { %3644 = vmatprep.subr.bf16.mxu0 %v3643_v7  ;;  %3792 = vmatpush1.bf16.msra.mxu1 %v4982_v45  ;;  %v935_v45 = vld [vmem:[#allocation5 + $0x6d8] sm:$0xff]  ;;  %v945_v7 = vld [vmem:[#allocation5 + $0x728] sm:$0xff]  ;;  %v3669_v51 = vpack.c.bf16 %v942_v36, %v940_v31  ;;  %v568_v24 = vld [vmem:[%s4879_s23 + $0x360] sm:$0xff] }
 0x18e   : > { %3777 = vmatprep.subr.bf16.mxu1 %v4985_v48  ;;  %1121 = vmatmul.mubr.f32.gmra.mrb[28].mxu1 %v572_v58  ;;  %v589_v48 = vld [vmem:[%s4879_s23 + $0x408] sm:$0xff]  ;;  %v3659_v11 = vpack.c.bf16 %v935_v45, %v933_v61  ;;  %v3671_v55 = vpack.c.bf16 %v947_v38, %v945_v7  ;;  %v552_v61 = vld [vmem:[%s4879_s23 + $0x2e0] sm:$0xff]  ;;  %v971_v31 = vld [vmem:[#allocation5 + $0x7f8] sm:$0xff] }
 0x18f   : > { %1563 = vmatmul.mubr.f32.gmra.mrb[4].mxu0 %v480_v43  ;;  %1126 = vmatprep.mubr.f32.mxu1 %v581_v30  ;;  %v944_v43 = vld [vmem:[#allocation5 + $0x720] sm:$0xff]  ;;  %v553_v58 = vld [vmem:[%s4879_s23 + $0x2e8] sm:$0xff] }
 0x190   : > { %1568 = vmatprep.mubr.f32.mxu0 %v489_v37  ;;  %3646 = vmatpush1.bf16.msra.mxu0 %v3645_v44  ;;  %v946_v44 = vld [vmem:[#allocation5 + $0x730] sm:$0xff]  ;;  %v612_v37 = vld [vmem:[%s4879_s23 + $0x4c0] sm:$0xff]  ;;  %v653_v23 = vld [vmem:[%s4879_s23 + $0x608] sm:$0xff] }
 0x191   : > { %3648 = vmatprep.subr.bf16.mxu0 %v3647_v46  ;;  %3793 = vmatpush1.bf16.msra.mxu1 %v4988_v62  ;;  %v939_v62 = vld [vmem:[#allocation5 + $0x6f8] sm:$0xff]  ;;  %v949_v46 = vld [vmem:[#allocation5 + $0x748] sm:$0xff]  ;;  %v3673_v5 = vpack.c.bf16 %v946_v44, %v944_v43  ;;  %v584_v43 = vld [vmem:[%s4879_s23 + $0x3e0] sm:$0xff] }
 0x192   : > { %3778 = vmatprep.subr.bf16.mxu1 %v4991_v2  ;;  %1127 = vmatmul.mubr.f32.gmra.mrb[30].mxu1 %v580_v4  ;;  %v597_v2 = vld [vmem:[%s4879_s23 + $0x448] sm:$0xff]  ;;  %v3663_v26 = vpack.c.bf16 %v939_v62, %v937_v17  ;;  %v3675_v9 = vpack.c.bf16 %v951_v39, %v949_v46  ;;  %v560_v17 = vld [vmem:[%s4879_s23 + $0x320] sm:$0xff] }
 0x193   : > { %1569 = vmatmul.mubr.f32.gmra.mrb[6].mxu0 %v488_v53  ;;  %1132 = vmatprep.mubr.f32.mxu1 %v589_v48  ;;  %v948_v53 = vld [vmem:[#allocation5 + $0x740] sm:$0xff]  ;;  %v561_v4 = vld [vmem:[%s4879_s23 + $0x328] sm:$0xff] }
 0x194   : > { %1574 = vmatprep.mubr.f32.mxu0 %v497_v54  ;;  %3650 = vmatpush1.bf16.msra.mxu0 %v3649_v14  ;;  %v950_v14 = vld [vmem:[#allocation5 + $0x750] sm:$0xff]  ;;  %v620_v54 = vld [vmem:[%s4879_s23 + $0x500] sm:$0xff]  ;;  %v661_v36 = vld [vmem:[%s4879_s23 + $0x648] sm:$0xff] }
 0x195   : > { %3652 = vmatprep.subr.bf16.mxu0 %v3651_v56  ;;  %3794 = vmatpush1.bf16.msra.mxu1 %v4994_v22  ;;  %v596_v22 = vld [vmem:[%s4879_s23 + $0x440] sm:$0xff]  ;;  %v953_v56 = vld [vmem:[#allocation5 + $0x768] sm:$0xff]  ;;  %v3677_v27 = vpack.c.bf16 %v950_v14, %v948_v53 }
 0x196   : > { %1133 = vmatmul.mubr.f32.gmra.mrb[32].mxu1 %v588_v25  ;;  %v3679_v30 = vpack.c.bf16 %v955_v49, %v953_v56  ;;  %v569_v25 = vld [vmem:[%s4879_s23 + $0x368] sm:$0xff]  ;;  %v668_v46 = vld [vmem:[%s4879_s23 + $0x680] sm:$0xff] }
 0x197   : > { %1575 = vmatmul.mubr.f32.gmra.mrb[8].mxu0 %v496_v59  ;;  %1138 = vmatprep.mubr.f32.mxu1 %v597_v2  ;;  %v952_v59 = vld [vmem:[#allocation5 + $0x760] sm:$0xff]  ;;  %v585_v38 = vld [vmem:[%s4879_s23 + $0x3e8] sm:$0xff] }
 0x198   : > { %1580 = vmatprep.mubr.f32.mxu0 %v505_v63  ;;  %3654 = vmatpush1.bf16.msra.mxu0 %v3653_v60  ;;  %v954_v60 = vld [vmem:[#allocation5 + $0x770] sm:$0xff]  ;;  %v628_v63 = vld [vmem:[%s4879_s23 + $0x540] sm:$0xff]  ;;  %v677_v39 = vld [vmem:[%s4879_s23 + $0x6c8] sm:$0xff] }
 0x199   : > { %3656 = vmatprep.subr.bf16.mxu0 %v3655_v19  ;;  %v957_v19 = vld [vmem:[#allocation5 + $0x788] sm:$0xff]  ;;  %v3681_v45 = vpack.c.bf16 %v954_v60, %v952_v59  ;;  %v684_v14 = vld [vmem:[%s4879_s23 + $0x700] sm:$0xff] }
 0x19a   : > { %1139 = vmatmul.mubr.f32.gmra.mrb[34].mxu1 %v596_v22  ;;  %v3683_v48 = vpack.c.bf16 %v959_v0, %v957_v19  ;;  %v577_v22 = vld [vmem:[%s4879_s23 + $0x3a8] sm:$0xff]  ;;  %v608_v56 = vld [vmem:[%s4879_s23 + $0x4a0] sm:$0xff]  ;;  %v591_v0 = vld [vmem:[%s4879_s23 + $0x418] sm:$0xff] }
 0x19b   : > { %1581 = vmatmul.mubr.f32.gmra.mrb[10].mxu0 %v504_v1  ;;  %1144 = vmatprep.mubr.f32.mxu1 %v605_v29  ;;  %v956_v1 = vld [vmem:[#allocation5 + $0x780] sm:$0xff]  ;;  %v609_v53 = vld [vmem:[%s4879_s23 + $0x4a8] sm:$0xff] }
 0x19c   : > { %1586 = vmatprep.mubr.f32.mxu0 %v513_v10  ;;  %3658 = vmatpush1.bf16.msra.mxu0 %v3657_v6  ;;  %v958_v6 = vld [vmem:[#allocation5 + $0x790] sm:$0xff]  ;;  %v636_v10 = vld [vmem:[%s4879_s23 + $0x580] sm:$0xff]  ;;  %v617_v49 = vld [vmem:[%s4879_s23 + $0x4e8] sm:$0xff] }
 0x19d   : > { %3660 = vmatprep.subr.bf16.mxu0 %v3659_v11  ;;  %v961_v11 = vld [vmem:[#allocation5 + $0x7a8] sm:$0xff]  ;;  %v3685_v62 = vpack.c.bf16 %v958_v6, %v956_v1  ;;  %v624_v60 = vld [vmem:[%s4879_s23 + $0x520] sm:$0xff]  ;;  %v598_v6 = vld [vmem:[%s4879_s23 + $0x450] sm:$0xff] }
 0x19e   : > { %1145 = vmatmul.mubr.f32.gmra.mrb[36].mxu1 %v604_v32  ;;  %v3687_v2 = vpack.c.bf16 %v963_v12, %v961_v11  ;;  %v576_v32 = vld [vmem:[%s4879_s23 + $0x3a0] sm:$0xff]  ;;  %v709_v59 = vld [vmem:[%s4879_s23 + $0x7c8] sm:$0xff] }
 0x19f   : > { %1587 = vmatmul.mubr.f32.gmra.mrb[12].mxu0 %v512_v16  ;;  %1150 = vmatprep.mubr.f32.mxu1 %v613_v8  ;;  %v960_v16 = vld [vmem:[#allocation5 + $0x7a0] sm:$0xff]  ;;  %v649_v1 = vld [vmem:[%s4879_s23 + $0x5e8] sm:$0xff] }
 0x1a0   : > { %1592 = vmatprep.mubr.f32.mxu0 %v521_v21  ;;  %3662 = vmatpush1.bf16.msra.mxu0 %v3661_v18  ;;  %v962_v18 = vld [vmem:[#allocation5 + $0x7b0] sm:$0xff]  ;;  %v644_v21 = vld [vmem:[%s4879_s23 + $0x5c0] sm:$0xff]  ;;  %v657_v12 = vld [vmem:[%s4879_s23 + $0x628] sm:$0xff] }
 0x1a1   : > { %3664 = vmatprep.subr.bf16.mxu0 %v3663_v26  ;;  %v965_v26 = vld [vmem:[#allocation5 + $0x7c8] sm:$0xff]  ;;  %v3689_v28 = vpack.c.bf16 %v962_v18, %v960_v16  ;;  %v708_v19 = vld [vmem:[%s4879_s23 + $0x7c0] sm:$0xff]  ;;  %v623_v16 = vld [vmem:[%s4879_s23 + $0x518] sm:$0xff] }
 0x1a2   : > { %1151 = vmatmul.mubr.f32.gmra.mrb[38].mxu1 %v612_v37  ;;  %v3691_v29 = vpack.c.bf16 %v967_v3, %v965_v26  ;;  %v593_v37 = vld [vmem:[%s4879_s23 + $0x428] sm:$0xff]  ;;  %v648_v11 = vld [vmem:[%s4879_s23 + $0x5e0] sm:$0xff]  ;;  %v622_v26 = vld [vmem:[%s4879_s23 + $0x510] sm:$0xff] }
 0x1a3   : > { %1593 = vmatmul.mubr.f32.gmra.mrb[14].mxu0 %v520_v33  ;;  %1156 = vmatprep.mubr.f32.mxu1 %v621_v47  ;;  %v964_v33 = vld [vmem:[#allocation5 + $0x7c0] sm:$0xff]  ;;  %v631_v3 = vld [vmem:[%s4879_s23 + $0x558] sm:$0xff] }
 0x1a4   : > { %1598 = vmatprep.mubr.f32.mxu0 %v529_v34  ;;  %3666 = vmatpush1.bf16.msra.mxu0 %v3665_v35  ;;  %v966_v35 = vld [vmem:[#allocation5 + $0x7d0] sm:$0xff]  ;;  %v652_v34 = vld [vmem:[%s4879_s23 + $0x600] sm:$0xff] }
 0x1a5   : > { %3668 = vmatprep.subr.bf16.mxu0 %v3667_v41  ;;  %v969_v41 = vld [vmem:[#allocation5 + $0x7e8] sm:$0xff]  ;;  %v3693_v7 = vpack.c.bf16 %v966_v35, %v964_v33  ;;  %v592_v47 = vld [vmem:[%s4879_s23 + $0x420] sm:$0xff]  ;;  %v638_v35 = vld [vmem:[%s4879_s23 + $0x590] sm:$0xff] }
 0x1a6   : > { %1157 = vmatmul.mubr.f32.gmra.mrb[40].mxu1 %v620_v54  ;;  %v3695_v8 = vpack.c.bf16 %v971_v31, %v969_v41  ;;  %v693_v54 = vld [vmem:[%s4879_s23 + $0x748] sm:$0xff]  ;;  %v664_v18 = vld [vmem:[%s4879_s23 + $0x660] sm:$0xff] }
 0x1a7   : > { %1599 = vmatmul.mubr.f32.gmra.mrb[16].mxu0 %v528_v40  ;;  %1162 = vmatprep.mubr.f32.mxu1 %v629_v57  ;;  %v968_v40 = vld [vmem:[#allocation5 + $0x7e0] sm:$0xff]  ;;  %v689_v33 = vld [vmem:[%s4879_s23 + $0x728] sm:$0xff] }
 0x1a8   : > { %1604 = vmatprep.mubr.f32.mxu0 %v537_v42  ;;  %3670 = vmatpush1.bf16.msra.mxu0 %v3669_v51  ;;  %v970_v51 = vld [vmem:[#allocation5 + $0x7f0] sm:$0xff]  ;;  %v660_v42 = vld [vmem:[%s4879_s23 + $0x640] sm:$0xff]  ;;  %v697_v31 = vld [vmem:[%s4879_s23 + $0x768] sm:$0xff] }
 0x1a9   : > { %3672 = vmatprep.subr.bf16.mxu0 %v3671_v55  ;;  %v669_v55 = vld [vmem:[%s4879_s23 + $0x688] sm:$0xff]  ;;  %v3697_v44 = vpack.c.bf16 %v970_v51, %v968_v40  ;;  %v692_v57 = vld [vmem:[%s4879_s23 + $0x740] sm:$0xff]  ;;  %v663_v40 = vld [vmem:[%s4879_s23 + $0x658] sm:$0xff] }
 0x1aa   : > { %1163 = vmatmul.mubr.f32.gmra.mrb[42].mxu1 %v628_v63  ;;  %v633_v63 = vld [vmem:[%s4879_s23 + $0x568] sm:$0xff]  ;;  %v688_v41 = vld [vmem:[%s4879_s23 + $0x720] sm:$0xff] }
 0x1ab   : > { %1605 = vmatmul.mubr.f32.gmra.mrb[18].mxu0 %v536_v50  ;;  %1168 = vmatprep.mubr.f32.mxu1 %v637_v20  ;;  %v601_v50 = vld [vmem:[%s4879_s23 + $0x468] sm:$0xff]  ;;  %v632_v20 = vld [vmem:[%s4879_s23 + $0x560] sm:$0xff] }
 0x1ac   : > { %1610 = vmatprep.mubr.f32.mxu0 %v545_v13  ;;  %3674 = vmatpush1.bf16.msra.mxu0 %v3673_v5  ;;  %v676_v5 = vld [vmem:[%s4879_s23 + $0x6c0] sm:$0xff]  ;;  %v685_v13 = vld [vmem:[%s4879_s23 + $0x708] sm:$0xff] }
 0x1ad   : > { %3676 = vmatprep.subr.bf16.mxu0 %v3675_v9  ;;  %v600_v9 = vld [vmem:[%s4879_s23 + $0x460] sm:$0xff] }
 0x1ae   : > { %1169 = vmatmul.mubr.f32.gmra.mrb[44].mxu1 %v636_v10  ;;  %v607_v10 = vld [vmem:[%s4879_s23 + $0x498] sm:$0xff]  ;;  %v704_v51 = vld [vmem:[%s4879_s23 + $0x7a0] sm:$0xff] }
 0x1af   : > { %1611 = vmatmul.mubr.f32.gmra.mrb[20].mxu0 %v544_v52  ;;  %1174 = vmatprep.mubr.f32.mxu1 %v645_v15  ;;  %v701_v52 = vld [vmem:[%s4879_s23 + $0x788] sm:$0xff]  ;;  %v606_v15 = vld [vmem:[%s4879_s23 + $0x490] sm:$0xff] }
 0x1b0   : > { %1616 = vmatprep.mubr.f32.mxu0 %v553_v58  ;;  %3678 = vmatpush1.bf16.msra.mxu0 %v3677_v27  ;;  %v616_v27 = vld [vmem:[%s4879_s23 + $0x4e0] sm:$0xff]  ;;  %v625_v58 = vld [vmem:[%s4879_s23 + $0x528] sm:$0xff] }
 0x1b1   : > { %3680 = vmatprep.subr.bf16.mxu0 %v3679_v30  ;;  %v700_v30 = vld [vmem:[%s4879_s23 + $0x780] sm:$0xff] }
 0x1b2   : > { %1175 = vmatmul.mubr.f32.gmra.mrb[46].mxu1 %v644_v21  ;;  %v673_v21 = vld [vmem:[%s4879_s23 + $0x6a8] sm:$0xff] }
 0x1b3   : > { %1617 = vmatmul.mubr.f32.gmra.mrb[22].mxu0 %v552_v61  ;;  %1180 = vmatprep.mubr.f32.mxu1 %v653_v23  ;;  %v641_v61 = vld [vmem:[%s4879_s23 + $0x5a8] sm:$0xff]  ;;  %v672_v23 = vld [vmem:[%s4879_s23 + $0x6a0] sm:$0xff] }
 0x1b4   : > { %1622 = vmatprep.mubr.f32.mxu0 %v561_v4  ;;  %3682 = vmatpush1.bf16.msra.mxu0 %v3681_v45  ;;  %v590_v45 = vld [vmem:[%s4879_s23 + $0x410] sm:$0xff]  ;;  %v599_v4 = vld [vmem:[%s4879_s23 + $0x458] sm:$0xff] }
 0x1b5   : > { %3684 = vmatprep.subr.bf16.mxu0 %v3683_v48  ;;  %v640_v48 = vld [vmem:[%s4879_s23 + $0x5a0] sm:$0xff] }
 0x1b6   : > { %1181 = vmatmul.mubr.f32.gmra.mrb[48].mxu1 %v652_v34  ;;  %v647_v34 = vld [vmem:[%s4879_s23 + $0x5d8] sm:$0xff] }
 0x1b7   : > { %1623 = vmatmul.mubr.f32.gmra.mrb[24].mxu0 %v560_v17  ;;  %1186 = vmatprep.mubr.f32.mxu1 %v661_v36  ;;  %v615_v17 = vld [vmem:[%s4879_s23 + $0x4d8] sm:$0xff]  ;;  %v646_v36 = vld [vmem:[%s4879_s23 + $0x5d0] sm:$0xff] }
 0x1b8   : > { %1628 = vmatprep.mubr.f32.mxu0 %v569_v25  ;;  %3686 = vmatpush1.bf16.msra.mxu0 %v3685_v62  ;;  %v656_v62 = vld [vmem:[%s4879_s23 + $0x620] sm:$0xff]  ;;  %v665_v25 = vld [vmem:[%s4879_s23 + $0x668] sm:$0xff] }
 0x1b9   : > { %3688 = vmatprep.subr.bf16.mxu0 %v3687_v2  ;;  %v614_v2 = vld [vmem:[%s4879_s23 + $0x4d0] sm:$0xff] }
 0x1ba   : > { %1187 = vmatmul.mubr.f32.gmra.mrb[50].mxu1 %v660_v42  ;;  %v713_v42 = vld [vmem:[%s4879_s23 + $0x7e8] sm:$0xff] }
 0x1bb   : > { %1629 = vmatmul.mubr.f32.gmra.mrb[26].mxu0 %v568_v24  ;;  %1192 = vmatprep.mubr.f32.mxu1 %v669_v55  ;;  %v681_v24 = vld [vmem:[%s4879_s23 + $0x6e8] sm:$0xff]  ;;  %v662_v55 = vld [vmem:[%s4879_s23 + $0x650] sm:$0xff] }
 0x1bc   : > { %1634 = vmatprep.mubr.f32.mxu0 %v577_v22  ;;  %3690 = vmatpush1.bf16.msra.mxu0 %v3689_v28  ;;  %v630_v28 = vld [vmem:[%s4879_s23 + $0x550] sm:$0xff]  ;;  %v639_v22 = vld [vmem:[%s4879_s23 + $0x598] sm:$0xff] }
 0x1bd   : > { %3692 = vmatprep.subr.bf16.mxu0 %v3691_v29  ;;  %v680_v29 = vld [vmem:[%s4879_s23 + $0x6e0] sm:$0xff] }
 0x1be   : > { %1193 = vmatmul.mubr.f32.gmra.mrb[52].mxu1 %v668_v46  ;;  %v670_v46 = vld [vmem:[%s4879_s23 + $0x690] sm:$0xff] }
 0x1bf   : > { %1635 = vmatmul.mubr.f32.gmra.mrb[28].mxu0 %v576_v32  ;;  %1198 = vmatprep.mubr.f32.mxu1 %v677_v39  ;;  %v655_v32 = vld [vmem:[%s4879_s23 + $0x618] sm:$0xff] }
 0x1c0   : > { %1640 = vmatprep.mubr.f32.mxu0 %v585_v38  ;;  %3694 = vmatpush1.bf16.msra.mxu0 %v3693_v7  ;;  %v696_v7 = vld [vmem:[%s4879_s23 + $0x760] sm:$0xff]  ;;  %v705_v38 = vld [vmem:[%s4879_s23 + $0x7a8] sm:$0xff]  ;;  %v679_v39 = vld [vmem:[%s4879_s23 + $0x6d8] sm:$0xff] }
 0x1c1   : > { %3696 = vmatprep.subr.bf16.mxu0 %v3695_v8  ;;  %v654_v8 = vld [vmem:[%s4879_s23 + $0x610] sm:$0xff] }
 0x1c2   : > { %1199 = vmatmul.mubr.f32.gmra.mrb[54].mxu1 %v676_v5  ;;  %v678_v5 = vld [vmem:[%s4879_s23 + $0x6d0] sm:$0xff] }
 0x1c3   : > { %1641 = vmatmul.mubr.f32.gmra.mrb[30].mxu0 %v584_v43  ;;  %1204 = vmatprep.mubr.f32.mxu1 %v685_v13  ;;  %v671_v43 = vld [vmem:[%s4879_s23 + $0x698] sm:$0xff] }
 0x1c4   : > { %1646 = vmatprep.mubr.f32.mxu0 %v593_v37  ;;  %3698 = vmatpush1.bf16.msra.mxu0 %v3697_v44  ;;  %v712_v44 = vld [vmem:[%s4879_s23 + $0x7e0] sm:$0xff]  ;;  %v467_v37 = vld [vmem:[%s4879_s23 + $0x38] sm:$0xff] }
 0x1c5   : > { %v687_v13 = vld [vmem:[%s4879_s23 + $0x718] sm:$0xff] }
 0x1c6   : > { %1205 = vmatmul.mubr.f32.gmra.mrb[56].mxu1 %v684_v14  ;;  %v686_v14 = vld [vmem:[%s4879_s23 + $0x710] sm:$0xff] }
 0x1c7   : > { %1647 = vmatmul.mubr.f32.gmra.mrb[32].mxu0 %v592_v47  ;;  %1210 = vmatprep.mubr.f32.mxu1 %v693_v54  ;;  %v466_v47 = vld [vmem:[%s4879_s23 + $0x30] sm:$0xff]  ;;  %v695_v54 = vld [vmem:[%s4879_s23 + $0x758] sm:$0xff] }
 0x1c8   : > { %1652 = vmatprep.mubr.f32.mxu0 %v601_v50  ;;  %v475_v50 = vld [vmem:[%s4879_s23 + $0x78] sm:$0xff] }
 0x1ca   : > { %1211 = vmatmul.mubr.f32.gmra.mrb[58].mxu1 %v692_v57  ;;  %v694_v57 = vld [vmem:[%s4879_s23 + $0x750] sm:$0xff] }
 0x1cb   : > { %1653 = vmatmul.mubr.f32.gmra.mrb[34].mxu0 %v600_v9  ;;  %1216 = vmatprep.mubr.f32.mxu1 %v701_v52  ;;  %v474_v9 = vld [vmem:[%s4879_s23 + $0x70] sm:$0xff]  ;;  %v703_v52 = vld [vmem:[%s4879_s23 + $0x798] sm:$0xff] }
 0x1cc   : > { %1658 = vmatprep.mubr.f32.mxu0 %v609_v53  ;;  %v483_v53 = vld [vmem:[%s4879_s23 + $0xb8] sm:$0xff] }
 0x1ce   : > { %1217 = vmatmul.mubr.f32.gmra.mrb[60].mxu1 %v700_v30  ;;  %v702_v30 = vld [vmem:[%s4879_s23 + $0x790] sm:$0xff] }
 0x1cf   : > { %1659 = vmatmul.mubr.f32.gmra.mrb[36].mxu0 %v608_v56  ;;  %1222 = vmatprep.mubr.f32.mxu1 %v709_v59  ;;  %v482_v56 = vld [vmem:[%s4879_s23 + $0xb0] sm:$0xff]  ;;  %v711_v59 = vld [vmem:[%s4879_s23 + $0x7d8] sm:$0xff] }
 0x1d0   : > { %1664 = vmatprep.mubr.f32.mxu0 %v617_v49  ;;  %v491_v49 = vld [vmem:[%s4879_s23 + $0xf8] sm:$0xff] }
 0x1d2   : > { %1223 = vmatmul.mubr.f32.gmra.mrb[62].mxu1 %v708_v19  ;;  %v710_v19 = vld [vmem:[%s4879_s23 + $0x7d0] sm:$0xff] }
 0x1d3   : > { %1665 = vmatmul.mubr.f32.gmra.mrb[38].mxu0 %v616_v27  ;;  %1389 = vmatprep.mubr.f32.mxu1 %v591_v0  ;;  %v490_v27 = vld [vmem:[%s4879_s23 + $0xf0] sm:$0xff] }
 0x1d4   : > { %1670 = vmatprep.mubr.f32.mxu0 %v625_v58  ;;  %v499_v58 = vld [vmem:[%s4879_s23 + $0x138] sm:$0xff]  ;;  %v506_v0 = vld [vmem:[%s4879_s23 + $0x170] sm:$0xff] }
 0x1d6   : > { %1390 = vmatmul.mubr.f32.vlgmr.msra.gmra.mrb[32].mxu1 %v590_v45  ;;  %v523_v45 = vld [vmem:[%s4879_s23 + $0x1f8] sm:$0xff] }
 0x1d7   : > { %1671 = vmatmul.mubr.f32.gmra.mrb[40].mxu0 %v624_v60  ;;  %1395 = vmatprep.mubr.f32.mxu1 %v599_v4  ;;  %v498_v60 = vld [vmem:[%s4879_s23 + $0x130] sm:$0xff] }
 0x1d8   : > { %1676 = vmatprep.mubr.f32.mxu0 %v633_v63  ;;  %v507_v63 = vld [vmem:[%s4879_s23 + $0x178] sm:$0xff]  ;;  %v522_v4 = vld [vmem:[%s4879_s23 + $0x1f0] sm:$0xff] }
 0x1da   : > { %1396 = vmatmul.mubr.f32.gmra.mrb[34].mxu1 %v598_v6  ;;  %v539_v6 = vld [vmem:[%s4879_s23 + $0x278] sm:$0xff] }
 0x1db   : > { %1677 = vmatmul.mubr.f32.gmra.mrb[42].mxu0 %v632_v20  ;;  %1401 = vmatprep.mubr.f32.mxu1 %v607_v10  ;;  %v515_v20 = vld [vmem:[%s4879_s23 + $0x1b8] sm:$0xff]  ;;  %v538_v10 = vld [vmem:[%s4879_s23 + $0x270] sm:$0xff] }
 0x1dc   : > { %1682 = vmatprep.mubr.f32.mxu0 %v641_v61  ;;  %v514_v61 = vld [vmem:[%s4879_s23 + $0x1b0] sm:$0xff] }
 0x1de   : > { %1402 = vmatmul.mubr.f32.gmra.mrb[36].mxu1 %v606_v15  ;;  %v555_v15 = vld [vmem:[%s4879_s23 + $0x2f8] sm:$0xff] }
 0x1df   : > { %1683 = vmatmul.mubr.f32.gmra.mrb[44].mxu0 %v640_v48  ;;  %1407 = vmatprep.mubr.f32.mxu1 %v615_v17  ;;  %v531_v48 = vld [vmem:[%s4879_s23 + $0x238] sm:$0xff]  ;;  %v554_v17 = vld [vmem:[%s4879_s23 + $0x2f0] sm:$0xff] }
 0x1e0   : > { %1688 = vmatprep.mubr.f32.mxu0 %v649_v1  ;;  %v530_v1 = vld [vmem:[%s4879_s23 + $0x230] sm:$0xff] }
 0x1e2   : > { %1408 = vmatmul.mubr.f32.gmra.mrb[38].mxu1 %v614_v2 }
 0x1e3   : > { %1689 = vmatmul.mubr.f32.gmra.mrb[46].mxu0 %v648_v11  ;;  %1413 = vmatprep.mubr.f32.mxu1 %v623_v16  ;;  %v547_v11 = vld [vmem:[%s4879_s23 + $0x2b8] sm:$0xff]  ;;  %v562_v16 = vld [vmem:[%s4879_s23 + $0x330] sm:$0xff] }
 0x1e4   : > { %1694 = vmatprep.mubr.f32.mxu0 %v657_v12  ;;  %v546_v12 = vld [vmem:[%s4879_s23 + $0x2b0] sm:$0xff] }
 0x1e6   : > { %1414 = vmatmul.mubr.f32.gmra.mrb[40].mxu1 %v622_v26 }
 0x1e7   : > { %1695 = vmatmul.mubr.f32.gmra.mrb[48].mxu0 %v656_v62  ;;  %1419 = vmatprep.mubr.f32.mxu1 %v631_v3  ;;  %v570_v3 = vld [vmem:[%s4879_s23 + $0x370] sm:$0xff] }
 0x1e8   : > { %1700 = vmatprep.mubr.f32.mxu0 %v665_v25  ;;  %v563_v25 = vld [vmem:[%s4879_s23 + $0x338] sm:$0xff] }
 0x1ea   : > { %1420 = vmatmul.mubr.f32.gmra.mrb[42].mxu1 %v630_v28 }
 0x1eb   : > { %1701 = vmatmul.mubr.f32.gmra.mrb[50].mxu0 %v664_v18  ;;  %1425 = vmatprep.mubr.f32.mxu1 %v639_v22  ;;  %v578_v22 = vld [vmem:[%s4879_s23 + $0x3b0] sm:$0xff] }
 0x1ec   : > { %1706 = vmatprep.mubr.f32.mxu0 %v673_v21  ;;  %v571_v21 = vld [vmem:[%s4879_s23 + $0x378] sm:$0xff] }
 0x1ee   : > { %1426 = vmatmul.mubr.f32.gmra.mrb[44].mxu1 %v638_v35 }
 0x1ef   : > { %1707 = vmatmul.mubr.f32.gmra.mrb[52].mxu0 %v672_v23  ;;  %1431 = vmatprep.mubr.f32.mxu1 %v647_v34  ;;  %v586_v34 = vld [vmem:[%s4879_s23 + $0x3f0] sm:$0xff] }
 0x1f0   : > { %1712 = vmatprep.mubr.f32.mxu0 %v681_v24  ;;  %v579_v24 = vld [vmem:[%s4879_s23 + $0x3b8] sm:$0xff] }
 0x1f2   : > { %1432 = vmatmul.mubr.f32.gmra.mrb[46].mxu1 %v646_v36 }
 0x1f3   : > { %1713 = vmatmul.mubr.f32.gmra.mrb[54].mxu0 %v680_v29  ;;  %1437 = vmatprep.mubr.f32.mxu1 %v655_v32  ;;  %v594_v32 = vld [vmem:[%s4879_s23 + $0x430] sm:$0xff] }
 0x1f4   : > { %1718 = vmatprep.mubr.f32.mxu0 %v689_v33  ;;  %v587_v33 = vld [vmem:[%s4879_s23 + $0x3f8] sm:$0xff] }
 0x1f6   : > { %1438 = vmatmul.mubr.f32.gmra.mrb[48].mxu1 %v654_v8 }
 0x1f7   : > { %1719 = vmatmul.mubr.f32.gmra.mrb[56].mxu0 %v688_v41  ;;  %1443 = vmatprep.mubr.f32.mxu1 %v663_v40  ;;  %v602_v40 = vld [vmem:[%s4879_s23 + $0x470] sm:$0xff] }
 0x1f8   : > { %1724 = vmatprep.mubr.f32.mxu0 %v697_v31  ;;  %v595_v31 = vld [vmem:[%s4879_s23 + $0x438] sm:$0xff] }
 0x1fa   : > { %1444 = vmatmul.mubr.f32.gmra.mrb[50].mxu1 %v662_v55 }
 0x1fb   : > { %1725 = vmatmul.mubr.f32.gmra.mrb[58].mxu0 %v696_v7  ;;  %1449 = vmatprep.mubr.f32.mxu1 %v671_v43  ;;  %v610_v43 = vld [vmem:[%s4879_s23 + $0x4b0] sm:$0xff] }
 0x1fc   : > { %1730 = vmatprep.mubr.f32.mxu0 %v705_v38  ;;  %v603_v38 = vld [vmem:[%s4879_s23 + $0x478] sm:$0xff] }
 0x1fe   : > { %1450 = vmatmul.mubr.f32.gmra.mrb[52].mxu1 %v670_v46 }
 0x1ff   : > { %1731 = vmatmul.mubr.f32.gmra.mrb[60].mxu0 %v704_v51  ;;  %1455 = vmatprep.mubr.f32.mxu1 %v679_v39  ;;  %v618_v39 = vld [vmem:[%s4879_s23 + $0x4f0] sm:$0xff] }
 0x200   : > { %1736 = vmatprep.mubr.f32.mxu0 %v713_v42  ;;  %v611_v42 = vld [vmem:[%s4879_s23 + $0x4b8] sm:$0xff] }
 0x202   : > { %1456 = vmatmul.mubr.f32.gmra.mrb[54].mxu1 %v678_v5 }
 0x203   : > { %1737 = vmatmul.mubr.f32.gmra.mrb[62].mxu0 %v712_v44  ;;  %1461 = vmatprep.mubr.f32.mxu1 %v687_v13  ;;  %v626_v13 = vld [vmem:[%s4879_s23 + $0x530] sm:$0xff] }
 0x204   : > { %1807 = vmatprep.mubr.f32.mxu0 %v467_v37  ;;  %v619_v37 = vld [vmem:[%s4879_s23 + $0x4f8] sm:$0xff] }
 0x206   : > { %1462 = vmatmul.mubr.f32.gmra.mrb[56].mxu1 %v686_v14 }
 0x207   : > { %1808 = vmatmul.mubr.f32.vlgmr.msra.gmra.mrb[0].mxu0 %v466_v47  ;;  %1467 = vmatprep.mubr.f32.mxu1 %v695_v54  ;;  %v634_v54 = vld [vmem:[%s4879_s23 + $0x570] sm:$0xff] }
 0x208   : > { %1813 = vmatprep.mubr.f32.mxu0 %v475_v50  ;;  %v627_v50 = vld [vmem:[%s4879_s23 + $0x538] sm:$0xff] }
 0x20a   : > { %1468 = vmatmul.mubr.f32.gmra.mrb[58].mxu1 %v694_v57 }
 0x20b   : > { %1814 = vmatmul.mubr.f32.gmra.mrb[2].mxu0 %v474_v9  ;;  %1473 = vmatprep.mubr.f32.mxu1 %v703_v52  ;;  %v642_v52 = vld [vmem:[%s4879_s23 + $0x5b0] sm:$0xff] }
 0x20c   : > { %1819 = vmatprep.mubr.f32.mxu0 %v483_v53  ;;  %v635_v53 = vld [vmem:[%s4879_s23 + $0x578] sm:$0xff] }
 0x20e   : > { %1474 = vmatmul.mubr.f32.gmra.mrb[60].mxu1 %v702_v30 }
 0x20f   : > { %1820 = vmatmul.mubr.f32.gmra.mrb[4].mxu0 %v482_v56  ;;  %1479 = vmatprep.mubr.f32.mxu1 %v711_v59  ;;  %v650_v59 = vld [vmem:[%s4879_s23 + $0x5f0] sm:$0xff] }
 0x210   : > { %1825 = vmatprep.mubr.f32.mxu0 %v491_v49  ;;  %v643_v49 = vld [vmem:[%s4879_s23 + $0x5b8] sm:$0xff] }
 0x212   : > { %1480 = vmatmul.mubr.f32.gmra.mrb[62].mxu1 %v710_v19 }
 0x213   : > { %1826 = vmatmul.mubr.f32.gmra.mrb[6].mxu0 %v490_v27 }
 0x214   : > { %1831 = vmatprep.mubr.f32.mxu0 %v499_v58  ;;  %v651_v58 = vld [vmem:[%s4879_s23 + $0x5f8] sm:$0xff] }
 0x217   : > { %1832 = vmatmul.mubr.f32.gmra.mrb[8].mxu0 %v498_v60 }
 0x218   : > { %1837 = vmatprep.mubr.f32.mxu0 %v507_v63  ;;  %v659_v63 = vld [vmem:[%s4879_s23 + $0x638] sm:$0xff] }
 0x21b   : > { %1838 = vmatmul.mubr.f32.gmra.mrb[10].mxu0 %v506_v0  ;;  %v658_v0 = vld [vmem:[%s4879_s23 + $0x630] sm:$0xff] }
 0x21c   : > { %1843 = vmatprep.mubr.f32.mxu0 %v515_v20 }
 0x21f   : > { %1844 = vmatmul.mubr.f32.gmra.mrb[12].mxu0 %v514_v61  ;;  %v667_v61 = vld [vmem:[%s4879_s23 + $0x678] sm:$0xff] }
 0x220   : > { %1849 = vmatprep.mubr.f32.mxu0 %v523_v45 }
 0x223   : > { %1850 = vmatmul.mubr.f32.gmra.mrb[14].mxu0 %v522_v4  ;;  %v666_v4 = vld [vmem:[%s4879_s23 + $0x670] sm:$0xff] }
 0x224   : > { %1855 = vmatprep.mubr.f32.mxu0 %v531_v48 }
 0x227   : > { %1856 = vmatmul.mubr.f32.gmra.mrb[16].mxu0 %v530_v1  ;;  %v675_v1 = vld [vmem:[%s4879_s23 + $0x6b8] sm:$0xff] }
 0x228   : > { %1861 = vmatprep.mubr.f32.mxu0 %v539_v6 }
 0x229   : > { %v5245_v62 = vpop.f32.mrb[0].mxu1 }
 0x22a   : > { %v5248_v2 = vpop.f32.mrb[1].mxu1 }
 0x22b   : > { %1862 = vmatmul.mubr.f32.gmra.mrb[18].mxu0 %v538_v10  ;;  %v674_v10 = vld [vmem:[%s4879_s23 + $0x6b0] sm:$0xff] }
 0x22c   : > { %1867 = vmatprep.mubr.f32.mxu0 %v547_v11 }
 0x22d   : > { %v5251_v18 = vpop.f32.mrb[2].mxu1 }
 0x22e   : > { %v5254_v26 = vpop.f32.mrb[3].mxu1 }
 0x22f   : > { %1868 = vmatmul.mubr.f32.gmra.mrb[20].mxu0 %v546_v12  ;;  %v683_v12 = vld [vmem:[%s4879_s23 + $0x6f8] sm:$0xff] }
 0x230   : > { %1873 = vmatprep.mubr.f32.mxu0 %v555_v15 }
 0x231   : > { %v5257_v23 = vpop.f32.mrb[4].mxu1 }
 0x232   : > { %v5260_v28 = vpop.f32.mrb[5].mxu1 }
 0x233   : > { %1874 = vmatmul.mubr.f32.gmra.mrb[22].mxu0 %v554_v17  ;;  %v682_v17 = vld [vmem:[%s4879_s23 + $0x6f0] sm:$0xff] }
 0x234   : > { %1879 = vmatprep.mubr.f32.mxu0 %v563_v25  ;;  %v691_v25 = vld [vmem:[%s4879_s23 + $0x738] sm:$0xff] }
 0x235   : > { %v5263_v29 = vpop.f32.mrb[6].mxu1 }
 0x236   : > { %v5266_v35 = vpop.f32.mrb[7].mxu1 }
 0x237   : > { %1880 = vmatmul.mubr.f32.gmra.mrb[24].mxu0 %v562_v16  ;;  %v690_v16 = vld [vmem:[%s4879_s23 + $0x730] sm:$0xff] }
 0x238   : > { %1885 = vmatprep.mubr.f32.mxu0 %v571_v21  ;;  %v699_v21 = vld [vmem:[%s4879_s23 + $0x778] sm:$0xff] }
 0x239   : > { %v5269_v41 = vpop.f32.mrb[8].mxu1 }
 0x23a   : > { %v5272_v36 = vpop.f32.mrb[9].mxu1 }
 0x23b   : > { %1886 = vmatmul.mubr.f32.gmra.mrb[26].mxu0 %v570_v3  ;;  %v698_v3 = vld [vmem:[%s4879_s23 + $0x770] sm:$0xff] }
 0x23c   : > { %1891 = vmatprep.mubr.f32.mxu0 %v579_v24  ;;  %v707_v24 = vld [vmem:[%s4879_s23 + $0x7b8] sm:$0xff] }
 0x23d   : > { %v5275_v7 = vpop.f32.mrb[10].mxu1 }
 0x23e   : > { %v5278_v8 = vpop.f32.mrb[11].mxu1 }
 0x23f   : > { %1892 = vmatmul.mubr.f32.gmra.mrb[28].mxu0 %v578_v22  ;;  %v706_v22 = vld [vmem:[%s4879_s23 + $0x7b0] sm:$0xff] }
 0x240   : > { %1897 = vmatprep.mubr.f32.mxu0 %v587_v33  ;;  %v715_v33 = vld [vmem:[%s4879_s23 + $0x7f8] sm:$0xff] }
 0x241   : > { %v5281_v51 = vpop.f32.mrb[12].mxu1 }
 0x242   : > { %v5284_v55 = vpop.f32.mrb[13].mxu1 }
 0x243   : > { %1898 = vmatmul.mubr.f32.gmra.mrb[30].mxu0 %v586_v34  ;;  %v714_v34 = vld [vmem:[%s4879_s23 + $0x7f0] sm:$0xff]  ;;  %s4430_s23 = scalar_lea.vmem %s4429_s9, 8192 }
 0x244   : > { %1903 = vmatprep.mubr.f32.mxu0 %v595_v31  ;;  %v2445_v31 = vld [vmem:[#allocation14] sm:$0xff]  ;;  %p4432_p8 = scmp.lt.s32.totalorder %s4430_s23, %s4424_s18 }
 0x245   : > { %v5287_v44 = vpop.f32.mrb[14].mxu1 }
 0x246   : > { %v5290_v46 = vpop.f32.mrb[15].mxu1  ;;  %p4433_p4 = por %p4432_p8, %p4431_p2 }
 0x247   : > { %1904 = vmatmul.mubr.f32.gmra.mrb[32].mxu0 %v594_v32  ;;  %v2446_v32 = vld [vmem:[#allocation14 + $0x8] sm:$0xff] }
 0x248   : > { %1909 = vmatprep.mubr.f32.mxu0 %v603_v38  ;;  %v3699_v38 = vpack.c.bf16 %v2446_v32, %v2445_v31  ;;  %p4434_p10 = pnand %p4433_p4, %p4427_p0 }
 0x249   : > { %v5293_v47 = vpop.f32.mrb[16].mxu1 }
 0x24a   : > { %v5296_v5 = vpop.f32.mrb[17].mxu1  ;;  %3700 = vmatprep.subr.bf16.mxu1 %v3699_v38 }
 0x24b   : > { %1910 = vmatmul.mubr.f32.gmra.mrb[34].mxu0 %v602_v40  ;;  %3702 = vmatpush3.bf16.msra.mxu1 %v3699_v38  ;;  %v2447_v40 = vld [vmem:[#allocation14 + $0x10] sm:$0xff] }
 0x24c   : > { %1915 = vmatprep.mubr.f32.mxu0 %v611_v42  ;;  %v2448_v42 = vld [vmem:[#allocation14 + $0x18] sm:$0xff] }
 0x24d   : > { %v5299_v9 = vpop.f32.mrb[18].mxu1 }
 0x24e   : > { %v5302_v14 = vpop.f32.mrb[19].mxu1 }
 0x24f   : > { %1916 = vmatmul.mubr.f32.gmra.mrb[36].mxu0 %v610_v43  ;;  %v3703_v43 = vpack.c.bf16 %v2448_v42, %v2447_v40 }
 0x250   : > { %1921 = vmatprep.mubr.f32.mxu0 %v619_v37  ;;  %v2449_v37 = vld [vmem:[#allocation14 + $0x20] sm:$0xff] }
 0x251   : > { %v5305_v56 = vpop.f32.mrb[20].mxu1  ;;  %3704 = vmatprep.subr.bf16.mxu1 %v3703_v43 }
 0x252   : > { %v5308_v57 = vpop.f32.mrb[21].mxu1  ;;  %3706 = vmatpush3.bf16.msra.mxu1 %v3703_v43 }
 0x253   : > { %1922 = vmatmul.mubr.f32.gmra.mrb[38].mxu0 %v618_v39  ;;  %v2450_v39 = vld [vmem:[#allocation14 + $0x28] sm:$0xff] }
 0x254   : > { %1927 = vmatprep.mubr.f32.mxu0 %v627_v50  ;;  %v3707_v50 = vpack.c.bf16 %v2450_v39, %v2449_v37 }
 0x255   : > { %v5311_v27 = vpop.f32.mrb[22].mxu1 }
 0x256   : > { %v5314_v30 = vpop.f32.mrb[23].mxu1  ;;  %3708 = vmatprep.subr.bf16.mxu1 %v3707_v50 }
 0x257   : > { %1928 = vmatmul.mubr.f32.gmra.mrb[40].mxu0 %v626_v13  ;;  %3710 = vmatpush3.bf16.msra.mxu1 %v3707_v50  ;;  %v2451_v13 = vld [vmem:[#allocation14 + $0x30] sm:$0xff] }
 0x258   : > { %1933 = vmatprep.mubr.f32.mxu0 %v635_v53  ;;  %v2452_v53 = vld [vmem:[#allocation14 + $0x38] sm:$0xff] }
 0x259   : > { %v5317_v60 = vpop.f32.mrb[24].mxu1 }
 0x25a   : > { %v5320_v19 = vpop.f32.mrb[25].mxu1 }
 0x25b   : > { %1934 = vmatmul.mubr.f32.gmra.mrb[42].mxu0 %v634_v54  ;;  %v3711_v54 = vpack.c.bf16 %v2452_v53, %v2451_v13 }
 0x25c   : > { %1939 = vmatprep.mubr.f32.mxu0 %v643_v49  ;;  %v2453_v49 = vld [vmem:[#allocation14 + $0x40] sm:$0xff] }
 0x25d   : > { %v5323_v20 = vpop.f32.mrb[26].mxu1  ;;  %3712 = vmatprep.subr.bf16.mxu1 %v3711_v54 }
 0x25e   : > { %v5326_v45 = vpop.f32.mrb[27].mxu1  ;;  %3714 = vmatpush3.bf16.msra.mxu1 %v3711_v54 }
 0x25f   : > { %1940 = vmatmul.mubr.f32.gmra.mrb[44].mxu0 %v642_v52  ;;  %v2454_v52 = vld [vmem:[#allocation14 + $0x48] sm:$0xff] }
 0x260   : > { %1945 = vmatprep.mubr.f32.mxu0 %v651_v58  ;;  %v3715_v58 = vpack.c.bf16 %v2454_v52, %v2453_v49 }
 0x261   : > { %v5329_v48 = vpop.f32.mrb[28].mxu1 }
 0x262   : > { %v5332_v6 = vpop.f32.mrb[29].mxu1  ;;  %3716 = vmatprep.subr.bf16.mxu1 %v3715_v58 }
 0x263   : > { %1946 = vmatmul.mubr.f32.gmra.mrb[46].mxu0 %v650_v59  ;;  %3718 = vmatpush3.bf16.msra.mxu1 %v3715_v58  ;;  %v2455_v59 = vld [vmem:[#allocation14 + $0x50] sm:$0xff] }
 0x264   : > { %1951 = vmatprep.mubr.f32.mxu0 %v659_v63  ;;  %v2456_v63 = vld [vmem:[#allocation14 + $0x58] sm:$0xff] }
 0x265   : > { %v5335_v11 = vpop.f32.mrb[30].mxu1 }
 0x266   : > { %v5338_v15 = vpop.f32.mrb[31].mxu1 }
 0x267   : > { %1952 = vmatmul.mubr.f32.gmra.mrb[48].mxu0 %v658_v0  ;;  %v3719_v0 = vpack.c.bf16 %v2456_v63, %v2455_v59 }
 0x268   : > { %1957 = vmatprep.mubr.f32.mxu0 %v667_v61  ;;  %v2457_v61 = vld [vmem:[#allocation14 + $0x60] sm:$0xff] }
 0x269   : > { %3720 = vmatprep.subr.bf16.mxu1 %v3719_v0 }
 0x26a   : > { %3722 = vmatpush3.bf16.msra.mxu1 %v3719_v0 }
 0x26b   : > { %1958 = vmatmul.mubr.f32.gmra.mrb[50].mxu0 %v666_v4  ;;  %v2458_v4 = vld [vmem:[#allocation14 + $0x68] sm:$0xff] }
 0x26c   : > { %1963 = vmatprep.mubr.f32.mxu0 %v675_v1  ;;  %v3723_v1 = vpack.c.bf16 %v2458_v4, %v2457_v61 }
 0x26e   : > { %3724 = vmatprep.subr.bf16.mxu1 %v3723_v1 }
 0x26f   : > { %1964 = vmatmul.mubr.f32.gmra.mrb[52].mxu0 %v674_v10  ;;  %3726 = vmatpush3.bf16.msra.mxu1 %v3723_v1  ;;  %v2459_v10 = vld [vmem:[#allocation14 + $0x70] sm:$0xff] }
 0x270   : > { %1969 = vmatprep.mubr.f32.mxu0 %v683_v12  ;;  %v2460_v12 = vld [vmem:[#allocation14 + $0x78] sm:$0xff] }
 0x273   : > { %1970 = vmatmul.mubr.f32.gmra.mrb[54].mxu0 %v682_v17  ;;  %v3727_v17 = vpack.c.bf16 %v2460_v12, %v2459_v10 }
 0x274   : > { %1975 = vmatprep.mubr.f32.mxu0 %v691_v25 }
 0x275   : > { %3728 = vmatprep.subr.bf16.mxu1 %v3727_v17 }
 0x276   : > { %3730 = vmatpush3.bf16.msra.mxu1 %v3727_v17 }
 0x277   : > { %1976 = vmatmul.mubr.f32.gmra.mrb[56].mxu0 %v690_v16 }
 0x278   : > { %1981 = vmatprep.mubr.f32.mxu0 %v699_v21 }
 0x27b   : > { %1982 = vmatmul.mubr.f32.gmra.mrb[58].mxu0 %v698_v3 }
 0x27c   : > { %1987 = vmatprep.mubr.f32.mxu0 %v707_v24 }
 0x27f   : > { %1988 = vmatmul.mubr.f32.gmra.mrb[60].mxu0 %v706_v22 }
 0x280   : > { %1993 = vmatprep.mubr.f32.mxu0 %v715_v33 }
 0x283   : > { %1994 = vmatmul.mubr.f32.gmra.mrb[62].mxu0 %v714_v34 }
 0x2a9   : > { %v5349_v25 = vpop.f32.mrb[32].mxu1 }
 0x2aa   : > { %v5351_v16 = vpop.f32.mrb[33].mxu1 }
 0x2ad   : > { %v5353_v21 = vpop.f32.mrb[34].mxu1 }
 0x2ae   : > { %v5355_v3 = vpop.f32.mrb[35].mxu1 }
 0x2b1   : > { %v5357_v24 = vpop.f32.mrb[36].mxu1 }
 0x2b2   : > { %v5359_v22 = vpop.f32.mrb[37].mxu1 }
 0x2b5   : > { %v5361_v33 = vpop.f32.mrb[38].mxu1 }
 0x2b6   : > { %v5363_v34 = vpop.f32.mrb[39].mxu1 }
 0x2b9   : > { %v5365_v31 = vpop.f32.mrb[40].mxu1 }
 0x2ba   : > { %v5367_v32 = vpop.f32.mrb[41].mxu1 }
 0x2bd   : > { %v5369_v38 = vpop.f32.mrb[42].mxu1 }
 0x2be   : > { %v5371_v40 = vpop.f32.mrb[43].mxu1 }
 0x2c1   : > { %v5373_v42 = vpop.f32.mrb[44].mxu1 }
 0x2c2   : > { %v5375_v43 = vpop.f32.mrb[45].mxu1 }
 0x2c5   : > { %v5377_v37 = vpop.f32.mrb[46].mxu1 }
 0x2c6   : > { %v5379_v39 = vpop.f32.mrb[47].mxu1 }
 0x2c9   : > { %v5381_v50 = vpop.f32.mrb[48].mxu1 }
 0x2ca   : > { %v5383_v13 = vpop.f32.mrb[49].mxu1 }
 0x2cd   : > { %v5385_v53 = vpop.f32.mrb[50].mxu1 }
 0x2ce   : > { %v5387_v54 = vpop.f32.mrb[51].mxu1 }
 0x2d1   : > { %v5389_v49 = vpop.f32.mrb[52].mxu1 }
 0x2d2   : > { %6100 = vst [vmem:[#allocation24_spill] sm:$0xff] %v5389_v49  ;;  %v5391_v52 = vpop.f32.mrb[53].mxu1 }
 0x2d3   : > { %6101 = vst [vmem:[#allocation25_spill] sm:$0xff] %v5391_v52 }
 0x2d5   : > { %v5397_v61 = vpop.f32.mrb[54].mxu1 }
 0x2d6   : > { %6103 = vst [vmem:[#allocation27_spill] sm:$0xff] %v5397_v61  ;;  %v5399_v4 = vpop.f32.mrb[55].mxu1 }
 0x2d7   : > { %6104 = vst [vmem:[#allocation28_spill] sm:$0xff] %v5399_v4 }
 0x2d9   : > { %v5405_v49 = vpop.f32.mrb[56].mxu1 }
 0x2da   : > { %v1809_v58 = vpop.f32.mrb[0].mxu0  ;;  %6106 = vst [vmem:[#allocation30_spill] sm:$0xff] %v5405_v49  ;;  %v5407_v52 = vpop.f32.mrb[57].mxu1 }
 0x2db   : > { %v5394_v59 = vadd.f32 %v1809_v58, %v5245_v62  ;;  %v1811_v63 = vpop.f32.mrb[1].mxu0  ;;  %6107 = vst [vmem:[#allocation31_spill] sm:$0xff] %v5407_v52 }
 0x2dc   : > { %v3796_v0 = vadd.f32 %v1811_v63, %v5248_v2 }
 0x2dd   : > { %6102 = vst [vmem:[#allocation26_spill] sm:$0xff] %v5394_v59  ;;  %v5413_v4 = vpop.f32.mrb[58].mxu1 }
 0x2de   : > { %v1815_v1 = vpop.f32.mrb[2].mxu0  ;;  %v5415_v61 = vpop.f32.mrb[59].mxu1 }
 0x2df   : > { %v5402_v10 = vadd.f32 %v1815_v1, %v5251_v18  ;;  %v1817_v12 = vpop.f32.mrb[3].mxu0  ;;  %6109 = vst [vmem:[#allocation33_spill] sm:$0xff] %v5415_v61 }
 0x2e0   : > { %v3798_v17 = vadd.f32 %v1817_v12, %v5254_v26 }
 0x2e1   : > { %6105 = vst [vmem:[#allocation29_spill] sm:$0xff] %v5402_v10  ;;  %v5421_v52 = vpop.f32.mrb[60].mxu1 }
 0x2e2   : > { %v2078_v62 = vadd.f32 %v3798_v17, %v3796_v0  ;;  %v1821_v58 = vpop.f32.mrb[4].mxu0  ;;  %v5423_v49 = vpop.f32.mrb[61].mxu1 }
 0x2e3   : > { %v5410_v59 = vadd.f32 %v1821_v58, %v5257_v23  ;;  %v1823_v2 = vpop.f32.mrb[5].mxu0  ;;  %6111 = vst [vmem:[#allocation35_spill] sm:$0xff] %v5423_v49 }
 0x2e4   : > { %v3800_v63 = vadd.f32 %v1823_v2, %v5260_v28 }
 0x2e5   : > { %6108 = vst [vmem:[#allocation32_spill] sm:$0xff] %v5410_v59  ;;  %v5431_v61 = vpop.f32.mrb[62].mxu1 }
 0x2e6   : > { %v2079_v18 = vadd.f32 %v3800_v63, %v2078_v62  ;;  %v1827_v1 = vpop.f32.mrb[6].mxu0  ;;  %6113 = vst [vmem:[#allocation37_spill] sm:$0xff] %v5431_v61 }
 0x2e7   : > { %v5418_v26 = vadd.f32 %v1827_v1, %v5263_v29  ;;  %v1829_v12 = vpop.f32.mrb[7].mxu0  ;;  %v5433_v29 = vpop.f32.mrb[63].mxu1 }
 0x2e8   : > { %v3802_v10 = vadd.f32 %v1829_v12, %v5266_v35  ;;  %6114 = vst [vmem:[#allocation38_spill] sm:$0xff] %v5433_v29 }
 0x2e9   : > { %6110 = vst [vmem:[#allocation34_spill] sm:$0xff] %v5418_v26 }
 0x2ea   : > { %v2080_v23 = vadd.f32 %v3802_v10, %v2079_v18  ;;  %v1833_v58 = vpop.f32.mrb[8].mxu0 }
 0x2eb   : > { %v5426_v28 = vadd.f32 %v1833_v58, %v5269_v41  ;;  %v1835_v2 = vpop.f32.mrb[9].mxu0 }
 0x2ec   : > { %v2081_v59 = vrot.slane %v2080_v23, 4  ;;  %v5429_v62 = vadd.f32 %v1835_v2, %v5272_v36 }
 0x2ed   : > { %6112 = vst [vmem:[#allocation36_spill] sm:$0xff] %v5426_v28 }
 0x2ee   : > { %v2082_v1 = vadd.f32 %v2081_v59, %v2080_v23  ;;  %v1839_v35 = vpop.f32.mrb[10].mxu0 }
 0x2ef   : > { %v5436_v12 = vadd.f32 %v1839_v35, %v5275_v7  ;;  %v1841_v26 = vpop.f32.mrb[11].mxu0 }
 0x2f0   : > { %v2083_v18 = vrot.slane %v2082_v1, 2  ;;  %v5439_v49 = vadd.f32 %v1841_v26, %v5278_v8 }
 0x2f1   : > { %6115 = vst [vmem:[#allocation39_spill] sm:$0xff] %v5436_v12 }
 0x2f2   : > { %v2084_v41 = vadd.f32 %v2083_v18, %v2082_v1  ;;  %v2087_v58 = vadd.f32 %v5439_v49, %v5429_v62  ;;  %v1845_v36 = vpop.f32.mrb[12].mxu0 }
 0x2f3   : > { %v5444_v2 = vadd.f32 %v1845_v36, %v5281_v51  ;;  %v1847_v28 = vpop.f32.mrb[13].mxu0 }
 0x2f4   : > { %v2085_v29 = vrot.slane %v2084_v41, 1  ;;  %v3808_v59 = vadd.f32 %v1847_v28, %v5284_v55 }
 0x2f5   : > { %6116 = vst [vmem:[#allocation40_spill] sm:$0xff] %v5444_v2 }
 0x2f6   : > { %v2086_v23 = vadd.f32 %v2085_v29, %v2084_v41  ;;  %v2088_v7 = vadd.f32 %v3808_v59, %v2087_v58  ;;  %v1851_v35 = vpop.f32.mrb[14].mxu0 }
 0x2f7   : > { %v5448_v12 = vadd.f32 %v1851_v35, %v5287_v44  ;;  %v1853_v8 = vpop.f32.mrb[15].mxu0 }
 0x2f8   : > { %v2151_v26 = vmul.f32 0.03125, %v2086_v23  ;;  %v3810_v1 = vadd.f32 %v1853_v8, %v5290_v46  ;;  %v2429_v8 = vld [vmem:[#allocation13] sm:$0xff] }
 0x2f9   : > { %6117 = vst [vmem:[#allocation41_spill] sm:$0xff] %v5448_v12 }
 0x2fa   : > { %v5451_v18 = vsub.f32 %v3796_v0, %v2151_v26  ;;  %v5453_v61 = vsub.f32 %v3798_v17, %v2151_v26  ;;  %v5455_v51 = vsub.f32 %v3800_v63, %v2151_v26  ;;  %v5457_v36 = vsub.f32 %v3802_v10, %v2151_v26  ;;  %v1857_v2 = vpop.f32.mrb[16].mxu0 }
 0x2fb   : > { %v2089_v55 = vadd.f32 %v3810_v1, %v2088_v7  ;;  %v5460_v28 = vadd.f32 %v1857_v2, %v5293_v47  ;;  %v1859_v29 = vpop.f32.mrb[17].mxu0 }
 0x2fc   : > { %v2191_v44 = vmul.f32 %v5451_v18, %v5451_v18  ;;  %v2192_v46 = vmul.f32 %v5453_v61, %v5453_v61  ;;  %v5467_v17 = vadd.f32 %v1859_v29, %v5296_v5  ;;  %v2193_v10 = vmul.f32 %v5455_v51, %v5455_v51  ;;  %v2430_v5 = vld [vmem:[#allocation13 + $0x8] sm:$0xff] }
 0x2fd   : > { %6118 = vst [vmem:[#allocation42_spill] sm:$0xff] %v5460_v28  ;;  %v2090_v0 = vrot.slane %v2089_v55, 4  ;;  %v2194_v23 = vmul.f32 %v5457_v36, %v5457_v36  ;;  %v5479_v29 = vpack.c.bf16 %v2430_v5, %v2429_v8 }
 0x2fe   : > { %v2223_v63 = vadd.f32 %v2192_v46, %v2191_v44  ;;  %v1863_v41 = vpop.f32.mrb[18].mxu0 }
 0x2ff   : > { %v2091_v58 = vadd.f32 %v2090_v0, %v2089_v55  ;;  %v5472_v47 = vadd.f32 %v1863_v41, %v5299_v9  ;;  %v1865_v2 = vpop.f32.mrb[19].mxu0  ;;  %3732 = vmatprep.subr.bf16.mxu1 %v5479_v29 }
 0x300   : > { %v2224_v7 = vadd.f32 %v2223_v63, %v2193_v10  ;;  %v5477_v35 = vadd.f32 %v1865_v2, %v5302_v14 }
 0x301   : > { %6119 = vst [vmem:[#allocation43_spill] sm:$0xff] %v5472_v47  ;;  %v2092_v26 = vrot.slane %v2091_v58, 2 }
 0x302   : > { %v2225_v28 = vadd.f32 %v2224_v7, %v2194_v23  ;;  %v2096_v55 = vadd.f32 %v5477_v35, %v5467_v17  ;;  %v1869_v44 = vpop.f32.mrb[20].mxu0 }
 0x303   : > { %v2093_v9 = vadd.f32 %v2092_v26, %v2091_v58  ;;  %v5484_v46 = vadd.f32 %v1869_v44, %v5305_v56  ;;  %v1871_v0 = vpop.f32.mrb[21].mxu0 }
 0x304   : > { %v2226_v10 = vrot.slane %v2225_v28, 4  ;;  %v3816_v14 = vadd.f32 %v1871_v0, %v5308_v57 }
 0x305   : > { %6120 = vst [vmem:[#allocation44_spill] sm:$0xff] %v5484_v46  ;;  %v2094_v63 = vrot.slane %v2093_v9, 1 }
 0x306   : > { %v2227_v41 = vadd.f32 %v2226_v10, %v2225_v28  ;;  %v2097_v2 = vadd.f32 %v3816_v14, %v2096_v55  ;;  %v1875_v8 = vpop.f32.mrb[22].mxu0 }
 0x307   : > { %v2095_v5 = vadd.f32 %v2094_v63, %v2093_v9  ;;  %v5489_v23 = vadd.f32 %v1875_v8, %v5311_v27  ;;  %v1877_v7 = vpop.f32.mrb[23].mxu0 }
 0x308   : > { %v2228_v47 = vrot.slane %v2227_v41, 2  ;;  %v3818_v58 = vadd.f32 %v1877_v7, %v5314_v30 }
 0x309   : > { %v2152_v56 = vmul.f32 0.03125, %v2095_v5 }
 0x30a   : > { %v2229_v26 = vadd.f32 %v2228_v47, %v2227_v41  ;;  %v2098_v44 = vadd.f32 %v3818_v58, %v2097_v2  ;;  %v1881_v46 = vpop.f32.mrb[24].mxu0 }
 0x30b   : > { %v5493_v12 = vsub.f32 %v5429_v62, %v2152_v56  ;;  %v5496_v57 = vsub.f32 %v5439_v49, %v2152_v56  ;;  %v5498_v28 = vsub.f32 %v3808_v59, %v2152_v56  ;;  %v5500_v55 = vsub.f32 %v3810_v1, %v2152_v56  ;;  %v1883_v27 = vpop.f32.mrb[25].mxu0 }
 0x30c   : > { %v2230_v9 = vrot.slane %v2229_v26, 1  ;;  %v2099_v0 = vrot.slane %v2098_v44, 4  ;;  %v5503_v10 = vadd.f32 %v1881_v46, %v5317_v60  ;;  %v5506_v30 = vadd.f32 %v1883_v27, %v5320_v19 }
 0x30d   : > { %v2195_v62 = vmul.f32 %v5493_v12, %v5493_v12  ;;  %v2196_v49 = vmul.f32 %v5496_v57, %v5496_v57  ;;  %v2197_v1 = vmul.f32 %v5498_v28, %v5498_v28  ;;  %v2198_v5 = vmul.f32 %v5500_v55, %v5500_v55 }
 0x30e   : > { %v2231_v47 = vadd.f32 %v2230_v9, %v2229_v26  ;;  %v2100_v59 = vadd.f32 %v2099_v0, %v2098_v44  ;;  %v1887_v63 = vpop.f32.mrb[26].mxu0 }
 0x30f   : > { %v2232_v41 = vadd.f32 %v2196_v49, %v2195_v62  ;;  %v5515_v2 = vadd.f32 %v1887_v63, %v5323_v20  ;;  %v1889_v60 = vpop.f32.mrb[27].mxu0 }
 0x310   : > { %v2295_v46 = vmul.f32 0.03125, %v2231_v47  ;;  %v2101_v19 = vrot.slane %v2100_v59, 2  ;;  %v5518_v8 = vadd.f32 %v1889_v60, %v5326_v45 }
 0x311   : > { %v2233_v7 = vadd.f32 %v2232_v41, %v2197_v1 }
 0x312   : > { %v2303_v56 = vadd.f32 1e-05, %v2295_v46  ;;  %v2102_v26 = vadd.f32 %v2101_v19, %v2100_v59  ;;  %v2105_v44 = vadd.f32 %v5518_v8, %v5506_v30  ;;  %v1893_v27 = vpop.f32.mrb[28].mxu0 }
 0x313   : > { %v2234_v9 = vadd.f32 %v2233_v7, %v2198_v5  ;;  %v5525_v20 = vadd.f32 %v1893_v27, %v5329_v48  ;;  %v1895_v0 = vpop.f32.mrb[29].mxu0 }
 0x314   : > { %4154 = vrsqrt.f32 %v2303_v56  ;;  %v2103_v62 = vrot.slane %v2102_v26, 1  ;;  %v5528_v45 = vadd.f32 %v1895_v0, %v5332_v6 }
 0x315   : > { %v2235_v49 = vrot.slane %v2234_v9, 4 }
 0x316   : > { %v2104_v47 = vadd.f32 %v2103_v62, %v2102_v26  ;;  %v2106_v63 = vadd.f32 %v5528_v45, %v2105_v44  ;;  %v1899_v1 = vpop.f32.mrb[30].mxu0 }
 0x317   : > { %v2236_v59 = vadd.f32 %v2235_v49, %v2234_v9  ;;  %v5532_v41 = vadd.f32 %v1899_v1, %v5335_v11  ;;  %v1901_v60 = vpop.f32.mrb[31].mxu0 }
 0x318   : > { %v2153_v46 = vmul.f32 0.03125, %v2104_v47  ;;  %v5535_v48 = vadd.f32 %v1901_v60, %v5338_v15 }
 0x319   : > { %6121 = vst [vmem:[#allocation45_spill] sm:$0xff] %v5532_v41  ;;  %v2237_v19 = vrot.slane %v2236_v59, 2  ;;  %v5573_v41 = vld [vmem:[#allocation11] ss:$0 sm:$0xff] }
 0x31a   : > { %v5538_v5 = vsub.f32 %v5467_v17, %v2153_v46  ;;  %v5541_v6 = vsub.f32 %v5477_v35, %v2153_v46  ;;  %v5543_v7 = vsub.f32 %v3816_v14, %v2153_v46  ;;  %v5545_v56 = vsub.f32 %v3818_v58, %v2153_v46  ;;  %v1905_v26 = vpop.f32.mrb[32].mxu0 }
 0x31b   : > { %v2238_v44 = vadd.f32 %v2237_v19, %v2236_v59  ;;  %v2107_v11 = vadd.f32 %v5535_v48, %v2106_v63  ;;  %v5549_v27 = vadd.f32 %v1905_v26, %v5349_v25  ;;  %v1907_v15 = vpop.f32.mrb[33].mxu0  ;;  %v5566_v19 = vld [vmem:[#allocation10] ss:$0 sm:$0xff] }
 0x31c   : > { %v2199_v9 = vmul.f32 %v5538_v5, %v5538_v5  ;;  %v2200_v17 = vmul.f32 %v5541_v6, %v5541_v6  ;;  %v5556_v14 = vadd.f32 %v1907_v15, %v5351_v16  ;;  %v2201_v62 = vmul.f32 %v5543_v7, %v5543_v7 }
 0x31d   : > { %6122 = vst [vmem:[#allocation46_spill] sm:$0xff] %v5549_v27  ;;  %v2239_v35 = vrot.slane %v2238_v44, 1  ;;  %v2108_v0 = vrot.slane %v2107_v11, 4  ;;  %v2202_v25 = vmul.f32 %v5545_v56, %v5545_v56 }
 0x31e   : > { %v4155_v58 = vpop.eup %4154  ;;  %v2241_v49 = vadd.f32 %v2200_v17, %v2199_v9  ;;  %v1911_v47 = vpop.f32.mrb[34].mxu0 }
 0x31f   : > { %v2322_v63 = vmul.f32 %v4155_v58, %v5457_v36  ;;  %v2240_v1 = vadd.f32 %v2239_v35, %v2238_v44  ;;  %v2109_v59 = vadd.f32 %v2108_v0, %v2107_v11  ;;  %v5564_v60 = vadd.f32 %v1911_v47, %v5353_v21  ;;  %v1913_v46 = vpop.f32.mrb[35].mxu0  ;;  %v2431_v0 = vld [vmem:[#allocation13 + $0x10] sm:$0xff] }
 0x320   : > { %v2242_v16 = vadd.f32 %v2241_v49, %v2201_v62  ;;  %v5569_v26 = vadd.f32 %v1913_v46, %v5355_v3  ;;  %v2319_v15 = vmul.f32 %v4155_v58, %v5451_v18  ;;  %v2320_v27 = vmul.f32 %v4155_v58, %v5453_v61  ;;  %v2432_v62 = vld [vmem:[#allocation13 + $0x18] sm:$0xff] }
 0x321   : > { %v2296_v9 = vmul.f32 0.03125, %v2240_v1  ;;  %v2110_v17 = vrot.slane %v2109_v59, 2  ;;  %v2321_v36 = vmul.f32 %v4155_v58, %v5455_v51 }
 0x322   : > { %v2243_v44 = vadd.f32 %v2242_v16, %v2202_v25  ;;  %v2114_v21 = vadd.f32 %v5569_v26, %v5556_v14  ;;  %v1917_v11 = vpop.f32.mrb[36].mxu0  ;;  %v2358_v35 = vmul.f32 %v5566_v19, %v2319_v15  ;;  %v2359_v3 = vmul.f32 %v5566_v19, %v2320_v27 }
 0x323   : > { %v2304_v18 = vadd.f32 1e-05, %v2296_v9  ;;  %v2111_v49 = vadd.f32 %v2110_v17, %v2109_v59  ;;  %v5581_v61 = vadd.f32 %v1917_v11, %v5357_v24  ;;  %v1919_v47 = vpop.f32.mrb[37].mxu0  ;;  %v2360_v1 = vmul.f32 %v5566_v19, %v2321_v36  ;;  %v2433_v36 = vld [vmem:[#allocation13 + $0x20] sm:$0xff]  ;;  %v2434_v11 = vld [vmem:[#allocation13 + $0x28] sm:$0xff] }
 0x324   : > { %v2244_v51 = vrot.slane %v2243_v44, 4  ;;  %v5585_v58 = vadd.f32 %v1919_v47, %v5359_v22  ;;  %v2397_v25 = vadd.f32 %v5573_v41, %v2358_v35  ;;  %v2398_v46 = vadd.f32 %v5573_v41, %v2359_v3 }
 0x325   : > { %4156 = vrsqrt.f32 %v2304_v18  ;;  %v2112_v27 = vrot.slane %v2111_v49, 1  ;;  %v3735_v16 = vpack.c.bf16 %v2432_v62, %v2431_v0  ;;  %v2399_v9 = vadd.f32 %v5573_v41, %v2360_v1  ;;  %v2436_v1 = vld [vmem:[#allocation13 + $0x38] sm:$0xff] }
 0x326   : > { %v2245_v15 = vadd.f32 %v2244_v51, %v2243_v44  ;;  %v2115_v59 = vadd.f32 %v5585_v58, %v2114_v21  ;;  %3315 = vmatprep.mubr.f32.mxu1 %v2397_v25  ;;  %v1923_v24 = vpop.f32.mrb[38].mxu0  ;;  %v2361_v17 = vmul.f32 %v5566_v19, %v2322_v63  ;;  %v3739_v63 = vpack.c.bf16 %v2434_v11, %v2433_v36 }
 0x327   : > { %v2113_v22 = vadd.f32 %v2112_v27, %v2111_v49  ;;  %v5593_v47 = vadd.f32 %v1923_v24, %v5361_v33  ;;  %3316 = vmatmul.mubr.f32.vlgmr.msra.gmra.mrb[64].mxu1 %v2398_v46  ;;  %v1925_v35 = vpop.f32.mrb[39].mxu0  ;;  %v2435_v33 = vld [vmem:[#allocation13 + $0x30] sm:$0xff] }
 0x328   : > { %v2246_v3 = vrot.slane %v2245_v15, 2  ;;  %v5596_v0 = vadd.f32 %v1925_v35, %v5363_v34  ;;  %3318 = vmatprep.mubr.f32.mxu1 %v2399_v9  ;;  %3734 = vmatpush3.bf16.msra.mxu1 %v5479_v29  ;;  %v2400_v21 = vadd.f32 %v5573_v41, %v2361_v17  ;;  %v3743_v9 = vpack.c.bf16 %v2436_v1, %v2435_v33 }
 0x329   : > { %v2154_v44 = vmul.f32 0.03125, %v2113_v22  ;;  %3736 = vmatprep.subr.bf16.mxu1 %v3735_v16 }
 0x32a   : > { %v2247_v62 = vadd.f32 %v2246_v3, %v2245_v15  ;;  %v2116_v18 = vadd.f32 %v5596_v0, %v2115_v59  ;;  %v1929_v49 = vpop.f32.mrb[40].mxu0 }
 0x32b   : > { %v5602_v51 = vsub.f32 %v5506_v30, %v2154_v44  ;;  %v5605_v34 = vsub.f32 %v5518_v8, %v2154_v44  ;;  %v5608_v25 = vsub.f32 %v5528_v45, %v2154_v44  ;;  %v5611_v29 = vsub.f32 %v5535_v48, %v2154_v44  ;;  %3319 = vmatmul.mubr.f32.gmra.mrb[66].mxu1 %v2400_v21  ;;  %v1931_v46 = vpop.f32.mrb[41].mxu0  ;;  %v2437_v30 = vld [vmem:[#allocation13 + $0x40] sm:$0xff]  ;;  %v2438_v8 = vld [vmem:[#allocation13 + $0x48] sm:$0xff] }
 0x32c   : > { %v2248_v27 = vrot.slane %v2247_v62, 1  ;;  %v2117_v15 = vrot.slane %v2116_v18, 4  ;;  %v5614_v59 = vadd.f32 %v1929_v49, %v5365_v31  ;;  %v5617_v24 = vadd.f32 %v1931_v46, %v5367_v32  ;;  %3738 = vmatpush3.bf16.msra.mxu1 %v3735_v16 }
 0x32d   : > { %v2203_v45 = vmul.f32 %v5602_v51, %v5602_v51  ;;  %v2204_v48 = vmul.f32 %v5605_v34, %v5605_v34  ;;  %3740 = vmatprep.subr.bf16.mxu1 %v3739_v63  ;;  %v2205_v31 = vmul.f32 %v5608_v25, %v5608_v25  ;;  %v3747_v3 = vpack.c.bf16 %v2438_v8, %v2437_v30 }
 0x32e   : > { %v2249_v17 = vadd.f32 %v2248_v27, %v2247_v62  ;;  %v2118_v36 = vadd.f32 %v2117_v15, %v2116_v18  ;;  %v1935_v11 = vpop.f32.mrb[42].mxu0  ;;  %v2206_v62 = vmul.f32 %v5611_v29, %v5611_v29 }
 0x32f   : > { %v4157_v22 = vpop.eup %4156  ;;  %v2250_v32 = vadd.f32 %v2204_v48, %v2203_v45  ;;  %v5626_v16 = vadd.f32 %v1935_v11, %v5369_v38  ;;  %v1937_v35 = vpop.f32.mrb[43].mxu0  ;;  %v2439_v48 = vld [vmem:[#allocation13 + $0x50] sm:$0xff] }
 0x330   : > { %v2326_v44 = vmul.f32 %v4157_v22, %v5500_v55  ;;  %v2297_v21 = vmul.f32 0.03125, %v2249_v17  ;;  %v2119_v49 = vrot.slane %v2118_v36, 2  ;;  %v5630_v46 = vadd.f32 %v1937_v35, %v5371_v40  ;;  %3742 = vmatpush3.bf16.msra.mxu1 %v3739_v63 }
 0x331   : > { %v2251_v18 = vadd.f32 %v2250_v32, %v2205_v31  ;;  %v2323_v33 = vmul.f32 %v4157_v22, %v5493_v12  ;;  %v2324_v1 = vmul.f32 %v4157_v22, %v5496_v57  ;;  %3744 = vmatprep.subr.bf16.mxu1 %v3743_v9  ;;  %v2325_v30 = vmul.f32 %v4157_v22, %v5498_v28  ;;  %v2440_v57 = vld [vmem:[#allocation13 + $0x58] sm:$0xff] }
 0x332   : > { %v2305_v38 = vadd.f32 1e-05, %v2297_v21  ;;  %v2120_v27 = vadd.f32 %v2119_v49, %v2118_v36  ;;  %v2123_v55 = vadd.f32 %v5630_v46, %v5617_v24  ;;  %v1941_v15 = vpop.f32.mrb[44].mxu0  ;;  %v2365_v21 = vmul.f32 %v5566_v19, %v2326_v44 }
 0x333   : > { %v2252_v40 = vadd.f32 %v2251_v18, %v2206_v62  ;;  %v5640_v63 = vadd.f32 %v1941_v15, %v5373_v42  ;;  %v1943_v8 = vpop.f32.mrb[45].mxu0  ;;  %v2362_v45 = vmul.f32 %v5566_v19, %v2323_v33  ;;  %v2363_v12 = vmul.f32 %v5566_v19, %v2324_v1  ;;  %v2441_v62 = vld [vmem:[#allocation13 + $0x60] sm:$0xff]  ;;  %v2442_v18 = vld [vmem:[#allocation13 + $0x68] sm:$0xff] }
 0x334   : > { %4158 = vrsqrt.f32 %v2305_v38  ;;  %v2121_v17 = vrot.slane %v2120_v27, 1  ;;  %v5645_v36 = vadd.f32 %v1943_v8, %v5375_v43  ;;  %v2364_v11 = vmul.f32 %v5566_v19, %v2325_v30  ;;  %3746 = vmatpush3.bf16.msra.mxu1 %v3743_v9 }
 0x335   : > { %v2253_v28 = vrot.slane %v2252_v40, 4  ;;  %v2401_v22 = vadd.f32 %v5573_v41, %v2362_v45  ;;  %v2402_v42 = vadd.f32 %v5573_v41, %v2363_v12  ;;  %3748 = vmatprep.subr.bf16.mxu1 %v3747_v3  ;;  %v3751_v49 = vpack.c.bf16 %v2440_v57, %v2439_v48  ;;  %v2444_v57 = vld [vmem:[#allocation13 + $0x78] sm:$0xff] }
 0x336   : > { %v2122_v31 = vadd.f32 %v2121_v17, %v2120_v27  ;;  %v2124_v32 = vadd.f32 %v5645_v36, %v2123_v55  ;;  %v1947_v35 = vpop.f32.mrb[46].mxu0  ;;  %v2403_v1 = vadd.f32 %v5573_v41, %v2364_v11  ;;  %v2404_v44 = vadd.f32 %v5573_v41, %v2365_v21 }
 0x337   : > { %v2254_v43 = vadd.f32 %v2253_v28, %v2252_v40  ;;  %3321 = vmatprep.mubr.f32.mxu1 %v2401_v22  ;;  %v5653_v33 = vadd.f32 %v1947_v35, %v5377_v37  ;;  %v1949_v9 = vpop.f32.mrb[47].mxu0  ;;  %v3755_v15 = vpack.c.bf16 %v2442_v18, %v2441_v62 }
 0x338   : > { %v2155_v38 = vmul.f32 0.03125, %v2122_v31  ;;  %3322 = vmatmul.mubr.f32.gmra.mrb[68].mxu1 %v2402_v42  ;;  %v5657_v27 = vadd.f32 %v1949_v9, %v5379_v39 }
 0x339   : > { %v2255_v55 = vrot.slane %v2254_v43, 2  ;;  %3324 = vmatprep.mubr.f32.mxu1 %v2403_v1  ;;  %3750 = vmatpush3.bf16.msra.mxu1 %v3747_v3 }
 0x33a   : > { %v5661_v30 = vsub.f32 %v5556_v14, %v2155_v38  ;;  %v5664_v37 = vsub.f32 %v5569_v26, %v2155_v38  ;;  %v5667_v40 = vsub.f32 %v5585_v58, %v2155_v38  ;;  %v5670_v8 = vsub.f32 %v5596_v0, %v2155_v38  ;;  %v1953_v39 = vpop.f32.mrb[48].mxu0  ;;  %3752 = vmatprep.subr.bf16.mxu1 %v3751_v49  ;;  %v2443_v14 = vld [vmem:[#allocation13 + $0x70] sm:$0xff] }
 0x33b   : > { %v2256_v45 = vadd.f32 %v2255_v55, %v2254_v43  ;;  %v2125_v12 = vadd.f32 %v5657_v27, %v2124_v32  ;;  %v5674_v3 = vadd.f32 %v1953_v39, %v5381_v50  ;;  %v1955_v48 = vpop.f32.mrb[49].mxu0  ;;  %v3759_v32 = vpack.c.bf16 %v2444_v57, %v2443_v14 }
 0x33c   : > { %v2207_v26 = vmul.f32 %v5661_v30, %v5661_v30  ;;  %v2208_v58 = vmul.f32 %v5664_v37, %v5664_v37  ;;  %3325 = vmatmul.mubr.f32.gmra.mrb[70].mxu1 %v2404_v44  ;;  %v5681_v11 = vadd.f32 %v1955_v48, %v5383_v13  ;;  %v2209_v50 = vmul.f32 %v5667_v40, %v5667_v40 }
 0x33d   : > { %v2257_v0 = vrot.slane %v2256_v45, 1  ;;  %v2126_v17 = vrot.slane %v2125_v12, 4  ;;  %3754 = vmatpush3.bf16.msra.mxu1 %v3751_v49  ;;  %v2210_v22 = vmul.f32 %v5670_v8, %v5670_v8 }
 0x33e   : > { %v4159_v28 = vpop.eup %4158  ;;  %v2259_v42 = vadd.f32 %v2208_v58, %v2207_v26  ;;  %v1959_v31 = vpop.f32.mrb[50].mxu0  ;;  %3756 = vmatprep.subr.bf16.mxu1 %v3755_v15 }
 0x33f   : > { %v2330_v35 = vmul.f32 %v4159_v28, %v5545_v56  ;;  %v2258_v21 = vadd.f32 %v2257_v0, %v2256_v45  ;;  %v2127_v62 = vadd.f32 %v2126_v17, %v2125_v12  ;;  %v5689_v18 = vadd.f32 %v1959_v31, %v5385_v53  ;;  %v1961_v13 = vpop.f32.mrb[51].mxu0 }
 0x340   : > { %v2260_v49 = vadd.f32 %v2259_v42, %v2209_v50  ;;  %v5692_v43 = vadd.f32 %v1961_v13, %v5387_v54  ;;  %v2327_v9 = vmul.f32 %v4159_v28, %v5538_v5  ;;  %v2328_v1 = vmul.f32 %v4159_v28, %v5541_v6  ;;  %v6123_v5 = vld [vmem:[#allocation24_spill] sm:$0xff] }
 0x341   : > { %v2298_v38 = vmul.f32 0.03125, %v2258_v21  ;;  %v2128_v55 = vrot.slane %v2127_v62, 2  ;;  %v2329_v44 = vmul.f32 %v4159_v28, %v5543_v7  ;;  %3758 = vmatpush3.bf16.msra.mxu1 %v3755_v15  ;;  %v6124_v15 = vld [vmem:[#allocation25_spill] sm:$0xff]  ;;  %v2369_v31 = vmul.f32 %v5566_v19, %v2330_v35 }
 0x342   : > { %v2261_v56 = vadd.f32 %v2260_v49, %v2210_v22  ;;  %v2132_v39 = vadd.f32 %v5692_v43, %v5681_v11  ;;  %v1965_v53 = vpop.f32.mrb[52].mxu0  ;;  %v2366_v45 = vmul.f32 %v5566_v19, %v2327_v9  ;;  %v2367_v12 = vmul.f32 %v5566_v19, %v2328_v1  ;;  %3760 = vmatprep.subr.bf16.mxu1 %v3759_v32  ;;  %v6126_v1 = vld [vmem:[#allocation28_spill] sm:$0xff] }
 0x343   : > { %v2306_v54 = vadd.f32 1e-05, %v2298_v38  ;;  %v2129_v48 = vadd.f32 %v2128_v55, %v2127_v62  ;;  %v5702_v14 = vadd.f32 %v1965_v53, %v6123_v5  ;;  %v1967_v6 = vpop.f32.mrb[53].mxu0  ;;  %v2368_v57 = vmul.f32 %v5566_v19, %v2329_v44  ;;  %v6125_v62 = vld [vmem:[#allocation27_spill] sm:$0xff] }
 0x344   : > { %v2262_v7 = vrot.slane %v2261_v56, 4  ;;  %v5706_v26 = vadd.f32 %v1967_v6, %v6124_v15  ;;  %v2405_v58 = vadd.f32 %v5573_v41, %v2366_v45  ;;  %v2406_v0 = vadd.f32 %v5573_v41, %v2367_v12  ;;  %v6127_v6 = vld [vmem:[#allocation30_spill] sm:$0xff] }
 0x345   : > { %4160 = vrsqrt.f32 %v2306_v54  ;;  %v2130_v17 = vrot.slane %v2129_v48, 1  ;;  %3762 = vmatpush3.bf16.msra.mxu1 %v3759_v32  ;;  %v2407_v42 = vadd.f32 %v5573_v41, %v2368_v57  ;;  %v2408_v55 = vadd.f32 %v5573_v41, %v2369_v31 }
 0x346   : > { %v2263_v28 = vadd.f32 %v2262_v7, %v2261_v56  ;;  %v2133_v50 = vadd.f32 %v5706_v26, %v2132_v39  ;;  %3327 = vmatprep.mubr.f32.mxu1 %v2405_v58  ;;  %v1971_v22 = vpop.f32.mrb[54].mxu0  ;;  %v6128_v7 = vld [vmem:[#allocation31_spill] sm:$0xff] }
 0x347   : > { %v2131_v21 = vadd.f32 %v2130_v17, %v2129_v48  ;;  %v5714_v13 = vadd.f32 %v1971_v22, %v6125_v62  ;;  %3328 = vmatmul.mubr.f32.gmra.mrb[72].mxu1 %v2406_v0  ;;  %v1973_v49 = vpop.f32.mrb[55].mxu0  ;;  %v6129_v62 = vld [vmem:[#allocation33_spill] sm:$0xff] }
 0x348   : > { %v2264_v9 = vrot.slane %v2263_v28, 2  ;;  %v5717_v38 = vadd.f32 %v1973_v49, %v6126_v1  ;;  %3330 = vmatprep.mubr.f32.mxu1 %v2407_v42 }
 0x349   : > { %v2156_v32 = vmul.f32 0.03125, %v2131_v21 }
 0x34a   : > { %v2265_v44 = vadd.f32 %v2264_v9, %v2263_v28  ;;  %v2134_v56 = vadd.f32 %v5717_v38, %v2133_v50  ;;  %v1977_v39 = vpop.f32.mrb[56].mxu0 }
 0x34b   : > { %v5722_v35 = vsub.f32 %v5617_v24, %v2156_v32  ;;  %v5725_v53 = vsub.f32 %v5630_v46, %v2156_v32  ;;  %v5728_v45 = vsub.f32 %v5645_v36, %v2156_v32  ;;  %v5731_v12 = vsub.f32 %v5657_v27, %v2156_v32  ;;  %3331 = vmatmul.mubr.f32.gmra.mrb[74].mxu1 %v2408_v55  ;;  %v1979_v54 = vpop.f32.mrb[57].mxu0 }
 0x34c   : > { %v2266_v48 = vrot.slane %v2265_v44, 1  ;;  %v2135_v5 = vrot.slane %v2134_v56, 4  ;;  %v5734_v57 = vadd.f32 %v1977_v39, %v6127_v6  ;;  %v5737_v15 = vadd.f32 %v1979_v54, %v6128_v7 }
 0x34d   : > { %v2211_v24 = vmul.f32 %v5722_v35, %v5722_v35  ;;  %v2212_v46 = vmul.f32 %v5725_v53, %v5725_v53  ;;  %v2213_v17 = vmul.f32 %v5728_v45, %v5728_v45  ;;  %v2214_v9 = vmul.f32 %v5731_v12, %v5731_v12 }
 0x34e   : > { %v2267_v36 = vadd.f32 %v2266_v48, %v2265_v44  ;;  %v2136_v58 = vadd.f32 %v2135_v5, %v2134_v56  ;;  %v1983_v27 = vpop.f32.mrb[58].mxu0 }
 0x34f   : > { %v4161_v0 = vpop.eup %4160  ;;  %v2268_v28 = vadd.f32 %v2212_v46, %v2211_v24  ;;  %v5746_v50 = vadd.f32 %v1983_v27, %v5413_v4  ;;  %v1985_v22 = vpop.f32.mrb[59].mxu0 }
 0x350   : > { %v2334_v42 = vmul.f32 %v4161_v0, %v5611_v29  ;;  %v2299_v31 = vmul.f32 0.03125, %v2267_v36  ;;  %v2137_v21 = vrot.slane %v2136_v58, 2  ;;  %v5750_v49 = vadd.f32 %v1985_v22, %v6129_v62  ;;  %v6131_v22 = vld [vmem:[#allocation37_spill] sm:$0xff] }
 0x351   : > { %v2269_v1 = vadd.f32 %v2268_v28, %v2213_v17  ;;  %v2331_v32 = vmul.f32 %v4161_v0, %v5602_v51  ;;  %v2332_v55 = vmul.f32 %v4161_v0, %v5605_v34  ;;  %v2333_v29 = vmul.f32 %v4161_v0, %v5608_v25  ;;  %v6130_v34 = vld [vmem:[#allocation35_spill] sm:$0xff] }
 0x352   : > { %v2307_v44 = vadd.f32 1e-05, %v2299_v31  ;;  %v2138_v56 = vadd.f32 %v2137_v21, %v2136_v58  ;;  %v2141_v4 = vadd.f32 %v5750_v49, %v5737_v15  ;;  %v1989_v39 = vpop.f32.mrb[60].mxu0  ;;  %v2373_v17 = vmul.f32 %v5566_v19, %v2334_v42 }
 0x353   : > { %v2270_v54 = vadd.f32 %v2269_v1, %v2214_v9  ;;  %v5760_v48 = vadd.f32 %v1989_v39, %v5421_v52  ;;  %v1991_v5 = vpop.f32.mrb[61].mxu0  ;;  %v2370_v6 = vmul.f32 %v5566_v19, %v2331_v32  ;;  %v2371_v7 = vmul.f32 %v5566_v19, %v2332_v55  ;;  %v6132_v1 = vld [vmem:[#allocation38_spill] sm:$0xff] }
 0x354   : > { %4162 = vrsqrt.f32 %v2307_v44  ;;  %v2139_v51 = vrot.slane %v2138_v56, 1  ;;  %v5765_v24 = vadd.f32 %v1991_v5, %v6130_v34  ;;  %v2372_v46 = vmul.f32 %v5566_v19, %v2333_v29 }
 0x355   : > { %v2271_v36 = vrot.slane %v2270_v54, 4  ;;  %v2409_v58 = vadd.f32 %v5573_v41, %v2370_v6  ;;  %v2410_v25 = vadd.f32 %v5573_v41, %v2371_v7  ;;  %v2412_v44 = vadd.f32 %v5573_v41, %v2373_v17 }
 0x356   : > { %v2140_v27 = vadd.f32 %v2139_v51, %v2138_v56  ;;  %v2142_v52 = vadd.f32 %v5765_v24, %v2141_v4  ;;  %v1995_v0 = vpop.f32.mrb[62].mxu0  ;;  %v2411_v62 = vadd.f32 %v5573_v41, %v2372_v46 }
 0x357   : > { %v2272_v28 = vadd.f32 %v2271_v36, %v2270_v54  ;;  %3333 = vmatprep.mubr.f32.mxu1 %v2409_v58  ;;  %v5773_v31 = vadd.f32 %v1995_v0, %v6131_v22  ;;  %v1997_v21 = vpop.f32.mrb[63].mxu0 }
 0x358   : > { %v2157_v9 = vmul.f32 0.03125, %v2140_v27  ;;  %3334 = vmatmul.mubr.f32.gmra.mrb[76].mxu1 %v2410_v25  ;;  %v3858_v32 = vadd.f32 %v1997_v21, %v6132_v1 }
 0x359   : > { %v2273_v55 = vrot.slane %v2272_v28, 2  ;;  %3336 = vmatprep.mubr.f32.mxu1 %v2411_v62 }
 0x35a   : > { %v5779_v56 = vsub.f32 %v5681_v11, %v2157_v9  ;;  %v5782_v42 = vsub.f32 %v5692_v43, %v2157_v9  ;;  %v5785_v4 = vsub.f32 %v5706_v26, %v2157_v9  ;;  %v5788_v39 = vsub.f32 %v5717_v38, %v2157_v9 }
 0x35b   : > { %v2274_v29 = vadd.f32 %v2273_v55, %v2272_v28  ;;  %v2143_v54 = vadd.f32 %v3858_v32, %v2142_v52 }
 0x35c   : > { %v2215_v5 = vmul.f32 %v5779_v56, %v5779_v56  ;;  %v2216_v6 = vmul.f32 %v5782_v42, %v5782_v42  ;;  %3337 = vmatmul.mubr.f32.gmra.mrb[78].mxu1 %v2412_v44  ;;  %v2217_v43 = vmul.f32 %v5785_v4, %v5785_v4  ;;  %v2218_v58 = vmul.f32 %v5788_v39, %v5788_v39 }
 0x35d   : > { %v2275_v11 = vrot.slane %v2274_v29, 1  ;;  %v2144_v7 = vrot.slane %v2143_v54, 4 }
 0x35e   : > { %v4163_v51 = vpop.eup %4162  ;;  %v2277_v26 = vadd.f32 %v2216_v6, %v2215_v5 }
 0x35f   : > { %v2338_v34 = vmul.f32 %v4163_v51, %v5670_v8  ;;  %v2276_v38 = vadd.f32 %v2275_v11, %v2274_v29  ;;  %v2145_v46 = vadd.f32 %v2144_v7, %v2143_v54  ;;  %v2335_v36 = vmul.f32 %v4163_v51, %v5661_v30 }
 0x360   : > { %v2278_v25 = vadd.f32 %v2277_v26, %v2217_v43  ;;  %v2336_v27 = vmul.f32 %v4163_v51, %v5664_v37  ;;  %v2337_v52 = vmul.f32 %v4163_v51, %v5667_v40 }
 0x361   : > { %v2300_v0 = vmul.f32 0.03125, %v2276_v38  ;;  %v2146_v17 = vrot.slane %v2145_v46, 2  ;;  %v2374_v28 = vmul.f32 %v5566_v19, %v2335_v36  ;;  %v2377_v37 = vmul.f32 %v5566_v19, %v2338_v34 }
 0x362   : > { %v2279_v22 = vadd.f32 %v2278_v25, %v2218_v58  ;;  %v2375_v21 = vmul.f32 %v5566_v19, %v2336_v27  ;;  %v2376_v8 = vmul.f32 %v5566_v19, %v2337_v52 }
 0x363   : > { %v2308_v62 = vadd.f32 1e-05, %v2300_v0  ;;  %v2147_v9 = vadd.f32 %v2146_v17, %v2145_v46  ;;  %v2413_v30 = vadd.f32 %v5573_v41, %v2374_v28  ;;  %v2416_v6 = vadd.f32 %v5573_v41, %v2377_v37 }
 0x364   : > { %v2280_v1 = vrot.slane %v2279_v22, 4  ;;  %v2414_v55 = vadd.f32 %v5573_v41, %v2375_v21  ;;  %v2415_v44 = vadd.f32 %v5573_v41, %v2376_v8 }
 0x365   : > { %4164 = vrsqrt.f32 %v2308_v62  ;;  %v2148_v40 = vrot.slane %v2147_v9, 1  ;;  %3339 = vmatprep.mubr.f32.mxu1 %v2413_v30 }
 0x366   : > { %v2281_v29 = vadd.f32 %v2280_v1, %v2279_v22  ;;  %3340 = vmatmul.mubr.f32.gmra.mrb[80].mxu1 %v2414_v55 }
 0x367   : > { %v2149_v54 = vadd.f32 %v2148_v40, %v2147_v9  ;;  %3342 = vmatprep.mubr.f32.mxu1 %v2415_v44 }
 0x368   : > { %v2282_v5 = vrot.slane %v2281_v29, 2 }
 0x369   : > { %v2158_v11 = vmul.f32 0.03125, %v2149_v54 }
 0x36a   : > { %v2283_v7 = vadd.f32 %v2282_v5, %v2281_v29  ;;  %3343 = vmatmul.mubr.f32.gmra.mrb[82].mxu1 %v2416_v6 }
 0x36b   : > { %v2187_v51 = vsub.f32 %v5737_v15, %v2158_v11  ;;  %v2188_v43 = vsub.f32 %v5750_v49, %v2158_v11  ;;  %v2189_v26 = vsub.f32 %v5765_v24, %v2158_v11  ;;  %v2190_v34 = vsub.f32 %v3858_v32, %v2158_v11 }
 0x36c   : > { %v2284_v38 = vrot.slane %v2283_v7, 1 }
 0x36d   : > { %v2219_v46 = vmul.f32 %v2187_v51, %v2187_v51  ;;  %v2220_v36 = vmul.f32 %v2188_v43, %v2188_v43  ;;  %v2221_v27 = vmul.f32 %v2189_v26, %v2189_v26  ;;  %v2222_v15 = vmul.f32 %v2190_v34, %v2190_v34 }
 0x36e   : > { %v2285_v58 = vadd.f32 %v2284_v38, %v2283_v7 }
 0x36f   : > { %v4165_v25 = vpop.eup %4164  ;;  %v2286_v52 = vadd.f32 %v2220_v36, %v2219_v46 }
 0x370   : > { %v2342_v0 = vmul.f32 %v4165_v25, %v5731_v12  ;;  %v2301_v17 = vmul.f32 0.03125, %v2285_v58  ;;  %v2339_v28 = vmul.f32 %v4165_v25, %v5722_v35  ;;  %v2340_v22 = vmul.f32 %v4165_v25, %v5725_v53 }
 0x371   : > { %v2287_v21 = vadd.f32 %v2286_v52, %v2221_v27  ;;  %v2341_v49 = vmul.f32 %v4165_v25, %v5728_v45 }
 0x372   : > { %v2309_v24 = vadd.f32 1e-05, %v2301_v17  ;;  %v2378_v32 = vmul.f32 %v5566_v19, %v2339_v28  ;;  %v2379_v8 = vmul.f32 %v5566_v19, %v2340_v22  ;;  %v2381_v53 = vmul.f32 %v5566_v19, %v2342_v0 }
 0x373   : > { %v2288_v62 = vadd.f32 %v2287_v21, %v2222_v15  ;;  %v2380_v9 = vmul.f32 %v5566_v19, %v2341_v49 }
 0x374   : > { %4166 = vrsqrt.f32 %v2309_v24  ;;  %v2417_v12 = vadd.f32 %v5573_v41, %v2378_v32  ;;  %v2418_v30 = vadd.f32 %v5573_v41, %v2379_v8  ;;  %v2420_v37 = vadd.f32 %v5573_v41, %v2381_v53  ;;  %v5840_v24 = vld [vmem:[#allocation7] ss:$0 sm:$0xff] }
 0x375   : > { %v2289_v35 = vrot.slane %v2288_v62, 4  ;;  %v2419_v1 = vadd.f32 %v5573_v41, %v2380_v9  ;;  %v6133_v9 = vld [vmem:[#allocation26_spill] sm:$0xff] }
 0x376   : > { %3345 = vmatprep.mubr.f32.mxu1 %v2417_v12 }
 0x377   : > { %v2290_v45 = vadd.f32 %v2289_v35, %v2288_v62  ;;  %3346 = vmatmul.mubr.f32.gmra.mrb[84].mxu1 %v2418_v30  ;;  %v6135_v35 = vld [vmem:[#allocation32_spill] sm:$0xff] }
 0x378   : > { %3348 = vmatprep.mubr.f32.mxu1 %v2419_v1  ;;  %v2009_v53 = vmul.f32 %v6135_v35, %v5840_v24  ;;  %v2027_v35 = vmul.f32 %v5614_v59, %v5840_v24 }
 0x379   : > { %v2291_v55 = vrot.slane %v2290_v45, 2 }
 0x37b   : > { %v2292_v40 = vadd.f32 %v2291_v55, %v2290_v45  ;;  %3349 = vmatmul.mubr.f32.gmra.mrb[86].mxu1 %v2420_v37  ;;  %v6136_v45 = vld [vmem:[#allocation34_spill] sm:$0xff]  ;;  %v6137_v37 = vld [vmem:[#allocation36_spill] sm:$0xff] }
 0x37c   : > { %v2010_v55 = vmul.f32 %v6136_v45, %v5840_v24  ;;  %v2031_v45 = vmul.f32 %v5674_v3, %v5840_v24 }
 0x37d   : > { %v2293_v44 = vrot.slane %v2292_v40, 1 }
 0x37e   : > { %v4167_v29 = vpop.eup %4166 }
 0x37f   : > { %v2346_v54 = vmul.f32 %v4167_v29, %v5788_v39  ;;  %v2294_v5 = vadd.f32 %v2293_v44, %v2292_v40  ;;  %v2343_v6 = vmul.f32 %v4167_v29, %v5779_v56  ;;  %v2344_v11 = vmul.f32 %v4167_v29, %v5782_v42 }
 0x380   : > { %v2345_v7 = vmul.f32 %v4167_v29, %v5785_v4  ;;  %v2011_v40 = vmul.f32 %v6137_v37, %v5840_v24  ;;  %v2033_v37 = vmul.f32 %v5702_v14, %v5840_v24 }
 0x381   : > { %v2302_v38 = vmul.f32 0.03125, %v2294_v5  ;;  %v2382_v46 = vmul.f32 %v5566_v19, %v2343_v6  ;;  %v2383_v36 = vmul.f32 %v5566_v19, %v2344_v11  ;;  %v2385_v39 = vmul.f32 %v5566_v19, %v2346_v54  ;;  %v6139_v5 = vld [vmem:[#allocation40_spill] sm:$0xff] }
 0x382   : > { %v2384_v58 = vmul.f32 %v5566_v19, %v2345_v7  ;;  %v2013_v6 = vmul.f32 %v6139_v5, %v5840_v24  ;;  %v6140_v7 = vld [vmem:[#allocation41_spill] sm:$0xff] }
 0x383   : > { %v2310_v25 = vadd.f32 1e-05, %v2302_v38  ;;  %v2421_v27 = vadd.f32 %v5573_v41, %v2382_v46  ;;  %v2422_v52 = vadd.f32 %v5573_v41, %v2383_v36  ;;  %v2424_v42 = vadd.f32 %v5573_v41, %v2385_v39  ;;  %v6141_v36 = vld [vmem:[#allocation42_spill] sm:$0xff] }
 0x384   : > { %v2423_v56 = vadd.f32 %v5573_v41, %v2384_v58  ;;  %v2014_v38 = vmul.f32 %v6140_v7, %v5840_v24  ;;  %v2015_v58 = vmul.f32 %v6141_v36, %v5840_v24 }
 0x385   : > { %4168 = vrsqrt.f32 %v2310_v25  ;;  %3351 = vmatprep.mubr.f32.mxu1 %v2421_v27  ;;  %v6142_v27 = vld [vmem:[#allocation43_spill] sm:$0xff] }
 0x386   : > { %3352 = vmatmul.mubr.f32.gmra.mrb[88].mxu1 %v2422_v52  ;;  %v2016_v52 = vmul.f32 %v6142_v27, %v5840_v24 }
 0x387   : > { %3354 = vmatprep.mubr.f32.mxu1 %v2423_v56  ;;  %v6143_v56 = vld [vmem:[#allocation44_spill] sm:$0xff] }
 0x38a   : > { %3355 = vmatmul.mubr.f32.gmra.mrb[90].mxu1 %v2424_v42  ;;  %v2017_v42 = vmul.f32 %v6143_v56, %v5840_v24 }
 0x38f   : > { %v4169_v4 = vpop.eup %4168 }
 0x390   : > { %v2350_v0 = vmul.f32 %v4169_v4, %v2190_v34  ;;  %v2347_v17 = vmul.f32 %v4169_v4, %v2187_v51  ;;  %v2348_v28 = vmul.f32 %v4169_v4, %v2188_v43  ;;  %v2349_v22 = vmul.f32 %v4169_v4, %v2189_v26  ;;  %v5848_v43 = vld [vmem:[#allocation8] ss:$0 sm:$0xff]  ;;  %v6134_v26 = vld [vmem:[#allocation29_spill] sm:$0xff] }
 0x391   : > { %v2007_v34 = vmul.f32 %v6133_v9, %v5840_v24  ;;  %v2008_v12 = vmul.f32 %v6134_v26, %v5840_v24  ;;  %v2048_v44 = vadd.f32 %v5848_v43, %v2009_v53  ;;  %v2049_v54 = vadd.f32 %v5848_v43, %v2010_v55 }
 0x392   : > { %v2386_v15 = vmul.f32 %v5566_v19, %v2347_v17  ;;  %v2387_v21 = vmul.f32 %v5566_v19, %v2348_v28  ;;  %v2388_v49 = vmul.f32 %v5566_v19, %v2349_v22  ;;  %v2389_v62 = vmul.f32 %v5566_v19, %v2350_v0 }
 0x393   : > { %v2046_v19 = vadd.f32 %v5848_v43, %v2007_v34  ;;  %v2047_v1 = vadd.f32 %v5848_v43, %v2008_v12  ;;  %v2050_v11 = vadd.f32 %v5848_v43, %v2011_v40  ;;  %v2052_v25 = vadd.f32 %v5848_v43, %v2013_v6  ;;  %v5946_v6 = vld [vmem:[#allocation16] ss:$0 sm:$0xff] }
 0x394   : > { %v2425_v32 = vadd.f32 %v5573_v41, %v2386_v15  ;;  %v2426_v8 = vadd.f32 %v5573_v41, %v2387_v21  ;;  %v2427_v51 = vadd.f32 %v5573_v41, %v2388_v49  ;;  %v2428_v30 = vadd.f32 %v5573_v41, %v2389_v62  ;;  %v6138_v41 = vld [vmem:[#allocation39_spill] sm:$0xff]  ;;  %v6145_v62 = vld [vmem:[#allocation46_spill] sm:$0xff] }
 0x395   : > { %v2012_v29 = vmul.f32 %v6138_v41, %v5840_v24  ;;  %v2053_v39 = vadd.f32 %v5848_v43, %v2014_v38  ;;  %v2054_v4 = vadd.f32 %v5848_v43, %v2015_v58  ;;  %v2018_v0 = vmul.f32 %v5489_v23, %v5840_v24  ;;  %v6144_v23 = vld [vmem:[#allocation45_spill] sm:$0xff] }
 0x396   : > { %3357 = vmatprep.mubr.f32.mxu1 %v2425_v32  ;;  %v2055_v17 = vadd.f32 %v5848_v43, %v2016_v52  ;;  %v2019_v28 = vmul.f32 %v5503_v10, %v5840_v24  ;;  %v2056_v22 = vadd.f32 %v5848_v43, %v2017_v42  ;;  %v2020_v15 = vmul.f32 %v5515_v2, %v5840_v24 }
 0x397   : > { %3358 = vmatmul.mubr.f32.gmra.mrb[92].mxu1 %v2426_v8  ;;  %v2051_v46 = vadd.f32 %v5848_v43, %v2012_v29  ;;  %v2057_v21 = vadd.f32 %v5848_v43, %v2018_v0  ;;  %v2021_v49 = vmul.f32 %v5525_v20, %v5840_v24  ;;  %v2022_v8 = vmul.f32 %v6144_v23, %v5840_v24 }
 0x398   : > { %3360 = vmatprep.mubr.f32.mxu1 %v2427_v51  ;;  %v2058_v32 = vadd.f32 %v5848_v43, %v2019_v28  ;;  %v2059_v10 = vadd.f32 %v5848_v43, %v2020_v15  ;;  %v2023_v9 = vmul.f32 %v6145_v62, %v5840_v24  ;;  %v2024_v2 = vmul.f32 %v5564_v60, %v5840_v24 }
 0x399   : > { %v2060_v34 = vadd.f32 %v5848_v43, %v2021_v49  ;;  %v2061_v20 = vadd.f32 %v5848_v43, %v2022_v8  ;;  %v2025_v51 = vmul.f32 %v5581_v61, %v5840_v24  ;;  %v2026_v12 = vmul.f32 %v5593_v47, %v5840_v24 }
 0x39a   : > { %v2062_v26 = vadd.f32 %v5848_v43, %v2023_v9  ;;  %v2028_v60 = vmul.f32 %v5626_v16, %v5840_v24  ;;  %v2030_v47 = vmul.f32 %v5653_v33, %v5840_v24  ;;  %v2032_v16 = vmul.f32 %v5689_v18, %v5840_v24 }
 0x39b   : > { %3361 = vmatmul.mubr.f32.gmra.mrb[94].mxu1 %v2428_v30  ;;  %v2063_v30 = vadd.f32 %v5848_v43, %v2024_v2  ;;  %v2064_v53 = vadd.f32 %v5848_v43, %v2025_v51  ;;  %v2065_v61 = vadd.f32 %v5848_v43, %v2026_v12  ;;  %v2070_v40 = vadd.f32 %v5848_v43, %v2031_v45 }
 0x39c   : > { %3395 = vmatprep.mubr.f32.mxu1 %v2046_v19  ;;  %v2029_v19 = vmul.f32 %v5640_v63, %v5840_v24  ;;  %v2067_v59 = vadd.f32 %v5848_v43, %v2028_v60  ;;  %v2069_v63 = vadd.f32 %v5848_v43, %v2030_v47  ;;  %v2034_v33 = vmul.f32 %v5714_v13, %v5840_v24 }
 0x39d   : > { %v2071_v3 = vadd.f32 %v5848_v43, %v2032_v16  ;;  %v2072_v41 = vadd.f32 %v5848_v43, %v2033_v37  ;;  %v2036_v18 = vmul.f32 %v5746_v50, %v5840_v24  ;;  %v2037_v29 = vmul.f32 %v5760_v48, %v5840_v24 }
 0x39e   : > { %v2068_v55 = vadd.f32 %v5848_v43, %v2029_v19  ;;  %v2073_v14 = vadd.f32 %v5848_v43, %v2034_v33 }
 0x39f   : > { %3396 = vmatmul.mubr.f32.vlgmr.msra.gmra.mrb[64].mxu1 %v2047_v1  ;;  %v2066_v1 = vadd.f32 %v5848_v43, %v2027_v35  ;;  %v2076_v5 = vadd.f32 %v5848_v43, %v2037_v29 }
 0x3a0   : > { %3398 = vmatprep.mubr.f32.mxu1 %v2048_v44  ;;  %v2035_v44 = vmul.f32 %v5734_v57, %v5840_v24  ;;  %v2038_v57 = vmul.f32 %v5773_v31, %v5840_v24 }
 0x3a2   : > { %v2074_v13 = vadd.f32 %v5848_v43, %v2035_v44  ;;  %v2077_v50 = vadd.f32 %v5848_v43, %v2038_v57 }
 0x3a3   : > { %3399 = vmatmul.mubr.f32.gmra.mrb[66].mxu1 %v2049_v54  ;;  %v2075_v54 = vadd.f32 %v5848_v43, %v2036_v18 }
 0x3a4   : > { %3401 = vmatprep.mubr.f32.mxu1 %v2050_v11 }
 0x3a7   : > { %3402 = vmatmul.mubr.f32.gmra.mrb[68].mxu1 %v2051_v46 }
 0x3a8   : > { %3404 = vmatprep.mubr.f32.mxu1 %v2052_v25 }
 0x3ab   : > { %3405 = vmatmul.mubr.f32.gmra.mrb[70].mxu1 %v2053_v39 }
 0x3ac   : > { %3407 = vmatprep.mubr.f32.mxu1 %v2054_v4 }
 0x3af   : > { %3408 = vmatmul.mubr.f32.gmra.mrb[72].mxu1 %v2055_v17 }
 0x3b0   : > { %3410 = vmatprep.mubr.f32.mxu1 %v2056_v22 }
 0x3b3   : > { %3411 = vmatmul.mubr.f32.gmra.mrb[74].mxu1 %v2057_v21 }
 0x3b4   : > { %3413 = vmatprep.mubr.f32.mxu1 %v2058_v32 }
 0x3b7   : > { %3414 = vmatmul.mubr.f32.gmra.mrb[76].mxu1 %v2059_v10 }
 0x3b8   : > { %3416 = vmatprep.mubr.f32.mxu1 %v2060_v34 }
 0x3bb   : > { %3417 = vmatmul.mubr.f32.gmra.mrb[78].mxu1 %v2061_v20 }
 0x3bc   : > { %3419 = vmatprep.mubr.f32.mxu1 %v2062_v26 }
 0x3bf   : > { %3420 = vmatmul.mubr.f32.gmra.mrb[80].mxu1 %v2063_v30 }
 0x3c0   : > { %3422 = vmatprep.mubr.f32.mxu1 %v2064_v53 }
 0x3c3   : > { %3423 = vmatmul.mubr.f32.gmra.mrb[82].mxu1 %v2065_v61 }
 0x3c4   : > { %3425 = vmatprep.mubr.f32.mxu1 %v2066_v1 }
 0x3c7   : > { %3426 = vmatmul.mubr.f32.gmra.mrb[84].mxu1 %v2067_v59 }
 0x3c8   : > { %3428 = vmatprep.mubr.f32.mxu1 %v2068_v55 }
 0x3cb   : > { %3429 = vmatmul.mubr.f32.gmra.mrb[86].mxu1 %v2069_v63 }
 0x3cc   : > { %3431 = vmatprep.mubr.f32.mxu1 %v2070_v40 }
 0x3cf   : > { %3432 = vmatmul.mubr.f32.gmra.mrb[88].mxu1 %v2071_v3 }
 0x3d0   : > { %3434 = vmatprep.mubr.f32.mxu1 %v2072_v41 }
 0x3d3   : > { %3435 = vmatmul.mubr.f32.gmra.mrb[90].mxu1 %v2073_v14 }
 0x3d4   : > { %3437 = vmatprep.mubr.f32.mxu1 %v2074_v13 }
 0x3d7   : > { %3438 = vmatmul.mubr.f32.gmra.mrb[92].mxu1 %v2075_v54 }
 0x3d8   : > { %3440 = vmatprep.mubr.f32.mxu1 %v2076_v5 }
 0x3db   : > { %3441 = vmatmul.mubr.f32.gmra.mrb[94].mxu1 %v2077_v50 }
 0x472   : > { %v3397_v48 = vpop.f32.mrb[64].mxu1 }
 0x473   : > { %v2919_v11 = vadd.f32 %v3397_v48, %v5946_v6  ;;  %v2752_v7 = vpop.f32.mrb[65].mxu1 }
 0x474   : > { %v2918_v38 = vadd.f32 %v5946_v6, %v2752_v7 }
 0x475   : > { %2951 = vst [vmem:[%s5950_s14 + $0x8] sm:$0xff] %v2919_v11 }
 0x476   : > { %2950 = vst [vmem:[%s5950_s14] sm:$0xff] %v2918_v38  ;;  %v3400_v31 = vpop.f32.mrb[66].mxu1 }
 0x477   : > { %v2921_v24 = vadd.f32 %v3400_v31, %v5946_v6  ;;  %v2762_v43 = vpop.f32.mrb[67].mxu1 }
 0x478   : > { %v2920_v46 = vadd.f32 %v5946_v6, %v2762_v43 }
 0x479   : > { %2953 = vst [vmem:[%s5950_s14 + $0x18] sm:$0xff] %v2921_v24 }
 0x47a   : > { %2952 = vst [vmem:[%s5950_s14 + $0x10] sm:$0xff] %v2920_v46  ;;  %v3403_v36 = vpop.f32.mrb[68].mxu1 }
 0x47b   : > { %v2923_v58 = vadd.f32 %v3403_v36, %v5946_v6  ;;  %v2772_v25 = vpop.f32.mrb[69].mxu1 }
 0x47c   : > { %v2922_v27 = vadd.f32 %v5946_v6, %v2772_v25 }
 0x47d   : > { %2955 = vst [vmem:[%s5950_s14 + $0x28] sm:$0xff] %v2923_v58 }
 0x47e   : > { %2954 = vst [vmem:[%s5950_s14 + $0x20] sm:$0xff] %v2922_v27  ;;  %v3406_v52 = vpop.f32.mrb[70].mxu1 }
 0x47f   : > { %v2925_v39 = vadd.f32 %v3406_v52, %v5946_v6  ;;  %v2782_v56 = vpop.f32.mrb[71].mxu1 }
 0x480   : > { %v2924_v42 = vadd.f32 %v5946_v6, %v2782_v56 }
 0x481   : > { %2957 = vst [vmem:[%s5950_s14 + $0x38] sm:$0xff] %v2925_v39 }
 0x482   : > { %2956 = vst [vmem:[%s5950_s14 + $0x30] sm:$0xff] %v2924_v42  ;;  %v3409_v4 = vpop.f32.mrb[72].mxu1 }
 0x483   : > { %v2927_v0 = vadd.f32 %v3409_v4, %v5946_v6  ;;  %v2792_v17 = vpop.f32.mrb[73].mxu1 }
 0x484   : > { %v2926_v28 = vadd.f32 %v5946_v6, %v2792_v17 }
 0x485   : > { %2959 = vst [vmem:[%s5950_s14 + $0x48] sm:$0xff] %v2927_v0 }
 0x486   : > { %2958 = vst [vmem:[%s5950_s14 + $0x40] sm:$0xff] %v2926_v28  ;;  %v3412_v22 = vpop.f32.mrb[74].mxu1 }
 0x487   : > { %v2929_v15 = vadd.f32 %v3412_v22, %v5946_v6  ;;  %v2802_v21 = vpop.f32.mrb[75].mxu1 }
 0x488   : > { %v2928_v49 = vadd.f32 %v5946_v6, %v2802_v21 }
 0x489   : > { %2961 = vst [vmem:[%s5950_s14 + $0x58] sm:$0xff] %v2929_v15 }
 0x48a   : > { %2960 = vst [vmem:[%s5950_s14 + $0x50] sm:$0xff] %v2928_v49  ;;  %v3415_v32 = vpop.f32.mrb[76].mxu1 }
 0x48b   : > { %v2931_v23 = vadd.f32 %v3415_v32, %v5946_v6  ;;  %v2812_v8 = vpop.f32.mrb[77].mxu1 }
 0x48c   : > { %v2930_v10 = vadd.f32 %v5946_v6, %v2812_v8 }
 0x48d   : > { %2963 = vst [vmem:[%s5950_s14 + $0x68] sm:$0xff] %v2931_v23 }
 0x48e   : > { %2962 = vst [vmem:[%s5950_s14 + $0x60] sm:$0xff] %v2930_v10  ;;  %v3418_v62 = vpop.f32.mrb[78].mxu1 }
 0x48f   : > { %v2933_v9 = vadd.f32 %v3418_v62, %v5946_v6  ;;  %v2822_v34 = vpop.f32.mrb[79].mxu1 }
 0x490   : > { %v2932_v2 = vadd.f32 %v5946_v6, %v2822_v34 }
 0x491   : > { %2965 = vst [vmem:[%s5950_s14 + $0x78] sm:$0xff] %v2933_v9 }
 0x492   : > { %2964 = vst [vmem:[%s5950_s14 + $0x70] sm:$0xff] %v2932_v2  ;;  %v3421_v20 = vpop.f32.mrb[80].mxu1 }
 0x493   : > { %v2935_v51 = vadd.f32 %v3421_v20, %v5946_v6  ;;  %v2832_v26 = vpop.f32.mrb[81].mxu1 }
 0x494   : > { %v2934_v12 = vadd.f32 %v5946_v6, %v2832_v26 }
 0x495   : > { %2967 = vst [vmem:[%s5950_s14 + $0x88] sm:$0xff] %v2935_v51 }
 0x496   : > { %2966 = vst [vmem:[%s5950_s14 + $0x80] sm:$0xff] %v2934_v12  ;;  %v3424_v30 = vpop.f32.mrb[82].mxu1 }
 0x497   : > { %v2937_v35 = vadd.f32 %v3424_v30, %v5946_v6  ;;  %v2842_v53 = vpop.f32.mrb[83].mxu1 }
 0x498   : > { %v2936_v60 = vadd.f32 %v5946_v6, %v2842_v53 }
 0x499   : > { %2969 = vst [vmem:[%s5950_s14 + $0x98] sm:$0xff] %v2937_v35 }
 0x49a   : > { %2968 = vst [vmem:[%s5950_s14 + $0x90] sm:$0xff] %v2936_v60  ;;  %v3427_v61 = vpop.f32.mrb[84].mxu1 }
 0x49b   : > { %v2939_v19 = vadd.f32 %v3427_v61, %v5946_v6  ;;  %v2852_v1 = vpop.f32.mrb[85].mxu1 }
 0x49c   : > { %v2938_v47 = vadd.f32 %v5946_v6, %v2852_v1 }
 0x49d   : > { %2971 = vst [vmem:[%s5950_s14 + $0xa8] sm:$0xff] %v2939_v19 }
 0x49e   : > { %2970 = vst [vmem:[%s5950_s14 + $0xa0] sm:$0xff] %v2938_v47  ;;  %v3430_v59 = vpop.f32.mrb[86].mxu1 }
 0x49f   : > { %v2941_v45 = vadd.f32 %v3430_v59, %v5946_v6  ;;  %v2862_v55 = vpop.f32.mrb[87].mxu1 }
 0x4a0   : > { %v2940_v16 = vadd.f32 %v5946_v6, %v2862_v55 }
 0x4a1   : > { %2973 = vst [vmem:[%s5950_s14 + $0xb8] sm:$0xff] %v2941_v45 }
 0x4a2   : > { %2972 = vst [vmem:[%s5950_s14 + $0xb0] sm:$0xff] %v2940_v16  ;;  %v3433_v63 = vpop.f32.mrb[88].mxu1 }
 0x4a3   : > { %v2943_v37 = vadd.f32 %v3433_v63, %v5946_v6  ;;  %v2872_v40 = vpop.f32.mrb[89].mxu1 }
 0x4a4   : > { %v2942_v33 = vadd.f32 %v5946_v6, %v2872_v40 }
 0x4a5   : > { %2975 = vst [vmem:[%s5950_s14 + $0xc8] sm:$0xff] %v2943_v37 }
 0x4a6   : > { %2974 = vst [vmem:[%s5950_s14 + $0xc0] sm:$0xff] %v2942_v33  ;;  %v3436_v3 = vpop.f32.mrb[90].mxu1 }
 0x4a7   : > { %v2945_v44 = vadd.f32 %v3436_v3, %v5946_v6  ;;  %v2882_v41 = vpop.f32.mrb[91].mxu1 }
 0x4a8   : > { %v2944_v18 = vadd.f32 %v5946_v6, %v2882_v41 }
 0x4a9   : > { %2977 = vst [vmem:[%s5950_s14 + $0xd8] sm:$0xff] %v2945_v44 }
 0x4aa   : > { %2976 = vst [vmem:[%s5950_s14 + $0xd0] sm:$0xff] %v2944_v18  ;;  %v3439_v14 = vpop.f32.mrb[92].mxu1 }
 0x4ab   : > { %v2947_v29 = vadd.f32 %v3439_v14, %v5946_v6  ;;  %v2892_v13 = vpop.f32.mrb[93].mxu1 }
 0x4ac   : > { %v2946_v57 = vadd.f32 %v5946_v6, %v2892_v13 }
 0x4ad   : > { %2979 = vst [vmem:[%s5950_s14 + $0xe8] sm:$0xff] %v2947_v29 }
 0x4ae   : > { %2978 = vst [vmem:[%s5950_s14 + $0xe0] sm:$0xff] %v2946_v57  ;;  %v3442_v54 = vpop.f32.mrb[94].mxu1 }
 0x4af   : > { %v2949_v5 = vadd.f32 %v3442_v54, %v5946_v6  ;;  %v2902_v50 = vpop.f32.mrb[95].mxu1 }
 0x4b0   : > { %v2948_v48 = vadd.f32 %v5946_v6, %v2902_v50 }
 0x4b1   : > { %2981 = vst [vmem:[%s5950_s14 + $0xf8] sm:$0xff] %v2949_v5 }
 0x4b2   : > { %2980 = vst [vmem:[%s5950_s14 + $0xf0] sm:$0xff] %v2948_v48 }
 0x4b3   : > { %4437 = shalt.err (!%p4434_p10)
}
 0x4b4   : > { %s4438_s16 = scalar_lea.hbm %s6016_s17, 4096  ;;  %s4442_s24 = scalar_lea.hbm %s6146_s28, 8192 }
 0x4b5   : > { %p4439_p11 = scmp.ne.s32.totalorder %s6016_s17, %s4438_s16  ;;  %p4443_p7 = scmp.lt.u32.totalorder %s6016_s17, %s6146_s28 }
 0x4b6   : > { %p4444_p6 = scmp.lt.u32.totalorder %s4442_s24, %s4438_s16  ;;  %p4446_p12 = scmp.lt.u32.totalorder %s4438_s16, %s6016_s17 }
 0x4b7   : > { %p4440_p3 = pnand %p4439_p11, %p6147_p1 }
 0x4b8   : > { %p4445_p9 = por %p4444_p6, %p4443_p7 }
 0x4b9   : > { %p4441_p5 = pneg %p4440_p3 }
 0x4ba   : > { %p4447_p13 = por %p4446_p12, %p4445_p9 }
 0x4bc   : > { %p4448_p0 = pnand %p4447_p13, %p4441_p5 }
 0x4be   : > { %4451 = shalt.err (!%p4448_p0)
}
 0x4bf   : > { %s4524_s18 = smov 128   ;;  %s4525_s9 = smov 8  }
 0x4c0   : > { %4053 = dma.vmem_to_hbm [thread:$0]  (%p6147_p1), %s6018_s27, 4096, %s6016_s17, %s2983_s15, %s4524_s18, %s4524_s18, %s4525_s9  }
 0x4c1 PF: > { %s3012_s23 = sand.u32 1, %s4494_s30   ;;  %p6148_p2 = scmp.ne.s32.totalorder %s6089_s20, 0 }
 0x4c2   : > { %p6149_p8 = scmp.ge.s32.totalorder %s4506_s12, 2  ;;  %s3013_s16 = scalar_lea.sflag [#allocation4], %s3012_s23 }
 0x4c4   : > { %p4085_p4 = pnand %p6149_p8, %p6148_p2 }
 0x4c6   : > { %4489 = dma.done.wait (!%p4085_p4), %s3013_s16, 4096  }
 0x4c7   : > { %4491 = vsyncadd (!%p4085_p4), %s3013_s16, 4294963200  ;;  %p26_p10 = scmp.ge.s32.totalorder %s4796_s19, 4   ;;  %s6150_s30 = smov %s4498_s10 }
 0x4c8   : > { %s6151_s10 = smov %s4502_s11  ;;  %s6152_s11 = smov %s4807_s29 }
 0x4c9   : > { %s6153_s12 = smov %s4796_s19  ;;  %28 = sbr.rel (!%p26_p10) target bundleno = 11 (0xb), region = 133 }
 0x4d0   :  { %3018 = vsyncpa [#allocation3], 1 }
 0x4d1   :  { %3020 = vsyncpa [#allocation3 + $0x1], 1 }
 0x4d2   :  { %3021 = vsyncpa [#allocation6], 1 }
 0x4d3   :  { %3022 = vsyncpa [#allocation9], 1 }
 0x4d4   :  { %3023 = vsyncpa [#allocation12], 1 }
 0x4d5   :  { %3024 = vsyncpa [#allocation15], 1 }
 0x4d6   :  { %3025 = vsyncpa [#allocation4], 1 }
 0x4d7   :  { %3027 = vsyncpa [#allocation4 + $0x1], 1 }

</bundles_post_ra>
